<compile_context>
chip_gen: v5e
topology: v5e:2x2
jax: 0.10.0
libtpu: 0.0.40
codegen_flags: <defaults>
</compile_context>

<pallas_src>
import jax
import jax.numpy as jnp
from jax.experimental import pallas as pl
from jax.experimental.pallas import tpu as pltpu


def _round_up(x, m):
    return (x + m - 1) // m * m


def _decoder_kernel(z_ref,
                    w1_ref, b1_ref, w2_ref, b2_ref, w3_ref, b3_ref,
                    w4_ref, b4_ref, w5_ref, b5_ref,
                    o_ref):
    """Fused 5-layer MLP: relu x4 then sigmoid. All operands VMEM-resident.

    z_ref is bf16; weights bf16; biases f32 (1, n). Dots accumulate in f32;
    activations are re-cast to bf16 right after each ReLU to halve VMEM/vreg
    pressure (the cast would happen before the next MXU dot anyway).
    """

    def dense(h_bf16, w_ref, b_ref):
        y = jnp.dot(h_bf16, w_ref[...], preferred_element_type=jnp.float32)
        return y + b_ref[...]

    h = z_ref[...]  # bf16
    h = jnp.maximum(dense(h, w1_ref, b1_ref), 0.0).astype(jnp.bfloat16)
    h = jnp.maximum(dense(h, w2_ref, b2_ref), 0.0).astype(jnp.bfloat16)
    h = jnp.maximum(dense(h, w3_ref, b3_ref), 0.0).astype(jnp.bfloat16)
    h = jnp.maximum(dense(h, w4_ref, b4_ref), 0.0).astype(jnp.bfloat16)
    o_ref[...] = jax.nn.sigmoid(dense(h, w5_ref, b5_ref)).astype(o_ref.dtype)


def decoder_forward(params, z, *, tile_b=512):
    """params: list of 5 (w, b); w: (in, out) bf16, b: (out,) f32.
    z: (B, latent_dims) f32. Returns sigmoid output (B, output_dim) f32."""
    B, latent = z.shape
    out_dim = params[-1][0].shape[1]
    n_layers = len(params)

    # --- lane-dense padding of the input/output feature dims -------------
    lat_pad = _round_up(max(latent, 1), 128)
    out_pad = _round_up(out_dim, 128)

    z_bf = z.astype(jnp.bfloat16)
    if lat_pad != latent:
        z_bf = jnp.pad(z_bf, ((0, 0), (0, lat_pad - latent)))

    padded = []
    for i, (w, b) in enumerate(params):
        w = w.astype(jnp.bfloat16)
        b = b.astype(jnp.float32)
        if i == 0 and lat_pad != latent:
            w = jnp.pad(w, ((0, lat_pad - latent), (0, 0)))
        if i == n_layers - 1 and out_pad != out_dim:
            w = jnp.pad(w, ((0, 0), (0, out_pad - out_dim)))
            b = jnp.pad(b, (0, out_pad - out_dim))
        padded.append((w, b.reshape(1, -1)))

    # --- batch tiling ------------------------------------------------------
    use_grid = B > 256
    if use_grid:
        tb = tile_b
        b_pad = _round_up(B, tb)
    else:
        tb = B
        b_pad = B
    if b_pad != B:
        z_bf = jnp.pad(z_bf, ((0, b_pad - B), (0, 0)))

    flat_args = []
    flops = 0
    bytes_acc = z_bf.size * z_bf.dtype.itemsize + b_pad * out_pad * 4
    for w, b in padded:
        k, n = w.shape
        flops += 2 * b_pad * k * n
        bytes_acc += w.size * w.dtype.itemsize + b.size * b.dtype.itemsize
        flat_args += [w, b]

    cost = pl.CostEstimate(
        flops=flops,
        transcendentals=b_pad * out_pad,  # sigmoid on the final layer
        bytes_accessed=bytes_acc,
    )
    out_shape = jax.ShapeDtypeStruct((b_pad, out_pad), jnp.float32)

    if use_grid:
        # Tiled batch: z / out move per grid step; weights have a constant
        # index_map so they are fetched once and stay VMEM-resident.
        in_specs = [pl.BlockSpec((tb, lat_pad), lambda i: (i, 0))]
        for w, b in padded:
            in_specs.append(pl.BlockSpec(w.shape, lambda i: (0, 0)))
            in_specs.append(pl.BlockSpec(b.shape, lambda i: (0, 0)))
        out = pl.pallas_call(
            _decoder_kernel,
            out_shape=out_shape,
            grid=(b_pad // tb,),
            in_specs=in_specs,
            out_specs=pl.BlockSpec((tb, out_pad), lambda i: (i, 0)),
            compiler_params=pltpu.CompilerParams(
                dimension_semantics=("parallel",),
                vmem_limit_bytes=32 * 1024 * 1024,
            ),
            cost_estimate=cost,
        )(z_bf, *flat_args)
    else:
        # Tiny batch: single invocation, whole arrays resident in VMEM.
        n_inputs = 1 + len(flat_args)
        out = pl.pallas_call(
            _decoder_kernel,
            out_shape=out_shape,
            in_specs=[pl.BlockSpec(memory_space=pltpu.MemorySpace.VMEM)] * n_inputs,
            out_specs=pl.BlockSpec(memory_space=pltpu.MemorySpace.VMEM),
            compiler_params=pltpu.CompilerParams(
                vmem_limit_bytes=32 * 1024 * 1024,
            ),
            cost_estimate=cost,
        )(z_bf, *flat_args)

    return out[:B, :out_dim]


def _init_linear(key, fan_in, fan_out, w_dtype=jnp.bfloat16):
    """PyTorch nn.Linear-style U(-1/sqrt(fan_in), +1/sqrt(fan_in)) init.
    Weight stored transposed as (in, out) so y = x @ W + b."""
    kw, kb = jax.random.split(key)
    bound = 1.0 / jnp.sqrt(float(fan_in))
    w = jax.random.uniform(kw, (fan_in, fan_out), jnp.float32, -bound, bound)
    b = jax.random.uniform(kb, (fan_out,), jnp.float32, -bound, bound)
    return w.astype(w_dtype), b


def init_decoder_params(key, latent_dims, output_dim, w_dtype=jnp.bfloat16):
    dims = [latent_dims, 256, 512, 1024, 512, output_dim]
    keys = jax.random.split(key, len(dims) - 1)
    return [_init_linear(keys[i], dims[i], dims[i + 1], w_dtype)
            for i in range(len(dims) - 1)]


def decoder_reference(params, z):
    """Plain-JAX reference (weights upcast to f32) for a tolerance check."""
    h = z.astype(jnp.float32)
    last = len(params) - 1
    for i, (w, b) in enumerate(params):
        h = jnp.dot(h, w.astype(jnp.float32)) + b
        h = jax.nn.sigmoid(h) if i == last else jnp.maximum(h, 0.0)
    return h


def _check(params, z, out_dim):
    out = jax.block_until_ready(decoder_forward(params, z))
    assert out.shape == (z.shape[0], out_dim), out.shape
    assert out.dtype == jnp.float32
    assert bool(jnp.all(out >= 0.0)) and bool(jnp.all(out <= 1.0))
    ref = decoder_reference(params, z)
    max_err = float(jnp.max(jnp.abs(out - ref)))
    assert max_err < 3e-2, max_err


if __name__ == "__main__":
    key = jax.random.PRNGKey(0)
    k_z1, k_p1, k_z2, k_p2 = jax.random.split(key, 4)

    # 1) Tiny-batch path (single invocation, whole-array VMEM residency):
    #    Decoder(latent_dims=32, output_dim=256), batch of 2.
    B1, latent1, out1 = 2, 32, 256
    z1 = jax.random.normal(k_z1, (B1, latent1), jnp.float32)
    params1 = init_decoder_params(k_p1, latent1, out1)
    _check(params1, z1, out1)

    # 2) Grid path (batch tiling + resident weights + output padding):
    #    non-multiple batch (700) and non-multiple-of-128 output (784).
    B2, latent2, out2 = 700, 32, 784
    z2 = jax.random.normal(k_z2, (B2, latent2), jnp.float32)
    params2 = init_decoder_params(k_p2, latent2, out2)
    _check(params2, z2, out2)

    print("KERNEL_OK")
</pallas_src>

<mosaic_0001>
module attributes {stable_mosaic.version = 11 : i64} {
  func.func @_decoder_kernel(%arg0: memref<2x128xbf16, #tpu.memory_space<vmem>>, %arg1: memref<128x256xbf16, #tpu.memory_space<vmem>>, %arg2: memref<1x256xf32, #tpu.memory_space<vmem>>, %arg3: memref<256x512xbf16, #tpu.memory_space<vmem>>, %arg4: memref<1x512xf32, #tpu.memory_space<vmem>>, %arg5: memref<512x1024xbf16, #tpu.memory_space<vmem>>, %arg6: memref<1x1024xf32, #tpu.memory_space<vmem>>, %arg7: memref<1024x512xbf16, #tpu.memory_space<vmem>>, %arg8: memref<1x512xf32, #tpu.memory_space<vmem>>, %arg9: memref<512x256xbf16, #tpu.memory_space<vmem>>, %arg10: memref<1x256xf32, #tpu.memory_space<vmem>>, %arg11: memref<2x256xf32, #tpu.memory_space<vmem>>) attributes {dimension_semantics = [], scalar_prefetch = 0 : i64, scratch_operands = 0 : i64, tpu.core_type = #tpu.core_type<tc>} {
    %c0 = arith.constant 0 : index
    %c0_0 = arith.constant 0 : index
    %0 = vector.load %arg0[%c0, %c0_0] : memref<2x128xbf16, #tpu.memory_space<vmem>>, vector<2x128xbf16>
    %c0_1 = arith.constant 0 : index
    %c0_2 = arith.constant 0 : index
    %1 = vector.load %arg1[%c0_1, %c0_2] : memref<128x256xbf16, #tpu.memory_space<vmem>>, vector<128x256xbf16>
    %cst = arith.constant dense<0.000000e+00> : vector<2x256xf32>
    %2 = tpu.matmul %0, %1, %cst {dimension_numbers = #tpu.dot_dimension_numbers<[1], [0], [0], [1], [0, 0, 1, 1], [], []>} : vector<2x128xbf16>, vector<128x256xbf16>, vector<2x256xf32> -> vector<2x256xf32>
    %c0_3 = arith.constant 0 : index
    %c0_4 = arith.constant 0 : index
    %3 = vector.load %arg2[%c0_3, %c0_4] : memref<1x256xf32, #tpu.memory_space<vmem>>, vector<1x256xf32>
    %4 = vector.broadcast %3 : vector<1x256xf32> to vector<2x256xf32>
    %5 = arith.addf %2, %4 : vector<2x256xf32>
    %cst_5 = arith.constant 0.000000e+00 : f32
    %6 = vector.broadcast %cst_5 : f32 to vector<2x256xf32>
    %7 = arith.maximumf %5, %6 : vector<2x256xf32>
    %8 = arith.truncf %7 : vector<2x256xf32> to vector<2x256xbf16>
    %c0_6 = arith.constant 0 : index
    %c0_7 = arith.constant 0 : index
    %9 = vector.load %arg3[%c0_6, %c0_7] : memref<256x512xbf16, #tpu.memory_space<vmem>>, vector<256x512xbf16>
    %cst_8 = arith.constant dense<0.000000e+00> : vector<2x512xf32>
    %10 = tpu.matmul %8, %9, %cst_8 {dimension_numbers = #tpu.dot_dimension_numbers<[1], [0], [0], [1], [0, 0, 1, 1], [], []>} : vector<2x256xbf16>, vector<256x512xbf16>, vector<2x512xf32> -> vector<2x512xf32>
    %c0_9 = arith.constant 0 : index
    %c0_10 = arith.constant 0 : index
    %11 = vector.load %arg4[%c0_9, %c0_10] : memref<1x512xf32, #tpu.memory_space<vmem>>, vector<1x512xf32>
    %12 = vector.broadcast %11 : vector<1x512xf32> to vector<2x512xf32>
    %13 = arith.addf %10, %12 : vector<2x512xf32>
    %cst_11 = arith.constant 0.000000e+00 : f32
    %14 = vector.broadcast %cst_11 : f32 to vector<2x512xf32>
    %15 = arith.maximumf %13, %14 : vector<2x512xf32>
    %16 = arith.truncf %15 : vector<2x512xf32> to vector<2x512xbf16>
    %c0_12 = arith.constant 0 : index
    %c0_13 = arith.constant 0 : index
    %17 = vector.load %arg5[%c0_12, %c0_13] : memref<512x1024xbf16, #tpu.memory_space<vmem>>, vector<512x1024xbf16>
    %cst_14 = arith.constant dense<0.000000e+00> : vector<2x1024xf32>
    %18 = tpu.matmul %16, %17, %cst_14 {dimension_numbers = #tpu.dot_dimension_numbers<[1], [0], [0], [1], [0, 0, 1, 1], [], []>} : vector<2x512xbf16>, vector<512x1024xbf16>, vector<2x1024xf32> -> vector<2x1024xf32>
    %c0_15 = arith.constant 0 : index
    %c0_16 = arith.constant 0 : index
    %19 = vector.load %arg6[%c0_15, %c0_16] : memref<1x1024xf32, #tpu.memory_space<vmem>>, vector<1x1024xf32>
    %20 = vector.broadcast %19 : vector<1x1024xf32> to vector<2x1024xf32>
    %21 = arith.addf %18, %20 : vector<2x1024xf32>
    %cst_17 = arith.constant 0.000000e+00 : f32
    %22 = vector.broadcast %cst_17 : f32 to vector<2x1024xf32>
    %23 = arith.maximumf %21, %22 : vector<2x1024xf32>
    %24 = arith.truncf %23 : vector<2x1024xf32> to vector<2x1024xbf16>
    %c0_18 = arith.constant 0 : index
    %c0_19 = arith.constant 0 : index
    %25 = vector.load %arg7[%c0_18, %c0_19] : memref<1024x512xbf16, #tpu.memory_space<vmem>>, vector<1024x512xbf16>
    %cst_20 = arith.constant dense<0.000000e+00> : vector<2x512xf32>
    %26 = tpu.matmul %24, %25, %cst_20 {dimension_numbers = #tpu.dot_dimension_numbers<[1], [0], [0], [1], [0, 0, 1, 1], [], []>} : vector<2x1024xbf16>, vector<1024x512xbf16>, vector<2x512xf32> -> vector<2x512xf32>
    %c0_21 = arith.constant 0 : index
    %c0_22 = arith.constant 0 : index
    %27 = vector.load %arg8[%c0_21, %c0_22] : memref<1x512xf32, #tpu.memory_space<vmem>>, vector<1x512xf32>
    %28 = vector.broadcast %27 : vector<1x512xf32> to vector<2x512xf32>
    %29 = arith.addf %26, %28 : vector<2x512xf32>
    %cst_23 = arith.constant 0.000000e+00 : f32
    %30 = vector.broadcast %cst_23 : f32 to vector<2x512xf32>
    %31 = arith.maximumf %29, %30 : vector<2x512xf32>
    %32 = arith.truncf %31 : vector<2x512xf32> to vector<2x512xbf16>
    %c0_24 = arith.constant 0 : index
    %c0_25 = arith.constant 0 : index
    %33 = vector.load %arg9[%c0_24, %c0_25] : memref<512x256xbf16, #tpu.memory_space<vmem>>, vector<512x256xbf16>
    %cst_26 = arith.constant dense<0.000000e+00> : vector<2x256xf32>
    %34 = tpu.matmul %32, %33, %cst_26 {dimension_numbers = #tpu.dot_dimension_numbers<[1], [0], [0], [1], [0, 0, 1, 1], [], []>} : vector<2x512xbf16>, vector<512x256xbf16>, vector<2x256xf32> -> vector<2x256xf32>
    %c0_27 = arith.constant 0 : index
    %c0_28 = arith.constant 0 : index
    %35 = vector.load %arg10[%c0_27, %c0_28] : memref<1x256xf32, #tpu.memory_space<vmem>>, vector<1x256xf32>
    %36 = vector.broadcast %35 : vector<1x256xf32> to vector<2x256xf32>
    %37 = arith.addf %34, %36 : vector<2x256xf32>
    %38 = arith.negf %37 : vector<2x256xf32>
    %39 = math.exp %38 : vector<2x256xf32>
    %cst_29 = arith.constant 1.000000e+00 : f32
    %40 = vector.broadcast %cst_29 : f32 to vector<2x256xf32>
    %41 = arith.addf %40, %39 : vector<2x256xf32>
    %42 = arith.divf %40, %41 : vector<2x256xf32>
    %c0_30 = arith.constant 0 : index
    %c0_31 = arith.constant 0 : index
    %43 = vector.load %arg11[%c0_30, %c0_31] : memref<2x256xf32, #tpu.memory_space<vmem>>, vector<2x256xf32>
    tpu.vector_store %arg11[%c0_30, %c0_31], %42 {strides = array<i32>} : memref<2x256xf32, #tpu.memory_space<vmem>>, vector<2x256xf32>,
    return
  }
}

</mosaic_0001>

<bundles_post_ra>
// kernel: tpu_custom_call.1
= control target key start
LH: loop header
LB: loop body
LE: loop exit
PB: predicated region body
PF: predicated region fallthrough
CT: control target
= control target key end

     0   :  { %16 = vsyncpa [#allocation3], 0  ;;  %s9226_s0 = inlined_call_operand.hbm [shape: bf16[2,128], index: 0, kind: input, shape index: {}]   ;;  %s9227_s1 = inlined_call_operand.hbm [shape: bf16[128,256], index: 1, kind: input, shape index: {}]   ;;  %s9228_s2 = inlined_call_operand.hbm [shape: f32[1,256], index: 2, kind: input, shape index: {}]   ;;  %s9229_s3 = inlined_call_operand.hbm [shape: bf16[256,512], index: 3, kind: input, shape index: {}]   ;;  %s9230_s4 = inlined_call_operand.hbm [shape: f32[1,512], index: 4, kind: input, shape index: {}]   ;;  %s9231_s5 = inlined_call_operand.hbm [shape: bf16[512,1024], index: 5, kind: input, shape index: {}]   ;;  %s9232_s6 = inlined_call_operand.hbm [shape: f32[1,1024], index: 6, kind: input, shape index: {}]   ;;  %s9233_s7 = inlined_call_operand.hbm [shape: bf16[1024,512], index: 7, kind: input, shape index: {}]   ;;  %s9234_s8 = inlined_call_operand.vmem [shape: f32[1,512], index: 8, kind: input, shape index: {}]   ;;  %s9235_s9 = inlined_call_operand.hbm [shape: bf16[512,256], index: 9, kind: input, shape index: {}]   ;;  %s9236_s10 = inlined_call_operand.vmem [shape: f32[1,256], index: 10, kind: input, shape index: {}]   ;;  %s9237_s11 = inlined_call_operand.hbm [shape: f32[2,256], index: 11, kind: output, shape index: {}]  }
   0x1   :  { %17 = vsyncpa [#allocation6], 0 }
   0x2   :  { %18 = vsyncpa [#allocation9], 0 }
   0x3   :  { %19 = vsyncpa [#allocation12], 0 }
   0x4   :  { %20 = vsyncpa [#allocation15], 0  ;;  %s37_s19 = sshll.u32 %s9227_s1, 4  ;;  %s38_s19 = int_to_ptr.hbm [resolvable:$true] %s37_s19 }
   0x5   :  { %21 = vsyncpa [#allocation4], 0  ;;  %s8886_s20 = smov [#allocation5]   ;;  %s61_s24 = sshll.u32 %s9229_s3, 4  ;;  %s62_s24 = int_to_ptr.hbm [resolvable:$true] %s61_s24 }
   0x6   :  { %s39_s21 = sshll.u32 %s8886_s20, 4  ;;  %s8887_s25 = smov 128   ;;  %s40_s21 = int_to_ptr.vmem [resolvable:$true] %s39_s21 }
   0x7   :  { %s8888_s26 = smov 8   ;;  %s8889_s27 = smov [#allocation8]  }
   0x8   :  { %45 = dma.hbm_to_vmem [thread:$0]  %s38_s19, 2048, %s40_s21, [#allocation6], %s8887_s25, %s8887_s25, %s8888_s26  }
   0x9   :  { %s63_s28 = sshll.u32 %s8889_s27, 4  ;;  %s8890_s1 = smov 256   ;;  %s64_s28 = int_to_ptr.vmem [resolvable:$true] %s63_s28 }
   0xa   :  { %s8891_s29 = smov 16   ;;  %s85_s13 = sshll.u32 %s9231_s5, 4  ;;  %s86_s13 = int_to_ptr.hbm [resolvable:$true] %s85_s13 }
   0xb   :  { %69 = dma.hbm_to_vmem [thread:$0]  %s62_s24, 8192, %s64_s28, [#allocation9], %s8890_s1, %s8890_s1, %s8891_s29  }
   0xc   :  { %s8892_s14 = smov [#allocation11]   ;;  %s109_s17 = sshll.u32 %s9233_s7, 4  ;;  %s110_s17 = int_to_ptr.hbm [resolvable:$true] %s109_s17 }
   0xd   :  { %s87_s3 = sshll.u32 %s8892_s14, 4  ;;  %s8893_s18 = smov 512   ;;  %s88_s3 = int_to_ptr.vmem [resolvable:$true] %s87_s3 }
   0xe   :  { %s8894_s19 = smov 32   ;;  %s8895_s20 = smov [#allocation14]  }
   0xf   :  { %93 = dma.hbm_to_vmem [thread:$0]  %s86_s13, 32768, %s88_s3, [#allocation12], %s8893_s18, %s8893_s18, %s8894_s19  }
  0x10   :  { %s111_s21 = sshll.u32 %s8895_s20, 4  ;;  %s27_s24 = sshll.u32 %s9226_s0, 4  ;;  %s112_s21 = int_to_ptr.vmem [resolvable:$true] %s111_s21  ;;  %s28_s24 = int_to_ptr.hbm [resolvable:$true] %s27_s24 }
  0x11   :  { %117 = dma.hbm_to_vmem [thread:$0]  %s110_s17, 32768, %s112_s21, [#allocation15], %s8890_s1, %s8890_s1, %s8891_s29  }
  0x12   :  { %s51_s28 = sshll.u32 %s9228_s2, 4  ;;  %s8896_s30 = smov [#allocation2]   ;;  %s52_s28 = int_to_ptr.hbm [resolvable:$true] %s51_s28 }
  0x13   :  { %s29_s12 = sshll.u32 %s8896_s30, 4  ;;  %s8897_s7 = smov [#allocation7]   ;;  %s30_s12 = int_to_ptr.vmem [resolvable:$true] %s29_s12 }
  0x14   :  { %32 = dma.hbm_to_vmem [thread:$0]  %s28_s24, 16, %s30_s12, [#allocation3]  }
  0x15   :  { %s53_s13 = sshll.u32 %s8897_s7, 4  ;;  %s75_s15 = sshll.u32 %s9230_s4, 4  ;;  %s54_s13 = int_to_ptr.vmem [resolvable:$true] %s53_s13  ;;  %s76_s15 = int_to_ptr.hbm [resolvable:$true] %s75_s15 }
  0x16   :  { %56 = dma.hbm_to_vmem [thread:$0]  %s52_s28, 32, %s54_s13, [#allocation6]  }
  0x17   :  { %s99_s29 = sshll.u32 %s9232_s6, 4  ;;  %s8898_s16 = smov [#allocation10]   ;;  %s100_s29 = int_to_ptr.hbm [resolvable:$true] %s99_s29 }
  0x18   :  { %s77_s2 = sshll.u32 %s8898_s16, 4  ;;  %s8899_s17 = smov [#allocation13]   ;;  %s78_s2 = int_to_ptr.vmem [resolvable:$true] %s77_s2 }
  0x19   :  { %80 = dma.hbm_to_vmem [thread:$0]  %s76_s15, 64, %s78_s2, [#allocation9]  }
  0x1a   :  { %s101_s18 = sshll.u32 %s8899_s17, 4  ;;  %s124_s21 = sshll.u32 %s9235_s9, 4  ;;  %s102_s18 = int_to_ptr.vmem [resolvable:$true] %s101_s18  ;;  %s125_s21 = int_to_ptr.hbm [resolvable:$true] %s124_s21 }
  0x1b   :  { %104 = dma.hbm_to_vmem [thread:$0]  %s100_s29, 128, %s102_s18, [#allocation12]  }
  0x1c   :  { %s8900_s4 = smov [#allocation16]  }
  0x1d   :  { %s126_s22 = sshll.u32 %s8900_s4, 4  ;;  %s127_s22 = int_to_ptr.vmem [resolvable:$true] %s126_s22 }
  0x1e   :  { %132 = dma.hbm_to_vmem [thread:$0]  %s125_s21, 8192, %s127_s22, [#allocation15], %s8887_s25, %s8887_s25, %s8888_s26  }
  0x1f   :  { %8874 = dma.done.wait [#allocation3], 16  }
  0x20   :  { %8875 = vsyncadd [#allocation3], 4294967280 }
  0x21   :  { %8876 = dma.done.wait [#allocation6], 2080  }
  0x22   :  { %8877 = vsyncadd [#allocation6], 4294965216 }
  0x23   :  { %8878 = dma.done.wait [#allocation9], 8256  }
  0x24   :  { %8879 = vsyncadd [#allocation9], 4294959040 }
  0x25   :  { %8880 = dma.done.wait [#allocation12], 32896  }
  0x26   :  { %8881 = vsyncadd [#allocation12], 4294934400 }
  0x27   :  { %8882 = dma.done.wait [#allocation15], 40960  }
  0x28   :  { %8883 = vsyncadd [#allocation15], 4294926336  ;;  %v5384_v0 = vld [vmem:[#allocation5 + $0x70] sm:$0xf]  ;;  %v7967_v1 = vld [vmem:[#allocation5 + $0x74] sm:$0xf0] }
  0x29   :  { %v7966_v2 = vld [vmem:[#allocation5 + $0x74] sm:$0xf]  ;;  %v5385_v3 = vor.u32 %v7967_v1, %v5384_v0  ;;  %v5386_v4 = vld [vmem:[#allocation5 + $0x78] sm:$0xf0]  ;;  %v5376_v5 = vld [vmem:[#allocation5 + $0x60] sm:$0xf] }
  0x2a   :  { %v7965_v6 = vld [vmem:[#allocation5 + $0x64] sm:$0xf0]  ;;  %v5389_v7 = vor.u32 %v7966_v2, %v5386_v4  ;;  %v7964_v8 = vld [vmem:[#allocation5 + $0x64] sm:$0xf]  ;;  %v5378_v9 = vld [vmem:[#allocation5 + $0x68] sm:$0xf0] }
  0x2b   :  { %274 = vmatpush.bf16.msra.mxu0 %v5385_v3  ;;  %v5377_v10 = vor.u32 %v7965_v6, %v5376_v5  ;;  %v5381_v11 = vor.u32 %v7964_v8, %v5378_v9  ;;  %v5368_v12 = vld [vmem:[#allocation5 + $0x50] sm:$0xf]  ;;  %v7963_v13 = vld [vmem:[#allocation5 + $0x54] sm:$0xf0]  ;;  %v7962_v14 = vld [vmem:[#allocation5 + $0x54] sm:$0xf] }
  0x2c   :  { %287 = vmatpush.bf16.msra.mxu1 %v5389_v7  ;;  %v5370_v15 = vld [vmem:[#allocation5 + $0x58] sm:$0xf0]  ;;  %v5369_v16 = vor.u32 %v7963_v13, %v5368_v12  ;;  %v5360_v18 = vld [vmem:[#allocation5 + $0x40] sm:$0xf]  ;;  %v7961_v19 = vld [vmem:[#allocation5 + $0x44] sm:$0xf0] }
  0x2d   :  { %v5373_v17 = vor.u32 %v7962_v14, %v5370_v15  ;;  %v7960_v20 = vld [vmem:[#allocation5 + $0x44] sm:$0xf]  ;;  %v5362_v21 = vld [vmem:[#allocation5 + $0x48] sm:$0xf0]  ;;  %v5361_v22 = vor.u32 %v7961_v19, %v5360_v18  ;;  %v7998_v24 = vld [vmem:[#allocation8 + $0xec] sm:$0xf0] }
  0x2e   :  { %v5504_v23 = vld [vmem:[#allocation8 + $0xe0] sm:$0xf]  ;;  %v5365_v26 = vor.u32 %v7960_v20, %v5362_v21  ;;  %v5352_v27 = vld [vmem:[#allocation5 + $0x30] sm:$0xf]  ;;  %v7959_v28 = vld [vmem:[#allocation5 + $0x34] sm:$0xf0] }
  0x2f   :  { %275 = vmatpush.bf16.msra.mxu0 %v5377_v10  ;;  %v5632_v25 = vld [vmem:[#allocation8 + $0x1e0] sm:$0xf]  ;;  %v5505_v29 = vor.u32 %v7998_v24, %v5504_v23  ;;  %v8030_v30 = vld [vmem:[#allocation8 + $0x1ec] sm:$0xf0]  ;;  %v5354_v32 = vld [vmem:[#allocation5 + $0x38] sm:$0xf0]  ;;  %v5353_v38 = vor.u32 %v7959_v28, %v5352_v27 }
  0x30   :  { %288 = vmatpush.bf16.msra.mxu1 %v5381_v11  ;;  %v7958_v31 = vld [vmem:[#allocation5 + $0x34] sm:$0xf]  ;;  %v5633_v33 = vor.u32 %v8030_v30, %v5632_v25  ;;  %v5488_v34 = vld [vmem:[#allocation8 + $0xc0] sm:$0xf]  ;;  %v7957_v40 = vld [vmem:[#allocation5 + $0x24] sm:$0xf0] }
  0x31   :  { %698 = vmatpush.bf16.msra.mxu2 %v5505_v29  ;;  %v7994_v35 = vld [vmem:[#allocation8 + $0xcc] sm:$0xf0]  ;;  %v5616_v36 = vld [vmem:[#allocation8 + $0x1c0] sm:$0xf]  ;;  %v5357_v43 = vor.u32 %v7958_v31, %v5354_v32  ;;  %v5346_v47 = vld [vmem:[#allocation5 + $0x28] sm:$0xf0] }
  0x32   :  { %v8026_v37 = vld [vmem:[#allocation8 + $0x1cc] sm:$0xf0]  ;;  %v5344_v39 = vld [vmem:[#allocation5 + $0x20] sm:$0xf]  ;;  %711 = vmatpush.bf16.msra.mxu3 %v5633_v33  ;;  %v5489_v41 = vor.u32 %v7994_v35, %v5488_v34  ;;  %v7956_v44 = vld [vmem:[#allocation5 + $0x24] sm:$0xf] }
  0x33   :  { %276 = vmatpush.bf16.msra.mxu0 %v5369_v16  ;;  %v5617_v42 = vor.u32 %v8026_v37, %v5616_v36  ;;  %v5472_v45 = vld [vmem:[#allocation8 + $0xa0] sm:$0xf]  ;;  %v7990_v46 = vld [vmem:[#allocation8 + $0xac] sm:$0xf0]  ;;  %v5345_v51 = vor.u32 %v7957_v40, %v5344_v39  ;;  %v5349_v56 = vor.u32 %v7956_v44, %v5346_v47  ;;  %v7955_v57 = vld [vmem:[#allocation5 + $0x14] sm:$0xf0] }
  0x34   :  { %289 = vmatpush.bf16.msra.mxu1 %v5373_v17  ;;  %v5600_v48 = vld [vmem:[#allocation8 + $0x1a0] sm:$0xf]  ;;  %v8022_v49 = vld [vmem:[#allocation8 + $0x1ac] sm:$0xf0]  ;;  %v5473_v50 = vor.u32 %v7990_v46, %v5472_v45  ;;  %v5338_v61 = vld [vmem:[#allocation5 + $0x18] sm:$0xf0] }
  0x35   :  { %699 = vmatpush.bf16.msra.mxu2 %v5489_v41  ;;  %v5336_v52 = vld [vmem:[#allocation5 + $0x10] sm:$0xf]  ;;  %v5601_v53 = vor.u32 %v8022_v49, %v5600_v48  ;;  %v5456_v54 = vld [vmem:[#allocation8 + $0x80] sm:$0xf]  ;;  %v7954_v60 = vld [vmem:[#allocation5 + $0x14] sm:$0xf] }
  0x36   :  { %712 = vmatpush.bf16.msra.mxu3 %v5617_v42  ;;  %v7986_v55 = vld [vmem:[#allocation8 + $0x8c] sm:$0xf0]  ;;  %v5584_v58 = vld [vmem:[#allocation8 + $0x180] sm:$0xf]  ;;  %v5337_v0 = vor.u32 %v7955_v57, %v5336_v52  ;;  %v7953_v1 = vld [vmem:[#allocation5 + $0x4] sm:$0xf0]  ;;  %v5341_v5 = vor.u32 %v7954_v60, %v5338_v61 }
  0x37   :  { %277 = vmatpush.bf16.msra.mxu0 %v5361_v22  ;;  %v8018_v59 = vld [vmem:[#allocation8 + $0x18c] sm:$0xf0]  ;;  %v5328_v62 = vld [vmem:[#allocation5] sm:$0xf]  ;;  %v5457_v63 = vor.u32 %v7986_v55, %v5456_v54  ;;  %v7952_v6 = vld [vmem:[#allocation5 + $0x4] sm:$0xf] }
  0x38   :  { %290 = vmatpush.bf16.msra.mxu1 %v5365_v26  ;;  %v5585_v2 = vor.u32 %v8018_v59, %v5584_v58  ;;  %v5440_v3 = vld [vmem:[#allocation8 + $0x60] sm:$0xf]  ;;  %v7982_v4 = vld [vmem:[#allocation8 + $0x6c] sm:$0xf0]  ;;  %v5330_v9 = vld [vmem:[#allocation5 + $0x8] sm:$0xf0]  ;;  %v5329_v15 = vor.u32 %v7953_v1, %v5328_v62 }
  0x39   :  { %700 = vmatpush.bf16.msra.mxu2 %v5473_v50  ;;  %v5568_v7 = vld [vmem:[#allocation8 + $0x160] sm:$0xf]  ;;  %v8014_v8 = vld [vmem:[#allocation8 + $0x16c] sm:$0xf0]  ;;  %v7996_v10 = vld [vmem:[#allocation8 + $0xe4] sm:$0xf]  ;;  %v5441_v14 = vor.u32 %v7982_v4, %v5440_v3  ;;  %v5333_v19 = vor.u32 %v7952_v6, %v5330_v9 }
  0x3a   :  { %713 = vmatpush.bf16.msra.mxu3 %v5601_v53  ;;  %v5506_v11 = vld [vmem:[#allocation8 + $0xf0] sm:$0xf0]  ;;  %v8028_v12 = vld [vmem:[#allocation8 + $0x1e4] sm:$0xf]  ;;  %v5569_v16 = vor.u32 %v8014_v8, %v5568_v7  ;;  %v5424_v17 = vld [vmem:[#allocation8 + $0x40] sm:$0xf] }
  0x3b   :  { %278 = vmatpush.bf16.msra.mxu0 %v5353_v38  ;;  %v5634_v13 = vld [vmem:[#allocation8 + $0x1f0] sm:$0xf0]  ;;  %v7978_v18 = vld [vmem:[#allocation8 + $0x4c] sm:$0xf0]  ;;  %v5509_v20 = vor.u32 %v7996_v10, %v5506_v11  ;;  %v5552_v21 = vld [vmem:[#allocation8 + $0x140] sm:$0xf] }
  0x3c   :  { %291 = vmatpush.bf16.msra.mxu1 %v5357_v43  ;;  %v8010_v22 = vld [vmem:[#allocation8 + $0x14c] sm:$0xf0]  ;;  %v5637_v23 = vor.u32 %v8028_v12, %v5634_v13  ;;  %v7992_v24 = vld [vmem:[#allocation8 + $0xc4] sm:$0xf]  ;;  %v5490_v25 = vld [vmem:[#allocation8 + $0xd0] sm:$0xf0]  ;;  %v5425_v28 = vor.u32 %v7978_v18, %v5424_v17 }
  0x3d   :  { %701 = vmatpush.bf16.msra.mxu2 %v5457_v63  ;;  %v8024_v26 = vld [vmem:[#allocation8 + $0x1c4] sm:$0xf]  ;;  %v5618_v27 = vld [vmem:[#allocation8 + $0x1d0] sm:$0xf0]  ;;  %v171_v29 = vld [vmem:[#allocation2] sm:$0x1]  ;;  %v5553_v30 = vor.u32 %v8010_v22, %v5552_v21  ;;  %v5493_v33 = vor.u32 %v7992_v24, %v5490_v25 }
  0x3e   :  { %714 = vmatpush.bf16.msra.mxu3 %v5585_v2  ;;  %v5408_v31 = vld [vmem:[#allocation8 + $0x20] sm:$0xf]  ;;  %v7974_v32 = vld [vmem:[#allocation8 + $0x2c] sm:$0xf0]  ;;  %v5621_v36 = vor.u32 %v8024_v26, %v5618_v27  ;;  %v7988_v37 = vld [vmem:[#allocation8 + $0xa4] sm:$0xf] }
  0x3f   :  { %279 = vmatpush.bf16.msra.mxu0 %v5345_v51  ;;  %v5536_v34 = vld [vmem:[#allocation8 + $0x120] sm:$0xf]  ;;  %v8006_v35 = vld [vmem:[#allocation8 + $0x12c] sm:$0xf0]  ;;  %v5474_v38 = vld [vmem:[#allocation8 + $0xb0] sm:$0xf0]  ;;  %v5409_v41 = vor.u32 %v7974_v32, %v5408_v31 }
  0x40   :  { %292 = vmatpush.bf16.msra.mxu1 %v5349_v56  ;;  %v8020_v39 = vld [vmem:[#allocation8 + $0x1a4] sm:$0xf]  ;;  %v5602_v40 = vld [vmem:[#allocation8 + $0x1b0] sm:$0xf0]  ;;  %v5537_v43 = vor.u32 %v8006_v35, %v5536_v34  ;;  %v5392_v44 = vld [vmem:[#allocation8] sm:$0xf]  ;;  %v5477_v47 = vor.u32 %v7988_v37, %v5474_v38 }
  0x41   :  { %702 = vmatpush.bf16.msra.mxu2 %v5441_v14  ;;  %v7984_v42 = vld [vmem:[#allocation8 + $0x84] sm:$0xf]  ;;  %v7970_v45 = vld [vmem:[#allocation8 + $0xc] sm:$0xf0]  ;;  %v5520_v46 = vld [vmem:[#allocation8 + $0x100] sm:$0xf]  ;;  %v5605_v51 = vor.u32 %v8020_v39, %v5602_v40 }
  0x42   :  { %715 = vmatpush.bf16.msra.mxu3 %v5569_v16  ;;  %v8002_v48 = vld [vmem:[#allocation8 + $0x10c] sm:$0xf0]  ;;  %v5512_v49 = vld [vmem:[#allocation8 + $0xe8] sm:$0xf]  ;;  %v7999_v50 = vld [vmem:[#allocation8 + $0xf4] sm:$0xf0]  ;;  %v5393_v57 = vor.u32 %v7970_v45, %v5392_v44 }
  0x43   :  { %280 = vmatpush.bf16.msra.mxu0 %v5337_v0  ;;  %v5458_v52 = vld [vmem:[#allocation8 + $0x90] sm:$0xf0]  ;;  %v5640_v53 = vld [vmem:[#allocation8 + $0x1e8] sm:$0xf]  ;;  %v8031_v54 = vld [vmem:[#allocation8 + $0x1f4] sm:$0xf0]  ;;  %v5521_v58 = vor.u32 %v8002_v48, %v5520_v46  ;;  %v5513_v59 = vor.u32 %v7999_v50, %v5512_v49 }
  0x44   :  { %293 = vmatpush.bf16.msra.mxu1 %v5341_v5  ;;  %v8016_v55 = vld [vmem:[#allocation8 + $0x184] sm:$0xf]  ;;  %v5586_v56 = vld [vmem:[#allocation8 + $0x190] sm:$0xf0]  ;;  %v5461_v60 = vor.u32 %v7984_v42, %v5458_v52  ;;  %v5641_v62 = vor.u32 %v8031_v54, %v5640_v53  ;;  %v5496_v63 = vld [vmem:[#allocation8 + $0xc8] sm:$0xf] }
  0x45   :  { %703 = vmatpush.bf16.msra.mxu2 %v5425_v28  ;;  %v7980_v61 = vld [vmem:[#allocation8 + $0x64] sm:$0xf]  ;;  %v7995_v0 = vld [vmem:[#allocation8 + $0xd4] sm:$0xf0]  ;;  %v5589_v1 = vor.u32 %v8016_v55, %v5586_v56  ;;  %v5442_v2 = vld [vmem:[#allocation8 + $0x70] sm:$0xf0] }
  0x46   :  { %716 = vmatpush.bf16.msra.mxu3 %v5553_v30  ;;  %v5624_v3 = vld [vmem:[#allocation8 + $0x1c8] sm:$0xf]  ;;  %v8027_v4 = vld [vmem:[#allocation8 + $0x1d4] sm:$0xf0]  ;;  %v8012_v5 = vld [vmem:[#allocation8 + $0x164] sm:$0xf]  ;;  %v5497_v7 = vor.u32 %v7995_v0, %v5496_v63  ;;  %v5445_v8 = vor.u32 %v7980_v61, %v5442_v2 }
  0x47   :  { %281 = vmatpush.bf16.msra.mxu0 %v5329_v15  ;;  %v5570_v6 = vld [vmem:[#allocation8 + $0x170] sm:$0xf0]  ;;  %v5625_v9 = vor.u32 %v8027_v4, %v5624_v3  ;;  %v7976_v11 = vld [vmem:[#allocation8 + $0x44] sm:$0xf]  ;;  %v7997_v27 = vld [vmem:[#allocation8 + $0xec] sm:$0xf] }
  0x48   :  { %294 = vmatpush.bf16.msra.mxu1 %v5333_v19  ;;  %v5573_v10 = vor.u32 %v8012_v5, %v5570_v6  ;;  %v5426_v12 = vld [vmem:[#allocation8 + $0x50] sm:$0xf0]  ;;  %v8008_v13 = vld [vmem:[#allocation8 + $0x144] sm:$0xf]  ;;  %v5514_v28 = vld [vmem:[#allocation8 + $0xf8] sm:$0xf0] }
  0x49   :  { %704 = vmatpush.bf16.msra.mxu2 %v5409_v41  ;;  %v5554_v14 = vld [vmem:[#allocation8 + $0x150] sm:$0xf0]  ;;  %v5429_v15 = vor.u32 %v7976_v11, %v5426_v12  ;;  %v7972_v17 = vld [vmem:[#allocation8 + $0x24] sm:$0xf]  ;;  %v5642_v30 = vld [vmem:[#allocation8 + $0x1f8] sm:$0xf0] }
  0x4a   :  { %282 = vmatmul.bf16.vlgmr.msra.gmra.mxu0 %v171_v29  ;;  %717 = vmatpush.bf16.msra.mxu3 %v5537_v43  ;;  %v5557_v16 = vor.u32 %v8008_v13, %v5554_v14  ;;  %v5410_v18 = vld [vmem:[#allocation8 + $0x30] sm:$0xf0]  ;;  %v8004_v19 = vld [vmem:[#allocation8 + $0x124] sm:$0xf]  ;;  %v7993_v35 = vld [vmem:[#allocation8 + $0xcc] sm:$0xf] }
  0x4b   :  { %724 = vmatpush.bf16.msrb.mxu0 %v5509_v20  ;;  %295 = vmatmul.bf16.vlgmr.msra.gmra.mxu1 %v171_v29  ;;  %v5538_v20 = vld [vmem:[#allocation8 + $0x130] sm:$0xf0]  ;;  %v5413_v21 = vor.u32 %v7972_v17, %v5410_v18  ;;  %v8000_v25 = vld [vmem:[#allocation8 + $0x104] sm:$0xf]  ;;  %v8029_v29 = vld [vmem:[#allocation8 + $0x1ec] sm:$0xf] }
  0x4c   :  { %737 = vmatpush.bf16.msrb.mxu1 %v5637_v23  ;;  %v5541_v22 = vor.u32 %v8004_v19, %v5538_v20  ;;  %v7968_v23 = vld [vmem:[#allocation8 + $0x4] sm:$0xf]  ;;  %v5394_v24 = vld [vmem:[#allocation8 + $0x10] sm:$0xf0]  ;;  %v5645_v34 = vor.u32 %v8029_v29, %v5642_v30  ;;  %v8025_v37 = vld [vmem:[#allocation8 + $0x1cc] sm:$0xf] }
  0x4d   :  { %705 = vmatpush.bf16.msra.mxu2 %v5393_v57  ;;  %v5522_v26 = vld [vmem:[#allocation8 + $0x110] sm:$0xf0]  ;;  %v5397_v31 = vor.u32 %v7968_v23, %v5394_v24  ;;  %v5626_v38 = vld [vmem:[#allocation8 + $0x1d8] sm:$0xf0]  ;;  %v5480_v41 = vld [vmem:[#allocation8 + $0xa8] sm:$0xf] }
  0x4e   :  { %718 = vmatpush.bf16.msra.mxu3 %v5521_v58  ;;  %v5525_v32 = vor.u32 %v8000_v25, %v5522_v26  ;;  %v5629_v40 = vor.u32 %v8025_v37, %v5626_v38  ;;  %v7991_v42 = vld [vmem:[#allocation8 + $0xb4] sm:$0xf0]  ;;  %v5608_v43 = vld [vmem:[#allocation8 + $0x1a8] sm:$0xf]  ;;  %v7989_v46 = vld [vmem:[#allocation8 + $0xac] sm:$0xf] }
  0x4f   :  { %725 = vmatpush.bf16.msrb.mxu0 %v5493_v33  ;;  %v5517_v33 = vor.u32 %v7997_v27, %v5514_v28  ;;  %v5481_v44 = vor.u32 %v7991_v42, %v5480_v41  ;;  %v8023_v45 = vld [vmem:[#allocation8 + $0x1b4] sm:$0xf0]  ;;  %v8021_v50 = vld [vmem:[#allocation8 + $0x1ac] sm:$0xf]  ;;  %v5464_v53 = vld [vmem:[#allocation8 + $0x88] sm:$0xf] }
  0x50   :  { %738 = vmatpush.bf16.msrb.mxu1 %v5621_v36  ;;  %v5498_v36 = vld [vmem:[#allocation8 + $0xd8] sm:$0xf0]  ;;  %v5609_v48 = vor.u32 %v8023_v45, %v5608_v43  ;;  %v7987_v54 = vld [vmem:[#allocation8 + $0x94] sm:$0xf0]  ;;  %v5592_v55 = vld [vmem:[#allocation8 + $0x188] sm:$0xf] }
  0x51   :  { %750 = vmatpush.bf16.msrb.mxu2 %v5513_v59  ;;  %v5501_v39 = vor.u32 %v7993_v35, %v5498_v36  ;;  %v5465_v56 = vor.u32 %v7987_v54, %v5464_v53  ;;  %v8019_v57 = vld [vmem:[#allocation8 + $0x194] sm:$0xf0]  ;;  %v7985_v58 = vld [vmem:[#allocation8 + $0x8c] sm:$0xf]  ;;  %v5466_v59 = vld [vmem:[#allocation8 + $0x98] sm:$0xf0] }
  0x52   :  { %763 = vmatpush.bf16.msrb.mxu3 %v5641_v62  ;;  %v5469_v61 = vor.u32 %v7985_v58, %v5466_v59  ;;  %v8017_v62 = vld [vmem:[#allocation8 + $0x18c] sm:$0xf]  ;;  %v5594_v63 = vld [vmem:[#allocation8 + $0x198] sm:$0xf0]  ;;  %v7983_v2 = vld [vmem:[#allocation8 + $0x74] sm:$0xf0] }
  0x53   :  { %726 = vmatpush.bf16.msrb.mxu0 %v5477_v47  ;;  %v5482_v47 = vld [vmem:[#allocation8 + $0xb8] sm:$0xf0]  ;;  %v5597_v0 = vor.u32 %v8017_v62, %v5594_v63  ;;  %v5576_v3 = vld [vmem:[#allocation8 + $0x168] sm:$0xf]  ;;  %v8015_v5 = vld [vmem:[#allocation8 + $0x174] sm:$0xf0] }
  0x54   :  { %739 = vmatpush.bf16.msrb.mxu1 %v5605_v51  ;;  %v5485_v49 = vor.u32 %v7989_v46, %v5482_v47  ;;  %v5610_v51 = vld [vmem:[#allocation8 + $0x1b8] sm:$0xf0]  ;;  %v7981_v6 = vld [vmem:[#allocation8 + $0x6c] sm:$0xf]  ;;  %v5432_v13 = vld [vmem:[#allocation8 + $0x48] sm:$0xf] }
  0x55   :  { %751 = vmatpush.bf16.msrb.mxu2 %v5497_v7  ;;  %v5613_v52 = vor.u32 %v8021_v50, %v5610_v51  ;;  %v5450_v7 = vld [vmem:[#allocation8 + $0x78] sm:$0xf0]  ;;  %v7979_v14 = vld [vmem:[#allocation8 + $0x54] sm:$0xf0]  ;;  %v7977_v18 = vld [vmem:[#allocation8 + $0x4c] sm:$0xf] }
  0x56   :  { %764 = vmatpush.bf16.msrb.mxu3 %v5625_v9  ;;  %v5453_v9 = vor.u32 %v7981_v6, %v5450_v7  ;;  %v5578_v11 = vld [vmem:[#allocation8 + $0x178] sm:$0xf0]  ;;  %v8011_v17 = vld [vmem:[#allocation8 + $0x154] sm:$0xf0]  ;;  %v5416_v24 = vld [vmem:[#allocation8 + $0x28] sm:$0xf] }
  0x57   :  { %727 = vmatpush.bf16.msrb.mxu0 %v5461_v60  ;;  %v5593_v60 = vor.u32 %v8019_v57, %v5592_v55  ;;  %v5434_v19 = vld [vmem:[#allocation8 + $0x58] sm:$0xf0]  ;;  %v7975_v26 = vld [vmem:[#allocation8 + $0x34] sm:$0xf0]  ;;  %v5544_v27 = vld [vmem:[#allocation8 + $0x128] sm:$0xf] }
  0x58   :  { %740 = vmatpush.bf16.msrb.mxu1 %v5589_v1  ;;  %v5448_v1 = vld [vmem:[#allocation8 + $0x68] sm:$0xf]  ;;  %v5562_v23 = vld [vmem:[#allocation8 + $0x158] sm:$0xf0]  ;;  %v8007_v28 = vld [vmem:[#allocation8 + $0x134] sm:$0xf0]  ;;  %v5417_v29 = vor.u32 %v7975_v26, %v5416_v24 }
  0x59   :  { %752 = vmatpush.bf16.msrb.mxu2 %v5481_v44  ;;  %v5449_v4 = vor.u32 %v7983_v2, %v5448_v1  ;;  %v7973_v30 = vld [vmem:[#allocation8 + $0x2c] sm:$0xf]  ;;  %v5546_v35 = vld [vmem:[#allocation8 + $0x138] sm:$0xf0]  ;;  %v5400_v36 = vld [vmem:[#allocation8 + $0x8] sm:$0xf] }
  0x5a   :  { %765 = vmatpush.bf16.msrb.mxu3 %v5609_v48  ;;  %v7971_v37 = vld [vmem:[#allocation8 + $0x14] sm:$0xf0]  ;;  %v7969_v41 = vld [vmem:[#allocation8 + $0xc] sm:$0xf]  ;;  %v5402_v42 = vld [vmem:[#allocation8 + $0x18] sm:$0xf0] }
  0x5b   :  { %728 = vmatpush.bf16.msrb.mxu0 %v5445_v8  ;;  %v5577_v8 = vor.u32 %v8015_v5, %v5576_v3  ;;  %v8001_v43 = vld [vmem:[#allocation8 + $0x10c] sm:$0xf]  ;;  %v5530_v44 = vld [vmem:[#allocation8 + $0x118] sm:$0xf0]  ;;  %v5401_v45 = vor.u32 %v7971_v37, %v5400_v36  ;;  %v5405_v47 = vor.u32 %v7969_v41, %v5402_v42  ;;  %v6128_v55 = vld [vmem:[#allocation11 + $0x3c0] sm:$0xf] }
  0x5c   :  { %741 = vmatpush.bf16.msrb.mxu1 %v5573_v10  ;;  %v8013_v10 = vld [vmem:[#allocation8 + $0x16c] sm:$0xf]  ;;  %v5533_v48 = vor.u32 %v8001_v43, %v5530_v44  ;;  %v5872_v57 = vld [vmem:[#allocation11 + $0x1c0] sm:$0xf]  ;;  %s5312_s28 = sshll.u32 %s9237_s11, 4  ;;  %vm5301_vm7 = vcmask 1041408   ;;  %s5313_s28 = int_to_ptr.hbm [resolvable:$true] %s5312_s28 }
  0x5d   :  { %753 = vmatpush.bf16.msrb.mxu2 %v5465_v56  ;;  %v5581_v12 = vor.u32 %v8013_v10, %v5578_v11  ;;  %v8156_v56 = vld [vmem:[#allocation11 + $0x3dc] sm:$0xf0] }
  0x5e   :  { %766 = vmatpush.bf16.msrb.mxu3 %v5593_v60  ;;  %v8092_v59 = vld [vmem:[#allocation11 + $0x1dc] sm:$0xf0]  ;;  %v6129_v3 = vor.u32 %v8156_v56, %v6128_v55 }
  0x5f   :  { %729 = vmatpush.bf16.msrb.mxu0 %v5429_v15  ;;  %v5560_v15 = vld [vmem:[#allocation8 + $0x148] sm:$0xf]  ;;  %v6640_v60 = vld [vmem:[#allocation11 + $0x7c0] sm:$0xf]  ;;  %v5873_v6 = vor.u32 %v8092_v59, %v5872_v57 }
  0x60   :  { %742 = vmatpush.bf16.msrb.mxu1 %v5557_v16  ;;  %v5433_v16 = vor.u32 %v7979_v14, %v5432_v13  ;;  %v5561_v20 = vor.u32 %v8011_v17, %v5560_v15  ;;  %v6384_v63 = vld [vmem:[#allocation11 + $0x5c0] sm:$0xf] }
  0x61   :  { %754 = vmatpush.bf16.msrb.mxu2 %v5449_v4  ;;  %v6096_v4 = vld [vmem:[#allocation11 + $0x380] sm:$0xf] }
  0x62   :  { %767 = vmatpush.bf16.msrb.mxu3 %v5577_v8  ;;  %v8148_v5 = vld [vmem:[#allocation11 + $0x39c] sm:$0xf0] }
  0x63   :  { %730 = vmatpush.bf16.msrb.mxu0 %v5413_v21  ;;  %v5437_v21 = vor.u32 %v7977_v18, %v5434_v19  ;;  %v5840_v8 = vld [vmem:[#allocation11 + $0x180] sm:$0xf]  ;;  %v6097_v18 = vor.u32 %v8148_v5, %v6096_v4 }
  0x64   :  { %743 = vmatpush.bf16.msrb.mxu1 %v5541_v22  ;;  %v8009_v22 = vld [vmem:[#allocation8 + $0x14c] sm:$0xf]  ;;  %v6608_v11 = vld [vmem:[#allocation11 + $0x780] sm:$0xf] }
  0x65   :  { %v5565_v25 = vor.u32 %v8009_v22, %v5562_v23  ;;  %755 = vmatpush.bf16.msrb.mxu2 %v5433_v16  ;;  %v8276_v13 = vld [vmem:[#allocation11 + $0x79c] sm:$0xf0] }
  0x66   :  { %768 = vmatpush.bf16.msrb.mxu3 %v5561_v20  ;;  %v6352_v14 = vld [vmem:[#allocation11 + $0x580] sm:$0xf]  ;;  %v6609_v24 = vor.u32 %v8276_v13, %v6608_v11 }
  0x67   :  { %731 = vmatpush.bf16.msrb.mxu0 %v5397_v31  ;;  %v5418_v31 = vld [vmem:[#allocation8 + $0x38] sm:$0xf0]  ;;  %v8212_v15 = vld [vmem:[#allocation11 + $0x59c] sm:$0xf0] }
  0x68   :  { %744 = vmatpush.bf16.msrb.mxu1 %v5525_v32  ;;  %v8005_v32 = vld [vmem:[#allocation8 + $0x12c] sm:$0xf]  ;;  %v6064_v19 = vld [vmem:[#allocation11 + $0x340] sm:$0xf]  ;;  %v6353_v26 = vor.u32 %v8212_v15, %v6352_v14 }
  0x69   :  { %v5549_v38 = vor.u32 %v8005_v32, %v5546_v35  ;;  %756 = vmatpush.bf16.msrb.mxu2 %v5417_v29  ;;  %v8140_v20 = vld [vmem:[#allocation11 + $0x35c] sm:$0xf0] }
  0x6a   :  { %v5808_v22 = vld [vmem:[#allocation11 + $0x140] sm:$0xf] }
  0x6b   :  { %776 = vmatpush.bf16.msra.mxu0 %v5517_v33  ;;  %v5545_v33 = vor.u32 %v8007_v28, %v5544_v27  ;;  %v8076_v23 = vld [vmem:[#allocation11 + $0x15c] sm:$0xf0] }
  0x6c   :  { %789 = vmatpush.bf16.msra.mxu1 %v5645_v34  ;;  %v5421_v34 = vor.u32 %v7973_v30, %v5418_v31  ;;  %v8268_v27 = vld [vmem:[#allocation11 + $0x75c] sm:$0xf0]  ;;  %v6065_v30 = vor.u32 %v8140_v20, %v6064_v19 }
  0x6d   :  { %769 = vmatpush.bf16.msrb.mxu3 %v5545_v33  ;;  %757 = vmatpush.bf16.msrb.mxu2 %v5401_v45  ;;  %v6320_v28 = vld [vmem:[#allocation11 + $0x540] sm:$0xf]  ;;  %v5809_v33 = vor.u32 %v8076_v23, %v5808_v22  ;;  %v6130_v23 = vld [vmem:[#allocation11 + $0x3e0] sm:$0xf0] }
  0x6e   :  { %v8204_v29 = vld [vmem:[#allocation11 + $0x55c] sm:$0xf0] }
  0x6f   :  { %777 = vmatpush.bf16.msra.mxu0 %v5501_v39  ;;  %v5528_v39 = vld [vmem:[#allocation8 + $0x108] sm:$0xf]  ;;  %v6032_v31 = vld [vmem:[#allocation11 + $0x300] sm:$0xf] }
  0x70   :  { %790 = vmatpush.bf16.msra.mxu1 %v5629_v40  ;;  %v8003_v40 = vld [vmem:[#allocation8 + $0x114] sm:$0xf0]  ;;  %v8132_v32 = vld [vmem:[#allocation11 + $0x31c] sm:$0xf0] }
  0x71   :  { %v5529_v46 = vor.u32 %v8003_v40, %v5528_v39  ;;  %v8068_v35 = vld [vmem:[#allocation11 + $0x11c] sm:$0xf0]  ;;  %v6033_v42 = vor.u32 %v8132_v32, %v6032_v31  ;;  %v6642_v31 = vld [vmem:[#allocation11 + $0x7e0] sm:$0xf0] }
  0x72   :  { %v6544_v37 = vld [vmem:[#allocation11 + $0x700] sm:$0xf] }
  0x73   :  { %778 = vmatpush.bf16.msra.mxu0 %v5485_v49  ;;  %770 = vmatpush.bf16.msrb.mxu3 %v5529_v46  ;;  %v188_v49 = vld [vmem:[#allocation7] sm:$0x3]  ;;  %v8260_v39 = vld [vmem:[#allocation11 + $0x71c] sm:$0xf0] }
  0x74   :  { %791 = vmatpush.bf16.msra.mxu1 %v5613_v52  ;;  %v190_v50 = vperm.slane %v188_v49, 0  ;;  %v191_v51 = vperm.slane %v188_v49, 1  ;;  %v6288_v40 = vld [vmem:[#allocation11 + $0x500] sm:$0xf] }
  0x75   :  { %v8196_v41 = vld [vmem:[#allocation11 + $0x51c] sm:$0xf0] }
  0x76   :  { %v6000_v43 = vld [vmem:[#allocation11 + $0x2c0] sm:$0xf] }
  0x77   :  { %779 = vmatpush.bf16.msra.mxu0 %v5469_v61  ;;  %v8284_v61 = vld [vmem:[#allocation11 + $0x7dc] sm:$0xf0] }
  0x78   :  { %792 = vmatpush.bf16.msra.mxu1 %v5597_v0  ;;  %v8220_v0 = vld [vmem:[#allocation11 + $0x5dc] sm:$0xf0]  ;;  %v6641_v10 = vor.u32 %v8284_v61, %v6640_v60 }
  0x79   :  { %v8124_v44 = vld [vmem:[#allocation11 + $0x2dc] sm:$0xf0] }
  0x7a   :  { %v5744_v46 = vld [vmem:[#allocation11 + $0xc0] sm:$0xf] }
  0x7b   :  { %780 = vmatpush.bf16.msra.mxu0 %v5453_v9  ;;  %v8084_v9 = vld [vmem:[#allocation11 + $0x19c] sm:$0xf0] }
  0x7c   :  { %793 = vmatpush.bf16.msra.mxu1 %v5581_v12  ;;  %v6385_v12 = vor.u32 %v8220_v0, %v6384_v63  ;;  %v6512_v49 = vld [vmem:[#allocation11 + $0x6c0] sm:$0xf] }
  0x7d   :  { %v5968_v55 = vld [vmem:[#allocation11 + $0x280] sm:$0xf] }
  0x7e   :  { %v8116_v56 = vld [vmem:[#allocation11 + $0x29c] sm:$0xf0] }
  0x7f   :  { %781 = vmatpush.bf16.msra.mxu0 %v5437_v21  ;;  %v5841_v21 = vor.u32 %v8084_v9, %v5840_v8  ;;  %v8052_v59 = vld [vmem:[#allocation11 + $0x9c] sm:$0xf0] }
  0x80   :  { %794 = vmatpush.bf16.msra.mxu1 %v5565_v25  ;;  %v6576_v25 = vld [vmem:[#allocation11 + $0x740] sm:$0xf] }
  0x81   :  { %v6577_v36 = vor.u32 %v8268_v27, %v6576_v25  ;;  %v6480_v61 = vld [vmem:[#allocation11 + $0x680] sm:$0xf]  ;;  %v5874_v25 = vld [vmem:[#allocation11 + $0x1e0] sm:$0xf0] }
  0x82   :  { %v8244_v63 = vld [vmem:[#allocation11 + $0x69c] sm:$0xf0] }
  0x83   :  { %782 = vmatpush.bf16.msra.mxu0 %v5421_v34  ;;  %v5776_v34 = vld [vmem:[#allocation11 + $0x100] sm:$0xf] }
  0x84   :  { %795 = vmatpush.bf16.msra.mxu1 %v5549_v38  ;;  %v6321_v38 = vor.u32 %v8204_v29, %v6320_v28  ;;  %v5777_v45 = vor.u32 %v8068_v35, %v5776_v34  ;;  %v6224_v0 = vld [vmem:[#allocation11 + $0x480] sm:$0xf]  ;;  %v6098_v35 = vld [vmem:[#allocation11 + $0x3a0] sm:$0xf0] }
  0x85   :  { %v5936_v4 = vld [vmem:[#allocation11 + $0x240] sm:$0xf] }
  0x86   :  { %v8108_v5 = vld [vmem:[#allocation11 + $0x25c] sm:$0xf0] }
  0x87   :  { %783 = vmatpush.bf16.msra.mxu0 %v5405_v47  ;;  %v8060_v47 = vld [vmem:[#allocation11 + $0xdc] sm:$0xf0]  ;;  %v5937_v15 = vor.u32 %v8108_v5, %v5936_v4  ;;  %v5746_v4 = vld [vmem:[#allocation11 + $0xe0] sm:$0xf0] }
  0x88   :  { %796 = vmatpush.bf16.msra.mxu1 %v5533_v48  ;;  %v6545_v48 = vor.u32 %v8260_v39, %v6544_v37  ;;  %v5745_v57 = vor.u32 %v8060_v47, %v5744_v46  ;;  %v5680_v8 = vld [vmem:[#allocation11 + $0x40] sm:$0xf]  ;;  %v5842_v37 = vld [vmem:[#allocation11 + $0x1a0] sm:$0xf0] }
  0x89   :  { %v8044_v9 = vld [vmem:[#allocation11 + $0x5c] sm:$0xf0]  ;;  %v8128_v47 = vld [vmem:[#allocation11 + $0x304] sm:$0xf] }
  0x8a   :  { %v6448_v11 = vld [vmem:[#allocation11 + $0x640] sm:$0xf]  ;;  %v8216_v5 = vld [vmem:[#allocation11 + $0x5c4] sm:$0xf] }
  0x8b   :  { %v6192_v13 = vld [vmem:[#allocation11 + $0x440] sm:$0xf] }
  0x8c   :  { %v8172_v14 = vld [vmem:[#allocation11 + $0x45c] sm:$0xf0] }
  0x8d   :  { %v5648_v19 = vld [vmem:[#allocation11] sm:$0xf]  ;;  %v6193_v22 = vor.u32 %v8172_v14, %v6192_v13  ;;  %v6578_v13 = vld [vmem:[#allocation11 + $0x760] sm:$0xf0] }
  0x8e   :  { %v8036_v20 = vld [vmem:[#allocation11 + $0x1c] sm:$0xf0] }
  0x8f   :  { %v8228_v27 = vld [vmem:[#allocation11 + $0x61c] sm:$0xf0]  ;;  %v5649_v29 = vor.u32 %v8036_v20, %v5648_v19  ;;  %v8096_v20 = vld [vmem:[#allocation11 + $0x204] sm:$0xf] }
  0xc7   :  { %v283_v52 = vpop.f32.mrf.mxu0 }
  0xc8   :  { %v284_v53 = vadd.f32 %v283_v52, %v190_v50  ;;  %v296_v54 = vpop.f32.mrf.mxu1  ;;  %v6289_v50 = vor.u32 %v8196_v41, %v6288_v40  ;;  %v6256_v52 = vld [vmem:[#allocation11 + $0x4c0] sm:$0xf]  ;;  %v8136_v41 = vld [vmem:[#allocation11 + $0x344] sm:$0xf] }
  0xc9   :  { %v297_v58 = vadd.f32 %v296_v54, %v191_v51  ;;  %v8252_v51 = vld [vmem:[#allocation11 + $0x6dc] sm:$0xf0]  ;;  %v6001_v54 = vor.u32 %v8124_v44, %v6000_v43  ;;  %v6066_v43 = vld [vmem:[#allocation11 + $0x360] sm:$0xf0] }
  0xca   :  { %v300_v62 = vmax.f32 %v284_v53, 0.0  ;;  %v8188_v53 = vld [vmem:[#allocation11 + $0x4dc] sm:$0xf0]  ;;  %v6513_v60 = vor.u32 %v8252_v51, %v6512_v49  ;;  %v8072_v44 = vld [vmem:[#allocation11 + $0x144] sm:$0xf]  ;;  %v6069_v46 = vor.u32 %v8136_v41, %v6066_v43 }
  0xcb   :  { %v301_v1 = vmax.f32 %v297_v58, 0.0  ;;  %v5712_v58 = vld [vmem:[#allocation11 + $0x80] sm:$0xf]  ;;  %v6034_v49 = vld [vmem:[#allocation11 + $0x320] sm:$0xf0] }
  0xcc   :  { %v8995_v2 = vpack.c.bf16 %v300_v62, %v300_v62  ;;  %v6257_v62 = vor.u32 %v8188_v53, %v6256_v52  ;;  %v5778_v51 = vld [vmem:[#allocation11 + $0x120] sm:$0xf0]  ;;  %v6037_v52 = vor.u32 %v8128_v47, %v6034_v49 }
  0xcd   :  { %v8997_v7 = vpack.c.bf16 %v301_v1, %v301_v1  ;;  %v8180_v1 = vld [vmem:[#allocation11 + $0x49c] sm:$0xf0]  ;;  %v8240_v41 = vld [vmem:[#allocation11 + $0x684] sm:$0xf] }
  0xce   :  { %706 = vmatmul.bf16.vlgmr.msra.gmra.mxu2 %v8995_v2  ;;  %732 = vmatmul.bf16.vlgmr.msrb.gmra.mxu0 %v8995_v2  ;;  %v8232_v47 = vld [vmem:[#allocation11 + $0x644] sm:$0xf] }
  0xcf   :  { %719 = vmatmul.bf16.vlgmr.msra.gmra.mxu3 %v8997_v7  ;;  %745 = vmatmul.bf16.vlgmr.msrb.gmra.mxu1 %v8997_v7  ;;  %v285_v16 = vpop.f32.mrf.mxu0 }
  0xd0   :  { %v298_v17 = vpop.f32.mrf.mxu1  ;;  %2377 = vmatpush.bf16.msra.mxu3 %v6129_v3  ;;  %2364 = vmatpush.bf16.msra.mxu2 %v5873_v6  ;;  %v5969_v3 = vor.u32 %v8116_v56, %v5968_v55  ;;  %v5713_v6 = vor.u32 %v8052_v59, %v5712_v58  ;;  %v8100_v16 = vld [vmem:[#allocation11 + $0x21c] sm:$0xf0]  ;;  %v6002_v55 = vld [vmem:[#allocation11 + $0x2e0] sm:$0xf0] }
  0xd1   :  { %2403 = vmatpush.bf16.msrb.mxu1 %v6641_v10  ;;  %2390 = vmatpush.bf16.msrb.mxu0 %v6385_v12  ;;  %v6481_v10 = vor.u32 %v8244_v63, %v6480_v61  ;;  %v8236_v12 = vld [vmem:[#allocation11 + $0x65c] sm:$0xf0]  ;;  %v5681_v17 = vor.u32 %v8044_v9, %v5680_v8  ;;  %v5970_v58 = vld [vmem:[#allocation11 + $0x2a0] sm:$0xf0] }
  0xd2   :  { %v8272_v59 = vld [vmem:[#allocation11 + $0x784] sm:$0xf]  ;;  %v8164_v63 = vld [vmem:[#allocation11 + $0x41c] sm:$0xf0] }
  0xd3   :  { %v6610_v61 = vld [vmem:[#allocation11 + $0x7a0] sm:$0xf0] }
  0xd4   :  { %2378 = vmatpush.bf16.msra.mxu3 %v6097_v18  ;;  %2365 = vmatpush.bf16.msra.mxu2 %v5841_v21  ;;  %v8152_v18 = vld [vmem:[#allocation11 + $0x3c4] sm:$0xf]  ;;  %v6449_v21 = vor.u32 %v8236_v12, %v6448_v11 }
  0xd5   :  { %2404 = vmatpush.bf16.msrb.mxu1 %v6609_v24  ;;  %2391 = vmatpush.bf16.msrb.mxu0 %v6353_v26  ;;  %v8088_v24 = vld [vmem:[#allocation11 + $0x1c4] sm:$0xf]  ;;  %v6416_v26 = vld [vmem:[#allocation11 + $0x600] sm:$0xf]  ;;  %v6133_v32 = vor.u32 %v8152_v18, %v6130_v23 }
  0xd6   :  { %v5877_v34 = vor.u32 %v8088_v24, %v5874_v25  ;;  %v6386_v8 = vld [vmem:[#allocation11 + $0x5e0] sm:$0xf0] }
  0xd7   :  { %v6389_v9 = vor.u32 %v8216_v5, %v6386_v8  ;;  %v5938_v11 = vld [vmem:[#allocation11 + $0x260] sm:$0xf0]  ;;  %v8157_v8 = vld [vmem:[#allocation11 + $0x3e4] sm:$0xf0] }
  0xd8   :  { %2379 = vmatpush.bf16.msra.mxu3 %v6065_v30  ;;  %2366 = vmatpush.bf16.msra.mxu2 %v5809_v33  ;;  %v8280_v30 = vld [vmem:[#allocation11 + $0x7c4] sm:$0xf] }
  0xd9   :  { %2405 = vmatpush.bf16.msrb.mxu1 %v6577_v36  ;;  %2392 = vmatpush.bf16.msrb.mxu0 %v6321_v38  ;;  %v8144_v33 = vld [vmem:[#allocation11 + $0x384] sm:$0xf]  ;;  %v6417_v38 = vor.u32 %v8228_v27, %v6416_v26  ;;  %v6645_v39 = vor.u32 %v8280_v30, %v6642_v31 }
  0xda   :  { %v8080_v36 = vld [vmem:[#allocation11 + $0x184] sm:$0xf]  ;;  %v6101_v40 = vor.u32 %v8144_v33, %v6098_v35 }
  0xdb   :  { %v6354_v18 = vld [vmem:[#allocation11 + $0x5a0] sm:$0xf0] }
  0xdc   :  { %2380 = vmatpush.bf16.msra.mxu3 %v6033_v42  ;;  %2367 = vmatpush.bf16.msra.mxu2 %v5777_v45  ;;  %v5845_v42 = vor.u32 %v8080_v36, %v5842_v37  ;;  %v5810_v45 = vld [vmem:[#allocation11 + $0x160] sm:$0xf0] }
  0xdd   :  { %2406 = vmatpush.bf16.msrb.mxu1 %v6545_v48  ;;  %2393 = vmatpush.bf16.msrb.mxu0 %v6289_v50  ;;  %v5813_v48 = vor.u32 %v8072_v44, %v5810_v45  ;;  %v8064_v50 = vld [vmem:[#allocation11 + $0x104] sm:$0xf] }
  0xde   :  { %758 = vmatmul.bf16.vlgmr.msrb.gmra.mxu2 %v8995_v2  ;;  %784 = vmatmul.bf16.vlgmr.msra.gmra.mxu0 %v8995_v2  ;;  %v6225_v2 = vor.u32 %v8180_v1, %v6224_v0  ;;  %v5781_v53 = vor.u32 %v8064_v50, %v5778_v51  ;;  %v6613_v0 = vor.u32 %v8272_v59, %v6610_v61  ;;  %v8256_v23 = vld [vmem:[#allocation11 + $0x704] sm:$0xf]  ;;  %v9007_v59 = vld [vmem:[#allocation10] sm:$0xf] }
  0xdf   :  { %771 = vmatmul.bf16.vlgmr.msrb.gmra.mxu3 %v8997_v7  ;;  %797 = vmatmul.bf16.vlgmr.msra.gmra.mxu1 %v8997_v7  ;;  %v5904_v7 = vld [vmem:[#allocation11 + $0x200] sm:$0xf]  ;;  %v6546_v24 = vld [vmem:[#allocation11 + $0x720] sm:$0xf0]  ;;  %v370_v5 = vperm.slane %v9007_v59, 0 }
  0xe0   :  { %2381 = vmatpush.bf16.msra.mxu3 %v6001_v54  ;;  %2368 = vmatpush.bf16.msra.mxu2 %v5745_v57  ;;  %v5905_v28 = vor.u32 %v8100_v16, %v5904_v7  ;;  %v8120_v54 = vld [vmem:[#allocation11 + $0x2c4] sm:$0xf]  ;;  %v6549_v25 = vor.u32 %v8256_v23, %v6546_v24  ;;  %v8141_v23 = vld [vmem:[#allocation11 + $0x364] sm:$0xf0] }
  0xe1   :  { %2407 = vmatpush.bf16.msrb.mxu1 %v6513_v60  ;;  %2394 = vmatpush.bf16.msrb.mxu0 %v6257_v62  ;;  %v6005_v56 = vor.u32 %v8120_v54, %v6002_v55  ;;  %v8112_v57 = vld [vmem:[#allocation11 + $0x284] sm:$0xf]  ;;  %v6160_v62 = vld [vmem:[#allocation11 + $0x400] sm:$0xf] }
  0xe2   :  { %v5973_v60 = vor.u32 %v8112_v57, %v5970_v58  ;;  %v6161_v1 = vor.u32 %v8164_v63, %v6160_v62  ;;  %v5714_v7 = vld [vmem:[#allocation11 + $0xa0] sm:$0xf0]  ;;  %v371_v62 = vperm.slane %v9007_v59, 1 }
  0xe3   :  { %v8208_v16 = vld [vmem:[#allocation11 + $0x584] sm:$0xf] }
  0xe4   :  { %2382 = vmatpush.bf16.msra.mxu3 %v5969_v3  ;;  %2369 = vmatpush.bf16.msra.mxu2 %v5713_v6  ;;  %v8056_v3 = vld [vmem:[#allocation11 + $0xc4] sm:$0xf]  ;;  %v6357_v19 = vor.u32 %v8208_v16, %v6354_v18  ;;  %v5880_v18 = vld [vmem:[#allocation11 + $0x1c8] sm:$0xf] }
  0xe5   :  { %2408 = vmatpush.bf16.msrb.mxu1 %v6481_v10  ;;  %2395 = vmatpush.bf16.msrb.mxu0 %v6225_v2  ;;  %v5749_v6 = vor.u32 %v8056_v3, %v5746_v4  ;;  %v8104_v10 = vld [vmem:[#allocation11 + $0x244] sm:$0xf] }
  0xe6   :  { %v8264_v2 = vld [vmem:[#allocation11 + $0x744] sm:$0xf]  ;;  %v5941_v12 = vor.u32 %v8104_v10, %v5938_v11 }
  0xe7   :  { %v6581_v14 = vor.u32 %v8264_v2, %v6578_v13  ;;  %v8040_v26 = vld [vmem:[#allocation11 + $0x44] sm:$0xf] }
  0xe8   :  { %2383 = vmatpush.bf16.msra.mxu3 %v5937_v15  ;;  %2370 = vmatpush.bf16.msra.mxu2 %v5681_v17  ;;  %v8048_v15 = vld [vmem:[#allocation11 + $0x84] sm:$0xf] }
  0xe9   :  { %2409 = vmatpush.bf16.msrb.mxu1 %v6449_v21  ;;  %2396 = vmatpush.bf16.msrb.mxu0 %v6193_v22  ;;  %v5717_v17 = vor.u32 %v8048_v15, %v5714_v7  ;;  %v5906_v21 = vld [vmem:[#allocation11 + $0x220] sm:$0xf0]  ;;  %v8149_v15 = vld [vmem:[#allocation11 + $0x3a4] sm:$0xf0] }
  0xea   :  { %v5909_v22 = vor.u32 %v8096_v20, %v5906_v21  ;;  %v5682_v27 = vld [vmem:[#allocation11 + $0x60] sm:$0xf0] }
  0xeb   :  { %v6322_v30 = vld [vmem:[#allocation11 + $0x560] sm:$0xf0] }
  0xec   :  { %2384 = vmatpush.bf16.msra.mxu3 %v5905_v28  ;;  %2371 = vmatpush.bf16.msra.mxu2 %v5649_v29  ;;  %v5685_v28 = vor.u32 %v8040_v26, %v5682_v27  ;;  %v8200_v29 = vld [vmem:[#allocation11 + $0x544] sm:$0xf]  ;;  %v373_v26 = vperm.slane %v9007_v59, 3  ;;  %v5848_v27 = vld [vmem:[#allocation11 + $0x188] sm:$0xf] }
  0xed   :  { %2410 = vmatpush.bf16.msrb.mxu1 %v6417_v38  ;;  %2397 = vmatpush.bf16.msrb.mxu0 %v6161_v1  ;;  %v6325_v31 = vor.u32 %v8200_v29, %v6322_v30  ;;  %v6514_v33 = vld [vmem:[#allocation11 + $0x6e0] sm:$0xf0] }
  0xee   :  { %v8032_v35 = vld [vmem:[#allocation11 + $0x4] sm:$0xf] }
  0xef   :  { %v5650_v36 = vld [vmem:[#allocation11 + $0x20] sm:$0xf0] }
  0xf0   :  { %2429 = vmatpush.bf16.msrb.mxu3 %v6133_v32  ;;  %2416 = vmatpush.bf16.msrb.mxu2 %v5877_v34  ;;  %v8248_v32 = vld [vmem:[#allocation11 + $0x6c4] sm:$0xf]  ;;  %v5653_v38 = vor.u32 %v8032_v35, %v5650_v36 }
  0xf1   :  { %2455 = vmatpush.bf16.msra.mxu1 %v6645_v39  ;;  %2442 = vmatpush.bf16.msra.mxu0 %v6389_v9  ;;  %v6517_v34 = vor.u32 %v8248_v32, %v6514_v33  ;;  %v8192_v37 = vld [vmem:[#allocation11 + $0x504] sm:$0xf]  ;;  %v6040_v32 = vld [vmem:[#allocation11 + $0x308] sm:$0xf] }
  0xf2   :  { %v6290_v39 = vld [vmem:[#allocation11 + $0x520] sm:$0xf0]  ;;  %v8133_v33 = vld [vmem:[#allocation11 + $0x324] sm:$0xf0] }
  0xf3   :  { %v8184_v44 = vld [vmem:[#allocation11 + $0x4c4] sm:$0xf] }
  0xf4   :  { %2430 = vmatpush.bf16.msrb.mxu3 %v6101_v40  ;;  %2417 = vmatpush.bf16.msrb.mxu2 %v5845_v42  ;;  %v6293_v40 = vor.u32 %v8192_v37, %v6290_v39  ;;  %v6482_v42 = vld [vmem:[#allocation11 + $0x6a0] sm:$0xf0]  ;;  %v8077_v39 = vld [vmem:[#allocation11 + $0x164] sm:$0xf0] }
  0xf5   :  { %2456 = vmatpush.bf16.msra.mxu1 %v6613_v0  ;;  %2443 = vmatpush.bf16.msra.mxu0 %v6357_v19  ;;  %v6485_v43 = vor.u32 %v8240_v41, %v6482_v42  ;;  %v6258_v45 = vld [vmem:[#allocation11 + $0x4e0] sm:$0xf0]  ;;  %v8093_v19 = vld [vmem:[#allocation11 + $0x1e4] sm:$0xf0]  ;;  %v372_v41 = vperm.slane %v9007_v59, 2 }
  0xf6   :  { %v8176_v50 = vld [vmem:[#allocation11 + $0x484] sm:$0xf]  ;;  %v5881_v24 = vor.u32 %v8093_v19, %v5880_v18  ;;  %v6008_v42 = vld [vmem:[#allocation11 + $0x2c8] sm:$0xf] }
  0xf7   :  { %v6226_v51 = vld [vmem:[#allocation11 + $0x4a0] sm:$0xf0]  ;;  %v6616_v59 = vld [vmem:[#allocation11 + $0x788] sm:$0xf] }
  0xf8   :  { %2431 = vmatpush.bf16.msrb.mxu3 %v6069_v46  ;;  %2418 = vmatpush.bf16.msrb.mxu2 %v5813_v48  ;;  %v6261_v46 = vor.u32 %v8184_v44, %v6258_v45  ;;  %v6450_v48 = vld [vmem:[#allocation11 + $0x660] sm:$0xf0]  ;;  %v8125_v44 = vld [vmem:[#allocation11 + $0x2e4] sm:$0xf0] }
  0xf9   :  { %2457 = vmatpush.bf16.msra.mxu1 %v6581_v14  ;;  %2444 = vmatpush.bf16.msra.mxu0 %v6325_v31  ;;  %v6453_v49 = vor.u32 %v8232_v47, %v6450_v48  ;;  %v6418_v54 = vld [vmem:[#allocation11 + $0x620] sm:$0xf0]  ;;  %v6104_v14 = vld [vmem:[#allocation11 + $0x388] sm:$0xf] }
  0xfa   :  { %v6194_v57 = vld [vmem:[#allocation11 + $0x460] sm:$0xf0]  ;;  %v6105_v20 = vor.u32 %v8149_v15, %v6104_v14  ;;  %v6648_v45 = vld [vmem:[#allocation11 + $0x7c8] sm:$0xf] }
  0xfb   :  { %v6162_v61 = vld [vmem:[#allocation11 + $0x420] sm:$0xf0]  ;;  %v6360_v18 = vld [vmem:[#allocation11 + $0x588] sm:$0xf] }
  0xfc   :  { %2432 = vmatpush.bf16.msrb.mxu3 %v6037_v52  ;;  %2419 = vmatpush.bf16.msrb.mxu2 %v5781_v53  ;;  %v6229_v52 = vor.u32 %v8176_v50, %v6226_v51  ;;  %v8224_v53 = vld [vmem:[#allocation11 + $0x604] sm:$0xf]  ;;  %v8069_v50 = vld [vmem:[#allocation11 + $0x124] sm:$0xf0] }
  0xfd   :  { %2458 = vmatpush.bf16.msra.mxu1 %v6549_v25  ;;  %2445 = vmatpush.bf16.msra.mxu0 %v6293_v40  ;;  %v6421_v55 = vor.u32 %v8224_v53, %v6418_v54  ;;  %v6041_v40 = vor.u32 %v8133_v33, %v6040_v32  ;;  %v5976_v54 = vld [vmem:[#allocation11 + $0x288] sm:$0xf]  ;;  %v6138_v32 = vld [vmem:[#allocation11 + $0x3e8] sm:$0xf0] }
  0xfe   :  { %v8213_v19 = vld [vmem:[#allocation11 + $0x5a4] sm:$0xf0] }
  0xff   :  { %v5688_v33 = vld [vmem:[#allocation11 + $0x48] sm:$0xf] }
 0x100   :  { %2433 = vmatpush.bf16.msrb.mxu3 %v6005_v56  ;;  %2420 = vmatpush.bf16.msrb.mxu2 %v5749_v6  ;;  %v8168_v56 = vld [vmem:[#allocation11 + $0x444] sm:$0xf]  ;;  %v6136_v6 = vld [vmem:[#allocation11 + $0x3c8] sm:$0xf] }
 0x101   :  { %2459 = vmatpush.bf16.msra.mxu1 %v6517_v34  ;;  %2446 = vmatpush.bf16.msra.mxu0 %v6261_v46  ;;  %v6197_v58 = vor.u32 %v8168_v56, %v6194_v57  ;;  %v6137_v11 = vor.u32 %v8157_v8, %v6136_v6  ;;  %v8285_v46 = vld [vmem:[#allocation11 + $0x7e4] sm:$0xf0] }
 0x102   :  { %v6649_v53 = vor.u32 %v8285_v46, %v6648_v45  ;;  %v6106_v45 = vld [vmem:[#allocation11 + $0x3a8] sm:$0xf0]  ;;  %v5656_v46 = vld [vmem:[#allocation11 + $0x8] sm:$0xf] }
 0x104   :  { %2434 = vmatpush.bf16.msrb.mxu3 %v5973_v60  ;;  %2421 = vmatpush.bf16.msrb.mxu2 %v5717_v17  ;;  %v8160_v60 = vld [vmem:[#allocation11 + $0x404] sm:$0xf] }
 0x105   :  { %2460 = vmatpush.bf16.msra.mxu1 %v6485_v43  ;;  %2447 = vmatpush.bf16.msra.mxu0 %v6229_v52  ;;  %v6165_v63 = vor.u32 %v8160_v60, %v6162_v61  ;;  %v6009_v52 = vor.u32 %v8125_v44, %v6008_v42  ;;  %v8277_v60 = vld [vmem:[#allocation11 + $0x7a4] sm:$0xf0]  ;;  %v8145_v44 = vld [vmem:[#allocation11 + $0x38c] sm:$0xf] }
 0x106   :  { %v6617_v8 = vor.u32 %v8277_v60, %v6616_v59  ;;  %v8137_v59 = vld [vmem:[#allocation11 + $0x34c] sm:$0xf] }
 0x107   :  { %v6074_v60 = vld [vmem:[#allocation11 + $0x368] sm:$0xf0] }
 0x108   :  { %2435 = vmatpush.bf16.msrb.mxu3 %v5941_v12  ;;  %2422 = vmatpush.bf16.msrb.mxu2 %v5685_v28  ;;  %v8085_v28 = vld [vmem:[#allocation11 + $0x1a4] sm:$0xf0] }
 0x109   :  { %2461 = vmatpush.bf16.msra.mxu1 %v6453_v49  ;;  %2448 = vmatpush.bf16.msra.mxu0 %v6197_v58  ;;  %v5849_v35 = vor.u32 %v8085_v28, %v5848_v27  ;;  %v5784_v49 = vld [vmem:[#allocation11 + $0x108] sm:$0xf] }
 0x10a   :  { %v8117_v58 = vld [vmem:[#allocation11 + $0x2a4] sm:$0xf0] }
 0x10b   :  { %v5977_v6 = vor.u32 %v8117_v58, %v5976_v54  ;;  %v6552_v27 = vld [vmem:[#allocation11 + $0x708] sm:$0xf] }
 0x10c   :  { %2436 = vmatpush.bf16.msrb.mxu3 %v5909_v22  ;;  %2423 = vmatpush.bf16.msrb.mxu2 %v5653_v38  ;;  %v6072_v22 = vld [vmem:[#allocation11 + $0x348] sm:$0xf] }
 0x10d   :  { %2462 = vmatpush.bf16.msra.mxu1 %v6421_v55  ;;  %2449 = vmatpush.bf16.msra.mxu0 %v6165_v63  ;;  %v6073_v30 = vor.u32 %v8141_v23, %v6072_v22  ;;  %v5816_v38 = vld [vmem:[#allocation11 + $0x148] sm:$0xf] }
 0x10e   :  { %v5817_v47 = vor.u32 %v8077_v39, %v5816_v38  ;;  %v5752_v63 = vld [vmem:[#allocation11 + $0xc8] sm:$0xf] }
 0x10f   :  { %v5912_v23 = vld [vmem:[#allocation11 + $0x208] sm:$0xf] }
 0x110   :  { %v8261_v28 = vld [vmem:[#allocation11 + $0x724] sm:$0xf0] }
 0x111   :  { %v6553_v38 = vor.u32 %v8261_v28, %v6552_v27  ;;  %v6488_v54 = vld [vmem:[#allocation11 + $0x688] sm:$0xf] }
 0x112   :  { %v6200_v27 = vld [vmem:[#allocation11 + $0x448] sm:$0xf] }
 0x113   :  { %v8173_v28 = vld [vmem:[#allocation11 + $0x464] sm:$0xf0] }
 0x14b   :  { %v733_v0 = vpop.f32.mrf.mxu0 }
 0x14c   :  { %v734_v1 = vadd.f32 %v733_v0, %v371_v62  ;;  %v746_v3 = vpop.f32.mrf.mxu1  ;;  %v5785_v62 = vor.u32 %v8069_v50, %v5784_v49  ;;  %v8197_v49 = vld [vmem:[#allocation11 + $0x524] sm:$0xf0] }
 0x14e   :  { %v747_v4 = vadd.f32 %v746_v3, %v734_v1  ;;  %v8061_v3 = vld [vmem:[#allocation11 + $0xe4] sm:$0xf0] }
 0x14f   :  { %v5753_v14 = vor.u32 %v8061_v3, %v5752_v63  ;;  %v8189_v63 = vld [vmem:[#allocation11 + $0x4e4] sm:$0xf0]  ;;  %v5850_v3 = vld [vmem:[#allocation11 + $0x1a8] sm:$0xf0] }
 0x150   :  { %v803_v9 = vmax.f32 %v747_v4, 0.0  ;;  %v6392_v4 = vld [vmem:[#allocation11 + $0x5c8] sm:$0xf] }
 0x151   :  { %v707_v10 = vpop.f32.mrf.mxu2 }
 0x152   :  { %v9011_v2 = vpack.c.bf16 %v803_v9, %v803_v9  ;;  %v708_v12 = vadd.f32 %v707_v10, %v370_v5  ;;  %v720_v13 = vpop.f32.mrf.mxu3  ;;  %v8221_v5 = vld [vmem:[#allocation11 + $0x5e4] sm:$0xf0] }
 0x153   :  { %v735_v7 = vpop.f32.mrf.mxu0  ;;  %v5944_v9 = vld [vmem:[#allocation11 + $0x248] sm:$0xf]  ;;  %v6393_v15 = vor.u32 %v8221_v5, %v6392_v4  ;;  %v6077_v4 = vor.u32 %v8137_v59, %v6074_v60  ;;  %v6362_v59 = vld [vmem:[#allocation11 + $0x5a8] sm:$0xf0] }
 0x154   :  { %v721_v16 = vadd.f32 %v720_v13, %v708_v12  ;;  %v748_v17 = vpop.f32.mrf.mxu1  ;;  %2385 = vmatmul.bf16.vlgmr.msra.gmra.mxu3 %v9011_v2  ;;  %v8109_v10 = vld [vmem:[#allocation11 + $0x264] sm:$0xf0] }
 0x155   :  { %2481 = vmatpush.bf16.msra.mxu3 %v6137_v11  ;;  %v6584_v12 = vld [vmem:[#allocation11 + $0x748] sm:$0xf] }
 0x156   :  { %v802_v21 = vmax.f32 %v721_v16, 0.0  ;;  %v8269_v13 = vld [vmem:[#allocation11 + $0x764] sm:$0xf0] }
 0x157   :  { %v5720_v7 = vld [vmem:[#allocation11 + $0x88] sm:$0xf]  ;;  %v6585_v22 = vor.u32 %v8269_v13, %v6584_v12 }
 0x158   :  { %v9014_v25 = vpack.c.bf16 %v802_v21, %v802_v21  ;;  %v8053_v17 = vld [vmem:[#allocation11 + $0xa4] sm:$0xf0]  ;;  %v5945_v21 = vor.u32 %v8109_v10, %v5944_v9  ;;  %v8129_v9 = vld [vmem:[#allocation11 + $0x30c] sm:$0xf] }
 0x159   :  { %2482 = vmatpush.bf16.msra.mxu3 %v6105_v20  ;;  %v709_v29 = vpop.f32.mrf.mxu2  ;;  %v6456_v5 = vld [vmem:[#allocation11 + $0x648] sm:$0xf]  ;;  %v6042_v10 = vld [vmem:[#allocation11 + $0x328] sm:$0xf0] }
 0x15a   :  { %v722_v31 = vpop.f32.mrf.mxu3  ;;  %2372 = vmatmul.bf16.vlgmr.msra.gmra.mxu2 %v9014_v25  ;;  %v5721_v29 = vor.u32 %v8053_v17, %v5720_v7  ;;  %v6232_v12 = vld [vmem:[#allocation11 + $0x488] sm:$0xf]  ;;  %v5818_v7 = vld [vmem:[#allocation11 + $0x168] sm:$0xf0]  ;;  %v6045_v17 = vor.u32 %v8129_v9, %v6042_v10 }
 0x15b   :  { %2468 = vmatpush.bf16.msra.mxu2 %v5881_v24  ;;  %v785_v34 = vpop.f32.mrf.mxu0  ;;  %v8153_v31 = vld [vmem:[#allocation11 + $0x3cc] sm:$0xf]  ;;  %v8181_v13 = vld [vmem:[#allocation11 + $0x4a4] sm:$0xf0] }
 0x15c   :  { %v786_v36 = vadd.f32 %v785_v34, %v373_v26  ;;  %v798_v37 = vpop.f32.mrf.mxu1  ;;  %v8101_v26 = vld [vmem:[#allocation11 + $0x224] sm:$0xf0]  ;;  %v6141_v39 = vor.u32 %v8153_v31, %v6138_v32  ;;  %v5786_v31 = vld [vmem:[#allocation11 + $0x128] sm:$0xf0] }
 0x15d   :  { %2483 = vmatpush.bf16.msra.mxu3 %v6073_v30  ;;  %v6361_v30 = vor.u32 %v8213_v19, %v6360_v18  ;;  %v8045_v34 = vld [vmem:[#allocation11 + $0x64] sm:$0xf0]  ;;  %v5690_v9 = vld [vmem:[#allocation11 + $0x68] sm:$0xf0] }
 0x15e   :  { %v799_v43 = vadd.f32 %v798_v37, %v786_v36  ;;  %v8205_v36 = vld [vmem:[#allocation11 + $0x564] sm:$0xf0]  ;;  %v5913_v37 = vor.u32 %v8101_v26, %v5912_v23  ;;  %v5689_v42 = vor.u32 %v8045_v34, %v5688_v33  ;;  %v8281_v23 = vld [vmem:[#allocation11 + $0x7cc] sm:$0xf] }
 0x15f   :  { %2469 = vmatpush.bf16.msra.mxu2 %v5849_v35  ;;  %v6328_v35 = vld [vmem:[#allocation11 + $0x548] sm:$0xf]  ;;  %v8113_v34 = vld [vmem:[#allocation11 + $0x28c] sm:$0xf] }
 0x160   :  { %v805_v48 = vmax.f32 %v799_v43, 0.0  ;;  %v6329_v43 = vor.u32 %v8205_v36, %v6328_v35  ;;  %v6424_v18 = vld [vmem:[#allocation11 + $0x608] sm:$0xf]  ;;  %v6201_v35 = vor.u32 %v8173_v28, %v6200_v27  ;;  %v5978_v36 = vld [vmem:[#allocation11 + $0x2a8] sm:$0xf0] }
 0x161   :  { %2484 = vmatpush.bf16.msra.mxu3 %v6041_v40  ;;  %v759_v51 = vpop.f32.mrf.mxu2  ;;  %v6520_v40 = vld [vmem:[#allocation11 + $0x6c8] sm:$0xf]  ;;  %v8201_v10 = vld [vmem:[#allocation11 + $0x54c] sm:$0xf]  ;;  %v5888_v27 = vld [vmem:[#allocation11 + $0x1d0] sm:$0xf] }
 0x162   :  { %v9019_v55 = vpack.c.bf16 %v805_v48, %v805_v48  ;;  %v760_v56 = vadd.f32 %v759_v51, %v372_v41  ;;  %v772_v57 = vpop.f32.mrf.mxu3  ;;  %v8253_v41 = vld [vmem:[#allocation11 + $0x6e4] sm:$0xf0]  ;;  %v8089_v51 = vld [vmem:[#allocation11 + $0x1cc] sm:$0xf]  ;;  %v8094_v28 = vld [vmem:[#allocation11 + $0x1ec] sm:$0xf0] }
 0x163   :  { %2470 = vmatpush.bf16.msra.mxu2 %v5817_v47  ;;  %v787_v61 = vpop.f32.mrf.mxu0  ;;  %v8037_v47 = vld [vmem:[#allocation11 + $0x24] sm:$0xf0]  ;;  %v6521_v50 = vor.u32 %v8253_v41, %v6520_v40 }
 0x164   :  { %v773_v0 = vadd.f32 %v772_v57, %v760_v56  ;;  %v800_v1 = vpop.f32.mrf.mxu1  ;;  %2411 = vmatmul.bf16.vlgmr.msrb.gmra.mxu1 %v9019_v55  ;;  %2437 = vmatmul.bf16.vlgmr.msrb.gmra.mxu3 %v9011_v2  ;;  %v6296_v48 = vld [vmem:[#allocation11 + $0x508] sm:$0xf]  ;;  %v5657_v57 = vor.u32 %v8037_v47, %v5656_v46  ;;  %v5981_v46 = vor.u32 %v8113_v34, %v5978_v36  ;;  %v6080_v34 = vld [vmem:[#allocation11 + $0x350] sm:$0xf] }
 0x165   :  { %2485 = vmatpush.bf16.msra.mxu3 %v6009_v52  ;;  %2507 = vmatpush.bf16.msrb.mxu1 %v6649_v53  ;;  %v5882_v52 = vld [vmem:[#allocation11 + $0x1e8] sm:$0xf0]  ;;  %v6109_v53 = vor.u32 %v8145_v44, %v6106_v45  ;;  %v8245_v56 = vld [vmem:[#allocation11 + $0x6a4] sm:$0xf0]  ;;  %v6297_v58 = vor.u32 %v8197_v49, %v6296_v48  ;;  %v5889_v36 = vor.u32 %v8094_v28, %v5888_v27 }
 0x166   :  { %v804_v11 = vmax.f32 %v773_v0, 0.0  ;;  %v5885_v61 = vor.u32 %v8089_v51, %v5882_v52  ;;  %v6489_v0 = vor.u32 %v8245_v56, %v6488_v54  ;;  %v8081_v1 = vld [vmem:[#allocation11 + $0x18c] sm:$0xf]  ;;  %v8229_v19 = vld [vmem:[#allocation11 + $0x624] sm:$0xf0] }
 0x167   :  { %2471 = vmatpush.bf16.msra.mxu2 %v5785_v62  ;;  %v6264_v62 = vld [vmem:[#allocation11 + $0x4c8] sm:$0xf]  ;;  %v8217_v44 = vld [vmem:[#allocation11 + $0x5cc] sm:$0xf] }
 0x168   :  { %v9023_v16 = vpack.c.bf16 %v804_v11, %v804_v11  ;;  %v5853_v11 = vor.u32 %v8081_v1, %v5850_v3  ;;  %v6168_v40 = vld [vmem:[#allocation11 + $0x408] sm:$0xf]  ;;  %v6394_v45 = vld [vmem:[#allocation11 + $0x5e8] sm:$0xf0] }
 0x169   :  { %2486 = vmatpush.bf16.msra.mxu3 %v5977_v6  ;;  %2508 = vmatpush.bf16.msrb.mxu1 %v6617_v8  ;;  %v761_v20 = vpop.f32.mrf.mxu2  ;;  %v8237_v6 = vld [vmem:[#allocation11 + $0x664] sm:$0xf0]  ;;  %v6265_v8 = vor.u32 %v8189_v63, %v6264_v62  ;;  %v8105_v48 = vld [vmem:[#allocation11 + $0x24c] sm:$0xf]  ;;  %v6397_v54 = vor.u32 %v8217_v44, %v6394_v45 }
 0x16a   :  { %v774_v24 = vpop.f32.mrf.mxu3  ;;  %2398 = vmatmul.bf16.vlgmr.msrb.gmra.mxu0 %v9023_v16  ;;  %2424 = vmatmul.bf16.vlgmr.msrb.gmra.mxu2 %v9014_v25  ;;  %v8121_v20 = vld [vmem:[#allocation11 + $0x2cc] sm:$0xf]  ;;  %v8165_v41 = vld [vmem:[#allocation11 + $0x424] sm:$0xf0] }
 0x16b   :  { %2472 = vmatpush.bf16.msra.mxu2 %v5753_v14  ;;  %2494 = vmatpush.bf16.msrb.mxu0 %v6393_v15  ;;  %v6457_v14 = vor.u32 %v8237_v6, %v6456_v5  ;;  %v8073_v15 = vld [vmem:[#allocation11 + $0x14c] sm:$0xf]  ;;  %v6169_v49 = vor.u32 %v8165_v41, %v6168_v40  ;;  %v6144_v5 = vld [vmem:[#allocation11 + $0x3d0] sm:$0xf] }
 0x16c   :  { %v6650_v24 = vld [vmem:[#allocation11 + $0x7e8] sm:$0xf0]  ;;  %v5821_v26 = vor.u32 %v8073_v15, %v5818_v7  ;;  %v8158_v6 = vld [vmem:[#allocation11 + $0x3ec] sm:$0xf0] }
 0x16d   :  { %2487 = vmatpush.bf16.msra.mxu3 %v5945_v21  ;;  %2509 = vmatpush.bf16.msrb.mxu1 %v6585_v22  ;;  %v6233_v21 = vor.u32 %v8181_v13, %v6232_v12  ;;  %v6010_v22 = vld [vmem:[#allocation11 + $0x2e8] sm:$0xf0]  ;;  %v6653_v33 = vor.u32 %v8281_v23, %v6650_v24  ;;  %v5856_v40 = vld [vmem:[#allocation11 + $0x190] sm:$0xf] }
 0x16e   :  { %v6013_v32 = vor.u32 %v8121_v20, %v6010_v22  ;;  %v8265_v51 = vld [vmem:[#allocation11 + $0x74c] sm:$0xf]  ;;  %v8150_v20 = vld [vmem:[#allocation11 + $0x3ac] sm:$0xf0] }
 0x16f   :  { %2473 = vmatpush.bf16.msra.mxu2 %v5721_v29  ;;  %2495 = vmatpush.bf16.msrb.mxu0 %v6361_v30  ;;  %v6425_v29 = vor.u32 %v8229_v19, %v6424_v18  ;;  %v8065_v30 = vld [vmem:[#allocation11 + $0x10c] sm:$0xf]  ;;  %v6112_v19 = vld [vmem:[#allocation11 + $0x390] sm:$0xf] }
 0x170   :  { %v6586_v52 = vld [vmem:[#allocation11 + $0x768] sm:$0xf0]  ;;  %v8086_v41 = vld [vmem:[#allocation11 + $0x1ac] sm:$0xf0] }
 0x171   :  { %2488 = vmatpush.bf16.msra.mxu3 %v5913_v37  ;;  %2510 = vmatpush.bf16.msrb.mxu1 %v6553_v38  ;;  %v8273_v37 = vld [vmem:[#allocation11 + $0x78c] sm:$0xf] }
 0x172   :  { %v6618_v38 = vld [vmem:[#allocation11 + $0x7a8] sm:$0xf0] }
 0x173   :  { %2474 = vmatpush.bf16.msra.mxu2 %v5689_v42  ;;  %2496 = vmatpush.bf16.msrb.mxu0 %v6329_v43  ;;  %v8057_v42 = vld [vmem:[#allocation11 + $0xcc] sm:$0xf]  ;;  %v6621_v47 = vor.u32 %v8273_v37, %v6618_v38 }
 0x174   :  { %2463 = vmatmul.bf16.vlgmr.msra.gmra.mxu1 %v9019_v55  ;;  %2489 = vmatmul.bf16.vlgmr.msra.gmra.mxu3 %v9011_v2  ;;  %v5754_v43 = vld [vmem:[#allocation11 + $0xe8] sm:$0xf0] }
 0x175   :  { %2533 = vmatpush.bf16.msrb.mxu3 %v6141_v39  ;;  %2511 = vmatpush.bf16.msrb.mxu1 %v6521_v50  ;;  %v5789_v39 = vor.u32 %v8065_v30, %v5786_v31  ;;  %v5946_v50 = vld [vmem:[#allocation11 + $0x268] sm:$0xf0] }
 0x176   :  { %v8049_v56 = vld [vmem:[#allocation11 + $0x8c] sm:$0xf]  ;;  %v5949_v60 = vor.u32 %v8105_v48, %v5946_v50  ;;  %v5857_v48 = vor.u32 %v8086_v41, %v5856_v40  ;;  %v8262_v40 = vld [vmem:[#allocation11 + $0x72c] sm:$0xf0] }
 0x177   :  { %2475 = vmatpush.bf16.msra.mxu2 %v5657_v57  ;;  %2497 = vmatpush.bf16.msrb.mxu0 %v6297_v58  ;;  %v5722_v57 = vld [vmem:[#allocation11 + $0xa8] sm:$0xf0] }
 0x178   :  { %v8209_v58 = vld [vmem:[#allocation11 + $0x58c] sm:$0xf]  ;;  %v5725_v3 = vor.u32 %v8049_v56, %v5722_v57 }
 0x179   :  { %2534 = vmatpush.bf16.msrb.mxu3 %v6109_v53  ;;  %2512 = vmatpush.bf16.msrb.mxu1 %v6489_v0  ;;  %v5757_v53 = vor.u32 %v8057_v42, %v5754_v43  ;;  %v8097_v62 = vld [vmem:[#allocation11 + $0x20c] sm:$0xf] }
 0x17a   :  { %2450 = vmatmul.bf16.vlgmr.msra.gmra.mxu0 %v9023_v16  ;;  %2476 = vmatmul.bf16.vlgmr.msra.gmra.mxu2 %v9014_v25  ;;  %v5914_v63 = vld [vmem:[#allocation11 + $0x228] sm:$0xf0] }
 0x17b   :  { %2520 = vmatpush.bf16.msrb.mxu2 %v5885_v61  ;;  %2498 = vmatpush.bf16.msrb.mxu0 %v6265_v8  ;;  %v6589_v61 = vor.u32 %v8265_v51, %v6586_v52  ;;  %v8257_v0 = vld [vmem:[#allocation11 + $0x70c] sm:$0xf]  ;;  %v5917_v12 = vor.u32 %v8097_v62, %v5914_v63  ;;  %v5824_v52 = vld [vmem:[#allocation11 + $0x150] sm:$0xf] }
 0x17c   :  { %v6554_v1 = vld [vmem:[#allocation11 + $0x728] sm:$0xf0]  ;;  %v8286_v62 = vld [vmem:[#allocation11 + $0x7ec] sm:$0xf0] }
 0x17d   :  { %2535 = vmatpush.bf16.msrb.mxu3 %v6077_v4  ;;  %2513 = vmatpush.bf16.msrb.mxu1 %v6457_v14  ;;  %v6365_v4 = vor.u32 %v8209_v58, %v6362_v59  ;;  %v8041_v8 = vld [vmem:[#allocation11 + $0x4c] sm:$0xf]  ;;  %v6557_v13 = vor.u32 %v8257_v0, %v6554_v1  ;;  %v6145_v14 = vor.u32 %v8158_v6, %v6144_v5  ;;  %v6016_v58 = vld [vmem:[#allocation11 + $0x2d0] sm:$0xf] }
 0x17e   :  { %v8249_v15 = vld [vmem:[#allocation11 + $0x6cc] sm:$0xf]  ;;  %v8070_v5 = vld [vmem:[#allocation11 + $0x12c] sm:$0xf0] }
 0x17f   :  { %2521 = vmatpush.bf16.msrb.mxu2 %v5853_v11  ;;  %2499 = vmatpush.bf16.msrb.mxu0 %v6233_v21  ;;  %v6330_v11 = vld [vmem:[#allocation11 + $0x568] sm:$0xf0] }
 0x180   :  { %v6522_v7 = vld [vmem:[#allocation11 + $0x6e8] sm:$0xf0]  ;;  %v6333_v18 = vor.u32 %v8201_v10, %v6330_v11  ;;  %v8118_v11 = vld [vmem:[#allocation11 + $0x2ac] sm:$0xf0] }
 0x181   :  { %2536 = vmatpush.bf16.msrb.mxu3 %v6045_v17  ;;  %2514 = vmatpush.bf16.msrb.mxu1 %v6425_v29  ;;  %v5693_v17 = vor.u32 %v8041_v8, %v5690_v9  ;;  %v8033_v21 = vld [vmem:[#allocation11 + $0xc] sm:$0xf]  ;;  %v6113_v29 = vor.u32 %v8150_v20, %v6112_v19  ;;  %v5984_v9 = vld [vmem:[#allocation11 + $0x290] sm:$0xf] }
 0x182   :  { %v5658_v22 = vld [vmem:[#allocation11 + $0x28] sm:$0xf0]  ;;  %v6400_v19 = vld [vmem:[#allocation11 + $0x5d0] sm:$0xf] }
 0x183   :  { %2522 = vmatpush.bf16.msrb.mxu2 %v5821_v26  ;;  %2500 = vmatpush.bf16.msrb.mxu0 %v6201_v35  ;;  %v8193_v23 = vld [vmem:[#allocation11 + $0x50c] sm:$0xf]  ;;  %v6525_v26 = vor.u32 %v8249_v15, %v6522_v7  ;;  %v8142_v35 = vld [vmem:[#allocation11 + $0x36c] sm:$0xf0] }
 0x184   :  { %2515 = vmatmul.bf16.vlgmr.msrb.gmra.mxu1 %v9019_v55  ;;  %v6298_v24 = vld [vmem:[#allocation11 + $0x528] sm:$0xf0]  ;;  %v6081_v42 = vor.u32 %v8142_v35, %v6080_v34  ;;  %v8222_v20 = vld [vmem:[#allocation11 + $0x5ec] sm:$0xf0] }
 0x185   :  { %2537 = vmatpush.bf16.msrb.mxu3 %v6013_v32  ;;  %2559 = vmatpush.bf16.msra.mxu1 %v6653_v33  ;;  %v8241_v30 = vld [vmem:[#allocation11 + $0x68c] sm:$0xf]  ;;  %v5661_v32 = vor.u32 %v8033_v21, %v5658_v22  ;;  %v6301_v33 = vor.u32 %v8193_v23, %v6298_v24  ;;  %v5985_v21 = vor.u32 %v8118_v11, %v5984_v9  ;;  %v5952_v24 = vld [vmem:[#allocation11 + $0x250] sm:$0xf]  ;;  %v8138_v9 = vld [vmem:[#allocation11 + $0x354] sm:$0xf] }
 0x186   :  { %v6490_v31 = vld [vmem:[#allocation11 + $0x6a8] sm:$0xf0]  ;;  %v6401_v28 = vor.u32 %v8222_v20, %v6400_v19  ;;  %v8214_v34 = vld [vmem:[#allocation11 + $0x5ac] sm:$0xf0]  ;;  %v6082_v11 = vld [vmem:[#allocation11 + $0x370] sm:$0xf0] }
 0x187   :  { %2523 = vmatpush.bf16.msrb.mxu2 %v5789_v39  ;;  %2501 = vmatpush.bf16.msrb.mxu0 %v6169_v49  ;;  %v8185_v37 = vld [vmem:[#allocation11 + $0x4cc] sm:$0xf]  ;;  %v6493_v39 = vor.u32 %v8241_v30, %v6490_v31  ;;  %v8270_v30 = vld [vmem:[#allocation11 + $0x76c] sm:$0xf0] }
 0x188   :  { %v6266_v38 = vld [vmem:[#allocation11 + $0x4e8] sm:$0xf0]  ;;  %v5728_v31 = vld [vmem:[#allocation11 + $0x90] sm:$0xf] }
 0x189   :  { %2538 = vmatpush.bf16.msrb.mxu3 %v5981_v46  ;;  %2560 = vmatpush.bf16.msra.mxu1 %v6621_v47  ;;  %v8233_v43 = vld [vmem:[#allocation11 + $0x64c] sm:$0xf]  ;;  %v6269_v45 = vor.u32 %v8185_v37, %v6266_v38  ;;  %v6048_v46 = vld [vmem:[#allocation11 + $0x310] sm:$0xf] }
 0x18a   :  { %2502 = vmatmul.bf16.vlgmr.msrb.gmra.mxu0 %v9023_v16  ;;  %v6458_v44 = vld [vmem:[#allocation11 + $0x668] sm:$0xf0]  ;;  %v8134_v47 = vld [vmem:[#allocation11 + $0x32c] sm:$0xf0] }
 0x18b   :  { %2524 = vmatpush.bf16.msrb.mxu2 %v5757_v53  ;;  %2546 = vmatpush.bf16.msra.mxu0 %v6397_v54  ;;  %v8177_v49 = vld [vmem:[#allocation11 + $0x48c] sm:$0xf]  ;;  %v6461_v51 = vor.u32 %v8233_v43, %v6458_v44  ;;  %v8078_v53 = vld [vmem:[#allocation11 + $0x16c] sm:$0xf0]  ;;  %v6049_v54 = vor.u32 %v8134_v47, %v6048_v46  ;;  %v8154_v43 = vld [vmem:[#allocation11 + $0x3d4] sm:$0xf] }
 0x18c   :  { %v6234_v50 = vld [vmem:[#allocation11 + $0x4a8] sm:$0xf0]  ;;  %v5825_v63 = vor.u32 %v8078_v53, %v5824_v52  ;;  %v8102_v38 = vld [vmem:[#allocation11 + $0x22c] sm:$0xf0]  ;;  %v6146_v44 = vld [vmem:[#allocation11 + $0x3f0] sm:$0xf0] }
 0x18d   :  { %2539 = vmatpush.bf16.msrb.mxu3 %v5949_v60  ;;  %2561 = vmatpush.bf16.msra.mxu1 %v6589_v61  ;;  %v8225_v56 = vld [vmem:[#allocation11 + $0x60c] sm:$0xf]  ;;  %v6237_v59 = vor.u32 %v8177_v49, %v6234_v50  ;;  %v8126_v60 = vld [vmem:[#allocation11 + $0x2ec] sm:$0xf0] }
 0x18e   :  { %v6426_v57 = vld [vmem:[#allocation11 + $0x628] sm:$0xf0]  ;;  %v6656_v61 = vld [vmem:[#allocation11 + $0x7d0] sm:$0xf]  ;;  %v6017_v6 = vor.u32 %v8126_v60, %v6016_v58  ;;  %v6114_v58 = vld [vmem:[#allocation11 + $0x3b0] sm:$0xf0] }
 0x18f   :  { %2525 = vmatpush.bf16.msrb.mxu2 %v5725_v3  ;;  %2547 = vmatpush.bf16.msra.mxu0 %v6365_v4  ;;  %v8169_v0 = vld [vmem:[#allocation11 + $0x44c] sm:$0xf]  ;;  %v6429_v3 = vor.u32 %v8225_v56, %v6426_v57  ;;  %v5792_v4 = vld [vmem:[#allocation11 + $0x110] sm:$0xf]  ;;  %v6657_v8 = vor.u32 %v8286_v62, %v6656_v61  ;;  %v8146_v57 = vld [vmem:[#allocation11 + $0x394] sm:$0xf] }
 0x190   :  { %v6202_v1 = vld [vmem:[#allocation11 + $0x468] sm:$0xf0]  ;;  %v8046_v46 = vld [vmem:[#allocation11 + $0x6c] sm:$0xf0] }
 0x191   :  { %2540 = vmatpush.bf16.msrb.mxu3 %v5917_v12  ;;  %2562 = vmatpush.bf16.msra.mxu1 %v6557_v13  ;;  %v6205_v10 = vor.u32 %v8169_v0, %v6202_v1  ;;  %v6624_v12 = vld [vmem:[#allocation11 + $0x790] sm:$0xf]  ;;  %v8161_v15 = vld [vmem:[#allocation11 + $0x40c] sm:$0xf]  ;;  %v5890_v0 = vld [vmem:[#allocation11 + $0x1f0] sm:$0xf0] }
 0x192   :  { %v8278_v13 = vld [vmem:[#allocation11 + $0x7ac] sm:$0xf0]  ;;  %v6170_v7 = vld [vmem:[#allocation11 + $0x428] sm:$0xf0] }
 0x193   :  { %2526 = vmatpush.bf16.msrb.mxu2 %v5693_v17  ;;  %2548 = vmatpush.bf16.msra.mxu0 %v6333_v18  ;;  %v5760_v17 = vld [vmem:[#allocation11 + $0xd0] sm:$0xf]  ;;  %v6625_v22 = vor.u32 %v8278_v13, %v6624_v12  ;;  %v6173_v23 = vor.u32 %v8161_v15, %v6170_v7  ;;  %v5858_v15 = vld [vmem:[#allocation11 + $0x1b0] sm:$0xf0] }
 0x194   :  { %2541 = vmatmul.bf16.vlgmr.msrb.gmra.mxu3 %v9011_v2  ;;  %v8062_v18 = vld [vmem:[#allocation11 + $0xec] sm:$0xf0] }
 0x195   :  { %2585 = vmatpush.bf16.msra.mxu3 %v6145_v14  ;;  %2563 = vmatpush.bf16.msra.mxu1 %v6525_v26  ;;  %v5793_v14 = vor.u32 %v8070_v5, %v5792_v4  ;;  %v8110_v26 = vld [vmem:[#allocation11 + $0x26c] sm:$0xf0]  ;;  %v5761_v27 = vor.u32 %v8062_v18, %v5760_v17  ;;  %v6085_v17 = vor.u32 %v8138_v9, %v6082_v11  ;;  %v6370_v9 = vld [vmem:[#allocation11 + $0x5b0] sm:$0xf0] }
 0x196   :  { %v5953_v35 = vor.u32 %v8110_v26, %v5952_v24  ;;  %v6336_v47 = vld [vmem:[#allocation11 + $0x550] sm:$0xf]  ;;  %v8098_v11 = vld [vmem:[#allocation11 + $0x214] sm:$0xf] }
 0x197   :  { %2527 = vmatpush.bf16.msrb.mxu2 %v5661_v32  ;;  %2549 = vmatpush.bf16.msra.mxu0 %v6301_v33  ;;  %v8054_v32 = vld [vmem:[#allocation11 + $0xac] sm:$0xf0] }
 0x198   :  { %v6368_v33 = vld [vmem:[#allocation11 + $0x590] sm:$0xf]  ;;  %v5729_v41 = vor.u32 %v8054_v32, %v5728_v31 }
 0x199   :  { %2586 = vmatpush.bf16.msra.mxu3 %v6113_v29  ;;  %2564 = vmatpush.bf16.msra.mxu1 %v6493_v39  ;;  %v6592_v29 = vld [vmem:[#allocation11 + $0x750] sm:$0xf] }
 0x19a   :  { %2528 = vmatmul.bf16.vlgmr.msrb.gmra.mxu2 %v9014_v25  ;;  %v6593_v37 = vor.u32 %v8270_v30, %v6592_v29  ;;  %v6560_v39 = vld [vmem:[#allocation11 + $0x710] sm:$0xf] }
 0x19b   :  { %2572 = vmatpush.bf16.msra.mxu2 %v5889_v36  ;;  %2550 = vmatpush.bf16.msra.mxu0 %v6269_v45  ;;  %v5920_v36 = vld [vmem:[#allocation11 + $0x210] sm:$0xf]  ;;  %v6561_v50 = vor.u32 %v8262_v40, %v6560_v39 }
 0x19c   :  { %v5696_v45 = vld [vmem:[#allocation11 + $0x50] sm:$0xf]  ;;  %v5921_v49 = vor.u32 %v8102_v38, %v5920_v36  ;;  %v6658_v38 = vld [vmem:[#allocation11 + $0x7f0] sm:$0xf0] }
 0x19d   :  { %2587 = vmatpush.bf16.msra.mxu3 %v6081_v42  ;;  %2565 = vmatpush.bf16.msra.mxu1 %v6461_v51  ;;  %v6369_v42 = vor.u32 %v8214_v34, %v6368_v33  ;;  %v6149_v51 = vor.u32 %v8154_v43, %v6146_v44  ;;  %v6528_v52 = vld [vmem:[#allocation11 + $0x6d0] sm:$0xf]  ;;  %v8122_v34 = vld [vmem:[#allocation11 + $0x2d4] sm:$0xf] }
 0x19e   :  { %v8254_v53 = vld [vmem:[#allocation11 + $0x6ec] sm:$0xf0] }
 0x19f   :  { %2573 = vmatpush.bf16.msra.mxu2 %v5857_v48  ;;  %2551 = vmatpush.bf16.msra.mxu0 %v6237_v59  ;;  %v8206_v48 = vld [vmem:[#allocation11 + $0x56c] sm:$0xf0]  ;;  %v6529_v1 = vor.u32 %v8254_v53, %v6528_v52 }
 0x1a0   :  { %v6337_v56 = vor.u32 %v8206_v48, %v6336_v47  ;;  %v5664_v59 = vld [vmem:[#allocation11 + $0x10] sm:$0xf]  ;;  %v5986_v47 = vld [vmem:[#allocation11 + $0x2b0] sm:$0xf0] }
 0x1a1   :  { %2588 = vmatpush.bf16.msra.mxu3 %v6049_v54  ;;  %2566 = vmatpush.bf16.msra.mxu1 %v6429_v3  ;;  %v5697_v54 = vor.u32 %v8046_v46, %v5696_v45  ;;  %v8038_v60 = vld [vmem:[#allocation11 + $0x2c] sm:$0xf0]  ;;  %v6117_v3 = vor.u32 %v8146_v57, %v6114_v58  ;;  %v8114_v46 = vld [vmem:[#allocation11 + $0x294] sm:$0xf] }
 0x1a2   :  { %v6304_v61 = vld [vmem:[#allocation11 + $0x510] sm:$0xf]  ;;  %v5665_v4 = vor.u32 %v8038_v60, %v5664_v59  ;;  %v8218_v57 = vld [vmem:[#allocation11 + $0x5d4] sm:$0xf]  ;;  %v5989_v59 = vor.u32 %v8114_v46, %v5986_v47  ;;  %v6088_v46 = vld [vmem:[#allocation11 + $0x358] sm:$0xf] }
 0x1a3   :  { %2574 = vmatpush.bf16.msra.mxu2 %v5825_v63  ;;  %2552 = vmatpush.bf16.msra.mxu0 %v6205_v10  ;;  %v8198_v62 = vld [vmem:[#allocation11 + $0x52c] sm:$0xf0]  ;;  %v8090_v63 = vld [vmem:[#allocation11 + $0x1d4] sm:$0xf] }
 0x1a4   :  { %2567 = vmatmul.bf16.vlgmr.msra.gmra.mxu1 %v9019_v55  ;;  %v6305_v5 = vor.u32 %v8198_v62, %v6304_v61  ;;  %v5893_v10 = vor.u32 %v8090_v63, %v5890_v0  ;;  %v6272_v12 = vld [vmem:[#allocation11 + $0x4d0] sm:$0xf]  ;;  %v6402_v58 = vld [vmem:[#allocation11 + $0x5f0] sm:$0xf0] }
 0x1a5   :  { %2589 = vmatpush.bf16.msra.mxu3 %v6017_v6  ;;  %2611 = vmatpush.bf16.msrb.mxu1 %v6657_v8  ;;  %v6496_v6 = vld [vmem:[#allocation11 + $0x690] sm:$0xf]  ;;  %v8106_v63 = vld [vmem:[#allocation11 + $0x254] sm:$0xf] }
 0x1a6   :  { %v8246_v8 = vld [vmem:[#allocation11 + $0x6ac] sm:$0xf0]  ;;  %v5954_v0 = vld [vmem:[#allocation11 + $0x270] sm:$0xf0] }
 0x1a7   :  { %2575 = vmatpush.bf16.msra.mxu2 %v5793_v14  ;;  %2553 = vmatpush.bf16.msra.mxu0 %v6173_v23  ;;  %v8190_v13 = vld [vmem:[#allocation11 + $0x4ec] sm:$0xf0]  ;;  %v8082_v14 = vld [vmem:[#allocation11 + $0x194] sm:$0xf]  ;;  %v6497_v7 = vor.u32 %v8246_v8, %v6496_v6 }
 0x1a8   :  { %v6273_v18 = vor.u32 %v8190_v13, %v6272_v12  ;;  %v6464_v19 = vld [vmem:[#allocation11 + $0x650] sm:$0xf]  ;;  %v6050_v23 = vld [vmem:[#allocation11 + $0x330] sm:$0xf0] }
 0x1a9   :  { %2590 = vmatpush.bf16.msra.mxu3 %v5985_v21  ;;  %2612 = vmatpush.bf16.msrb.mxu1 %v6625_v22  ;;  %v8238_v20 = vld [vmem:[#allocation11 + $0x66c] sm:$0xf0]  ;;  %v8130_v21 = vld [vmem:[#allocation11 + $0x314] sm:$0xf]  ;;  %v5861_v22 = vor.u32 %v8082_v14, %v5858_v15 }
 0x1aa   :  { %2554 = vmatmul.bf16.vlgmr.msra.gmra.mxu0 %v9023_v16  ;;  %v6240_v24 = vld [vmem:[#allocation11 + $0x490] sm:$0xf]  ;;  %v6465_v29 = vor.u32 %v8238_v20, %v6464_v19  ;;  %v6053_v31 = vor.u32 %v8130_v21, %v6050_v23  ;;  %v5730_v6 = vld [vmem:[#allocation11 + $0xb0] sm:$0xf0]  ;;  %v8159_v19 = vld [vmem:[#allocation11 + $0x3f4] sm:$0xf0] }
 0x1ab   :  { %2576 = vmatpush.bf16.msra.mxu2 %v5761_v27  ;;  %2598 = vmatpush.bf16.msrb.mxu0 %v6401_v28  ;;  %v8182_v26 = vld [vmem:[#allocation11 + $0x4ac] sm:$0xf0]  ;;  %v8074_v27 = vld [vmem:[#allocation11 + $0x154] sm:$0xf] }
 0x1ac   :  { %v5826_v28 = vld [vmem:[#allocation11 + $0x170] sm:$0xf0]  ;;  %v6432_v30 = vld [vmem:[#allocation11 + $0x610] sm:$0xf]  ;;  %v6241_v32 = vor.u32 %v8182_v26, %v6240_v24 }
 0x1ad   :  { %2591 = vmatpush.bf16.msra.mxu3 %v5953_v35  ;;  %2613 = vmatpush.bf16.msrb.mxu1 %v6593_v37  ;;  %v8230_v33 = vld [vmem:[#allocation11 + $0x62c] sm:$0xf0]  ;;  %v6018_v35 = vld [vmem:[#allocation11 + $0x2f0] sm:$0xf0]  ;;  %v5829_v36 = vor.u32 %v8074_v27, %v5826_v28 }
 0x1ae   :  { %v8282_v37 = vld [vmem:[#allocation11 + $0x7d4] sm:$0xf]  ;;  %v6208_v39 = vld [vmem:[#allocation11 + $0x450] sm:$0xf]  ;;  %v6433_v43 = vor.u32 %v8230_v33, %v6432_v30  ;;  %v6021_v44 = vor.u32 %v8122_v34, %v6018_v35  ;;  %v8151_v33 = vld [vmem:[#allocation11 + $0x3b4] sm:$0xf0] }
 0x1af   :  { %2577 = vmatpush.bf16.msra.mxu2 %v5729_v41  ;;  %2599 = vmatpush.bf16.msrb.mxu0 %v6369_v42  ;;  %v8174_v40 = vld [vmem:[#allocation11 + $0x46c] sm:$0xf0]  ;;  %v8066_v41 = vld [vmem:[#allocation11 + $0x114] sm:$0xf]  ;;  %v6661_v45 = vor.u32 %v8282_v37, %v6658_v38  ;;  %v5896_v38 = vld [vmem:[#allocation11 + $0x1d8] sm:$0xf] }
 0x1b0   :  { %v5794_v42 = vld [vmem:[#allocation11 + $0x130] sm:$0xf0]  ;;  %v6209_v48 = vor.u32 %v8174_v40, %v6208_v39  ;;  %v6176_v52 = vld [vmem:[#allocation11 + $0x410] sm:$0xf]  ;;  %v8095_v39 = vld [vmem:[#allocation11 + $0x1f4] sm:$0xf0] }
 0x1b1   :  { %2592 = vmatpush.bf16.msra.mxu3 %v5921_v49  ;;  %2614 = vmatpush.bf16.msrb.mxu1 %v6561_v50  ;;  %v5797_v49 = vor.u32 %v8066_v41, %v5794_v42  ;;  %v8274_v50 = vld [vmem:[#allocation11 + $0x794] sm:$0xf]  ;;  %v8166_v53 = vld [vmem:[#allocation11 + $0x42c] sm:$0xf0]  ;;  %v5897_v47 = vor.u32 %v8095_v39, %v5896_v38 }
 0x1b2   :  { %v6177_v61 = vor.u32 %v8166_v53, %v6176_v52  ;;  %v8210_v8 = vld [vmem:[#allocation11 + $0x594] sm:$0xf]  ;;  %v8087_v52 = vld [vmem:[#allocation11 + $0x1b4] sm:$0xf0] }
 0x1b3   :  { %2578 = vmatpush.bf16.msra.mxu2 %v5697_v54  ;;  %2600 = vmatpush.bf16.msrb.mxu0 %v6337_v56  ;;  %v8058_v54 = vld [vmem:[#allocation11 + $0xd4] sm:$0xf] }
 0x1b4   :  { %2593 = vmatmul.bf16.vlgmr.msra.gmra.mxu3 %v9011_v2  ;;  %v5762_v56 = vld [vmem:[#allocation11 + $0xf0] sm:$0xf0] }
 0x1b5   :  { %2637 = vmatpush.bf16.msrb.mxu3 %v6149_v51  ;;  %2615 = vmatpush.bf16.msrb.mxu1 %v6529_v1  ;;  %v6626_v51 = vld [vmem:[#allocation11 + $0x7b0] sm:$0xf0]  ;;  %v5765_v62 = vor.u32 %v8058_v54, %v5762_v56 }
 0x1b6   :  { %v6629_v60 = vor.u32 %v8274_v50, %v6626_v51  ;;  %v8266_v1 = vld [vmem:[#allocation11 + $0x754] sm:$0xf]  ;;  %v5864_v51 = vld [vmem:[#allocation11 + $0x198] sm:$0xf] }
 0x1b7   :  { %2579 = vmatpush.bf16.msra.mxu2 %v5665_v4  ;;  %2601 = vmatpush.bf16.msrb.mxu0 %v6305_v5  ;;  %v6594_v4 = vld [vmem:[#allocation11 + $0x770] sm:$0xf0] }
 0x1b8   :  { %v8050_v5 = vld [vmem:[#allocation11 + $0x94] sm:$0xf]  ;;  %v6597_v12 = vor.u32 %v8266_v1, %v6594_v4  ;;  %v8079_v1 = vld [vmem:[#allocation11 + $0x174] sm:$0xf0] }
 0x1b9   :  { %2638 = vmatpush.bf16.msrb.mxu3 %v6117_v3  ;;  %2616 = vmatpush.bf16.msrb.mxu1 %v6497_v7  ;;  %v6405_v3 = vor.u32 %v8218_v57, %v6402_v58  ;;  %v5733_v13 = vor.u32 %v8050_v5, %v5730_v6  ;;  %v5922_v14 = vld [vmem:[#allocation11 + $0x230] sm:$0xf0] }
 0x1ba   :  { %2580 = vmatmul.bf16.vlgmr.msra.gmra.mxu2 %v9014_v25  ;;  %v8258_v15 = vld [vmem:[#allocation11 + $0x714] sm:$0xf]  ;;  %v5925_v24 = vor.u32 %v8098_v11, %v5922_v14 }
 0x1bb   :  { %2624 = vmatpush.bf16.msrb.mxu2 %v5893_v10  ;;  %2602 = vmatpush.bf16.msrb.mxu0 %v6273_v18  ;;  %v5957_v10 = vor.u32 %v8106_v63, %v5954_v0  ;;  %v6562_v7 = vld [vmem:[#allocation11 + $0x730] sm:$0xf0]  ;;  %v6152_v18 = vld [vmem:[#allocation11 + $0x3d8] sm:$0xf] }
 0x1bc   :  { %v8042_v20 = vld [vmem:[#allocation11 + $0x54] sm:$0xf]  ;;  %v6565_v26 = vor.u32 %v8258_v15, %v6562_v7  ;;  %v6153_v27 = vor.u32 %v8159_v19, %v6152_v18  ;;  %v5832_v0 = vld [vmem:[#allocation11 + $0x158] sm:$0xf] }
 0x1bd   :  { %2639 = vmatpush.bf16.msrb.mxu3 %v6085_v17  ;;  %2617 = vmatpush.bf16.msrb.mxu1 %v6465_v29  ;;  %v6373_v17 = vor.u32 %v8210_v8, %v6370_v9  ;;  %v5698_v21 = vld [vmem:[#allocation11 + $0x70] sm:$0xf0]  ;;  %v6024_v9 = vld [vmem:[#allocation11 + $0x2d8] sm:$0xf]  ;;  %v5833_v11 = vor.u32 %v8079_v1, %v5832_v0  ;;  %v8155_v0 = vld [vmem:[#allocation11 + $0x3dc] sm:$0xf] }
 0x1be   :  { %v6338_v23 = vld [vmem:[#allocation11 + $0x570] sm:$0xf0]  ;;  %v5701_v30 = vor.u32 %v8042_v20, %v5698_v21  ;;  %v5800_v7 = vld [vmem:[#allocation11 + $0x118] sm:$0xf]  ;;  %v6154_v1 = vld [vmem:[#allocation11 + $0x3f8] sm:$0xf0] }
 0x1bf   :  { %2625 = vmatpush.bf16.msrb.mxu2 %v5861_v22  ;;  %2603 = vmatpush.bf16.msrb.mxu0 %v6241_v32  ;;  %v8202_v22 = vld [vmem:[#allocation11 + $0x554] sm:$0xf]  ;;  %v6120_v32 = vld [vmem:[#allocation11 + $0x398] sm:$0xf] }
 0x1c0   :  { %v8250_v28 = vld [vmem:[#allocation11 + $0x6d4] sm:$0xf]  ;;  %v6121_v41 = vor.u32 %v8151_v33, %v6120_v32  ;;  %v5768_v32 = vld [vmem:[#allocation11 + $0xd8] sm:$0xf] }
 0x1c1   :  { %2640 = vmatpush.bf16.msrb.mxu3 %v6053_v31  ;;  %2618 = vmatpush.bf16.msrb.mxu1 %v6433_v43  ;;  %v6530_v29 = vld [vmem:[#allocation11 + $0x6f0] sm:$0xf0]  ;;  %v6341_v31 = vor.u32 %v8202_v22, %v6338_v23  ;;  %v5992_v22 = vld [vmem:[#allocation11 + $0x298] sm:$0xf] }
 0x1c2   :  { %v8034_v34 = vld [vmem:[#allocation11 + $0x14] sm:$0xf]  ;;  %v6533_v40 = vor.u32 %v8250_v28, %v6530_v29  ;;  %v8119_v23 = vld [vmem:[#allocation11 + $0x2b4] sm:$0xf0] }
 0x1c3   :  { %2626 = vmatpush.bf16.msrb.mxu2 %v5829_v36  ;;  %2604 = vmatpush.bf16.msrb.mxu0 %v6209_v48  ;;  %v5666_v35 = vld [vmem:[#allocation11 + $0x30] sm:$0xf0]  ;;  %v8143_v48 = vld [vmem:[#allocation11 + $0x374] sm:$0xf0] }
 0x1c4   :  { %2619 = vmatmul.bf16.vlgmr.msrb.gmra.mxu1 %v9019_v55  ;;  %v8194_v36 = vld [vmem:[#allocation11 + $0x514] sm:$0xf]  ;;  %v5669_v42 = vor.u32 %v8034_v34, %v5666_v35  ;;  %v6089_v54 = vor.u32 %v8143_v48, %v6088_v46  ;;  %v6632_v28 = vld [vmem:[#allocation11 + $0x798] sm:$0xf] }
 0x1c5   :  { %2641 = vmatpush.bf16.msrb.mxu3 %v6021_v44  ;;  %2663 = vmatpush.bf16.msra.mxu1 %v6661_v45  ;;  %v6306_v37 = vld [vmem:[#allocation11 + $0x530] sm:$0xf0]  ;;  %v8279_v29 = vld [vmem:[#allocation11 + $0x7b4] sm:$0xf0] }
 0x1c6   :  { %v6309_v43 = vor.u32 %v8194_v36, %v6306_v37  ;;  %v8242_v44 = vld [vmem:[#allocation11 + $0x694] sm:$0xf]  ;;  %v8063_v33 = vld [vmem:[#allocation11 + $0xf4] sm:$0xf0]  ;;  %v5993_v37 = vor.u32 %v8119_v23, %v5992_v22  ;;  %v6633_v38 = vor.u32 %v8279_v29, %v6632_v28 }
 0x1c7   :  { %2627 = vmatpush.bf16.msrb.mxu2 %v5797_v49  ;;  %2605 = vmatpush.bf16.msrb.mxu0 %v6177_v61  ;;  %v6498_v45 = vld [vmem:[#allocation11 + $0x6b0] sm:$0xf0]  ;;  %v8135_v61 = vld [vmem:[#allocation11 + $0x334] sm:$0xf0] }
 0x1c8   :  { %v8186_v49 = vld [vmem:[#allocation11 + $0x4d4] sm:$0xf]  ;;  %v6501_v53 = vor.u32 %v8242_v44, %v6498_v45  ;;  %v6408_v35 = vld [vmem:[#allocation11 + $0x5d8] sm:$0xf] }
 0x1c9   :  { %2642 = vmatpush.bf16.msrb.mxu3 %v5989_v59  ;;  %2664 = vmatpush.bf16.msra.mxu1 %v6629_v60  ;;  %v6274_v50 = vld [vmem:[#allocation11 + $0x4f0] sm:$0xf0]  ;;  %v6056_v59 = vld [vmem:[#allocation11 + $0x318] sm:$0xf]  ;;  %v5865_v60 = vor.u32 %v8087_v52, %v5864_v51 }
 0x1ca   :  { %2606 = vmatmul.bf16.vlgmr.msrb.gmra.mxu0 %v9023_v16  ;;  %v6277_v56 = vor.u32 %v8186_v49, %v6274_v50  ;;  %v8234_v57 = vld [vmem:[#allocation11 + $0x654] sm:$0xf]  ;;  %v6057_v5 = vor.u32 %v8135_v61, %v6056_v59  ;;  %v8223_v36 = vld [vmem:[#allocation11 + $0x5f4] sm:$0xf0] }
 0x1cb   :  { %2628 = vmatpush.bf16.msrb.mxu2 %v5765_v62  ;;  %2650 = vmatpush.bf16.msra.mxu0 %v6405_v3  ;;  %v6466_v58 = vld [vmem:[#allocation11 + $0x670] sm:$0xf0]  ;;  %v6409_v45 = vor.u32 %v8223_v36, %v6408_v35  ;;  %v8271_v46 = vld [vmem:[#allocation11 + $0x774] sm:$0xf0]  ;;  %v8139_v36 = vld [vmem:[#allocation11 + $0x35c] sm:$0xf] }
 0x1cc   :  { %v8178_v62 = vld [vmem:[#allocation11 + $0x494] sm:$0xf]  ;;  %v6469_v3 = vor.u32 %v8234_v57, %v6466_v58  ;;  %v8055_v48 = vld [vmem:[#allocation11 + $0xb4] sm:$0xf0] }
 0x1cd   :  { %2643 = vmatpush.bf16.msrb.mxu3 %v5957_v10  ;;  %2665 = vmatpush.bf16.msra.mxu1 %v6597_v12  ;;  %v6242_v63 = vld [vmem:[#allocation11 + $0x4b0] sm:$0xf0]  ;;  %v8127_v10 = vld [vmem:[#allocation11 + $0x2f4] sm:$0xf0] }
 0x1ce   :  { %v8226_v4 = vld [vmem:[#allocation11 + $0x614] sm:$0xf]  ;;  %v6245_v6 = vor.u32 %v8178_v62, %v6242_v63  ;;  %v6664_v12 = vld [vmem:[#allocation11 + $0x7d8] sm:$0xf]  ;;  %v6025_v20 = vor.u32 %v8127_v10, %v6024_v9  ;;  %v6157_v10 = vor.u32 %v8155_v0, %v6154_v1 }
 0x1cf   :  { %2629 = vmatpush.bf16.msrb.mxu2 %v5733_v13  ;;  %2651 = vmatpush.bf16.msra.mxu0 %v6373_v17  ;;  %v6434_v8 = vld [vmem:[#allocation11 + $0x630] sm:$0xf0]  ;;  %v8287_v13 = vld [vmem:[#allocation11 + $0x7f4] sm:$0xf0] }
 0x1d0   :  { %v8170_v14 = vld [vmem:[#allocation11 + $0x454] sm:$0xf]  ;;  %v8071_v17 = vld [vmem:[#allocation11 + $0x134] sm:$0xf0]  ;;  %v6437_v18 = vor.u32 %v8226_v4, %v6434_v8  ;;  %v6665_v21 = vor.u32 %v8287_v13, %v6664_v12 }
 0x1d1   :  { %2644 = vmatpush.bf16.msrb.mxu3 %v5925_v24  ;;  %2666 = vmatpush.bf16.msra.mxu1 %v6565_v26  ;;  %v6210_v15 = vld [vmem:[#allocation11 + $0x470] sm:$0xf0]  ;;  %v9043_v24 = vld [vmem:[#allocation13] sm:$0xff]  ;;  %v6376_v50 = vld [vmem:[#allocation11 + $0x598] sm:$0xf] }
 0x1d2   :  { %v6213_v26 = vor.u32 %v8170_v14, %v6210_v15  ;;  %v1068_v34 = vperm.slane %v9043_v24, 0  ;;  %v8215_v51 = vld [vmem:[#allocation11 + $0x5b4] sm:$0xf0] }
 0x1d3   :  { %2630 = vmatpush.bf16.msrb.mxu2 %v5701_v30  ;;  %2652 = vmatpush.bf16.msra.mxu0 %v6341_v31  ;;  %v8162_v30 = vld [vmem:[#allocation11 + $0x414] sm:$0xf]  ;;  %v8103_v58 = vld [vmem:[#allocation11 + $0x234] sm:$0xf0]  ;;  %v6377_v63 = vor.u32 %v8215_v51, %v6376_v50  ;;  %v8131_v50 = vld [vmem:[#allocation11 + $0x31c] sm:$0xf] }
 0x1d4   :  { %2645 = vmatmul.bf16.vlgmr.msrb.gmra.mxu3 %v9011_v2  ;;  %v6178_v31 = vld [vmem:[#allocation11 + $0x430] sm:$0xf0]  ;;  %v6568_v59 = vld [vmem:[#allocation11 + $0x718] sm:$0xf] }
 0x1d5   :  { %2689 = vmatpush.bf16.msra.mxu3 %v6153_v27  ;;  %2667 = vmatpush.bf16.msra.mxu1 %v6533_v40  ;;  %v5801_v27 = vor.u32 %v8071_v17, %v5800_v7  ;;  %v6181_v39 = vor.u32 %v8162_v30, %v6178_v31  ;;  %v5769_v40 = vor.u32 %v8063_v33, %v5768_v32  ;;  %v8047_v4 = vld [vmem:[#allocation11 + $0x74] sm:$0xf0]  ;;  %v8147_v7 = vld [vmem:[#allocation11 + $0x39c] sm:$0xf] }
 0x1d6   :  { %v8255_v12 = vld [vmem:[#allocation11 + $0x6f4] sm:$0xf0]  ;;  %v6122_v17 = vld [vmem:[#allocation11 + $0x3b8] sm:$0xf0] }
 0x1d7   :  { %2631 = vmatpush.bf16.msrb.mxu2 %v5669_v42  ;;  %2653 = vmatpush.bf16.msra.mxu0 %v6309_v43  ;;  %v2386_v19 = vpop.f32.mrf.mxu3  ;;  %v8111_v42 = vld [vmem:[#allocation11 + $0x274] sm:$0xf0]  ;;  %v6125_v30 = vor.u32 %v8147_v7, %v6122_v17  ;;  %v8115_v17 = vld [vmem:[#allocation11 + $0x29c] sm:$0xf] }
 0x1d8   :  { %v6600_v43 = vld [vmem:[#allocation11 + $0x758] sm:$0xf] }
 0x1d9   :  { %2690 = vmatpush.bf16.msra.mxu3 %v6121_v41  ;;  %2668 = vmatpush.bf16.msra.mxu1 %v6501_v53  ;;  %v5960_v41 = vld [vmem:[#allocation11 + $0x258] sm:$0xf] }
 0x1da   :  { %2632 = vmatmul.bf16.vlgmr.msrb.gmra.mxu2 %v9014_v25  ;;  %v5961_v53 = vor.u32 %v8111_v42, %v5960_v41  ;;  %v8247_v35 = vld [vmem:[#allocation11 + $0x6b4] sm:$0xf0]  ;;  %v8083_v42 = vld [vmem:[#allocation11 + $0x19c] sm:$0xf] }
 0x1db   :  { %2676 = vmatpush.bf16.msra.mxu2 %v5897_v47  ;;  %2654 = vmatpush.bf16.msra.mxu0 %v6277_v56  ;;  %v5736_v47 = vld [vmem:[#allocation11 + $0x98] sm:$0xf]  ;;  %v6601_v56 = vor.u32 %v8271_v46, %v6600_v43  ;;  %v5866_v43 = vld [vmem:[#allocation11 + $0x1b8] sm:$0xf0] }
 0x1dc   :  { %v5737_v57 = vor.u32 %v8055_v48, %v5736_v47  ;;  %v8191_v41 = vld [vmem:[#allocation11 + $0x4f4] sm:$0xf0]  ;;  %v5869_v51 = vor.u32 %v8083_v42, %v5866_v43  ;;  %v8267_v42 = vld [vmem:[#allocation11 + $0x75c] sm:$0xf] }
 0x1dd   :  { %2691 = vmatpush.bf16.msra.mxu3 %v6089_v54  ;;  %2669 = vmatpush.bf16.msra.mxu1 %v6469_v3  ;;  %v2373_v44 = vpop.f32.mrf.mxu2  ;;  %v5928_v54 = vld [vmem:[#allocation11 + $0x218] sm:$0xf] }
 0x1de   :  { %v2374_v49 = vadd.f32 %v2373_v44, %v1068_v34  ;;  %v5704_v3 = vld [vmem:[#allocation11 + $0x58] sm:$0xf]  ;;  %v5929_v8 = vor.u32 %v8103_v58, %v5928_v54  ;;  %v8075_v58 = vld [vmem:[#allocation11 + $0x15c] sm:$0xf] }
 0x1df   :  { %2677 = vmatpush.bf16.msra.mxu2 %v5865_v60  ;;  %2655 = vmatpush.bf16.msra.mxu0 %v6245_v6  ;;  %v2388_v52 = vpop.f32.mrf.mxu3  ;;  %v8263_v60 = vld [vmem:[#allocation11 + $0x734] sm:$0xf0]  ;;  %v5705_v14 = vor.u32 %v8047_v4, %v5704_v3  ;;  %v8123_v3 = vld [vmem:[#allocation11 + $0x2dc] sm:$0xf] }
 0x1e0   :  { %v2387_v61 = vadd.f32 %v2386_v19, %v2374_v49  ;;  %v8207_v6 = vld [vmem:[#allocation11 + $0x574] sm:$0xf0]  ;;  %v6569_v9 = vor.u32 %v8263_v60, %v6568_v59  ;;  %v6058_v52 = vld [vmem:[#allocation11 + $0x338] sm:$0xf0] }
 0x1e1   :  { %2692 = vmatpush.bf16.msra.mxu3 %v6057_v5  ;;  %2670 = vmatpush.bf16.msra.mxu1 %v6437_v18  ;;  %v2412_v62 = vpop.f32.mrf.mxu1  ;;  %v6344_v5 = vld [vmem:[#allocation11 + $0x558] sm:$0xf]  ;;  %v5834_v59 = vld [vmem:[#allocation11 + $0x178] sm:$0xf0] }
 0x1e2   :  { %v6345_v15 = vor.u32 %v8207_v6, %v6344_v5  ;;  %v5672_v18 = vld [vmem:[#allocation11 + $0x18] sm:$0xf]  ;;  %v6026_v4 = vld [vmem:[#allocation11 + $0x2f8] sm:$0xf0]  ;;  %v5837_v5 = vor.u32 %v8075_v58, %v5834_v59 }
 0x1e3   :  { %2678 = vmatpush.bf16.msra.mxu2 %v5833_v11  ;;  %2656 = vmatpush.bf16.msra.mxu0 %v6213_v26  ;;  %v6536_v11 = vld [vmem:[#allocation11 + $0x6d8] sm:$0xf]  ;;  %v8091_v26 = vld [vmem:[#allocation11 + $0x1dc] sm:$0xf] }
 0x1e4   :  { %2671 = vmatmul.bf16.vlgmr.msra.gmra.mxu1 %v9019_v55  ;;  %v8039_v19 = vld [vmem:[#allocation11 + $0x34] sm:$0xf0]  ;;  %v6537_v29 = vor.u32 %v8255_v12, %v6536_v11  ;;  %v8283_v6 = vld [vmem:[#allocation11 + $0x7dc] sm:$0xf] }
 0x1e5   :  { %2693 = vmatpush.bf16.msra.mxu3 %v6025_v20  ;;  %2715 = vmatpush.bf16.msrb.mxu1 %v6665_v21  ;;  %v2375_v13 = vpop.f32.mrf.mxu2  ;;  %v6312_v20 = vld [vmem:[#allocation11 + $0x518] sm:$0xf]  ;;  %v5673_v32 = vor.u32 %v8039_v19, %v5672_v18  ;;  %v8067_v11 = vld [vmem:[#allocation11 + $0x11c] sm:$0xf] }
 0x1e6   :  { %v8199_v21 = vld [vmem:[#allocation11 + $0x534] sm:$0xf0]  ;;  %v5802_v12 = vld [vmem:[#allocation11 + $0x138] sm:$0xf0] }
 0x1e7   :  { %2679 = vmatpush.bf16.msra.mxu2 %v5801_v27  ;;  %2657 = vmatpush.bf16.msra.mxu0 %v6181_v39  ;;  %v2399_v22 = vpop.f32.mrf.mxu0  ;;  %v9048_v23 = vpop.f32.mrf.mxu3  ;;  %v5898_v27 = vld [vmem:[#allocation11 + $0x1f8] sm:$0xf0]  ;;  %v6313_v33 = vor.u32 %v8199_v21, %v6312_v20  ;;  %v6504_v34 = vld [vmem:[#allocation11 + $0x698] sm:$0xf]  ;;  %v5805_v20 = vor.u32 %v8067_v11, %v5802_v12 }
 0x1e8   :  { %v2400_v28 = vadd.f32 %v2399_v22, %v2387_v61  ;;  %v6090_v39 = vld [vmem:[#allocation11 + $0x378] sm:$0xf0]  ;;  %v6505_v44 = vor.u32 %v8247_v35, %v6504_v34  ;;  %v6472_v48 = vld [vmem:[#allocation11 + $0x658] sm:$0xf] }
 0x1e9   :  { %2694 = vmatpush.bf16.msra.mxu3 %v5993_v37  ;;  %2716 = vmatpush.bf16.msrb.mxu1 %v6633_v38  ;;  %v2414_v31 = vpop.f32.mrf.mxu1  ;;  %v5901_v38 = vor.u32 %v8091_v26, %v5898_v27  ;;  %v6093_v46 = vor.u32 %v8139_v36, %v6090_v39  ;;  %v8239_v49 = vld [vmem:[#allocation11 + $0x674] sm:$0xf0]  ;;  %v5994_v18 = vld [vmem:[#allocation11 + $0x2b8] sm:$0xf0] }
 0x1ea   :  { %2658 = vmatmul.bf16.vlgmr.msra.gmra.mxu0 %v9023_v16  ;;  %v9050_v37 = vadd.f32 %v2412_v62, %v2400_v28  ;;  %v8183_v54 = vld [vmem:[#allocation11 + $0x4b4] sm:$0xf0]  ;;  %v6473_v60 = vor.u32 %v8239_v49, %v6472_v48  ;;  %v8275_v21 = vld [vmem:[#allocation11 + $0x79c] sm:$0xf]  ;;  %v5997_v35 = vor.u32 %v8115_v17, %v5994_v18 }
 0x1eb   :  { %2680 = vmatpush.bf16.msra.mxu2 %v5769_v40  ;;  %2702 = vmatpush.bf16.msrb.mxu0 %v6409_v45  ;;  %v6280_v40 = vld [vmem:[#allocation11 + $0x4d8] sm:$0xf]  ;;  %v6634_v22 = vld [vmem:[#allocation11 + $0x7b8] sm:$0xf0] }
 0x1ec   :  { %v6281_v47 = vor.u32 %v8191_v41, %v6280_v40  ;;  %v6440_v61 = vld [vmem:[#allocation11 + $0x618] sm:$0xf]  ;;  %v5770_v31 = vld [vmem:[#allocation11 + $0xf8] sm:$0xf0]  ;;  %v6637_v36 = vor.u32 %v8275_v21, %v6634_v22  ;;  %v6784_v21 = vld [vmem:[#allocation14 + $0xe0] sm:$0xf] }
 0x1ed   :  { %2695 = vmatpush.bf16.msra.mxu3 %v5961_v53  ;;  %2717 = vmatpush.bf16.msrb.mxu1 %v6601_v56  ;;  %v9053_v45 = vpop.f32.mrf.mxu2  ;;  %v6248_v53 = vld [vmem:[#allocation11 + $0x498] sm:$0xf]  ;;  %v8107_v40 = vld [vmem:[#allocation11 + $0x25c] sm:$0xf] }
 0x1ee   :  { %v6249_v0 = vor.u32 %v8183_v54, %v6248_v53  ;;  %v8231_v1 = vld [vmem:[#allocation11 + $0x634] sm:$0xf0]  ;;  %v5962_v41 = vld [vmem:[#allocation11 + $0x278] sm:$0xf0] }
 0x1ef   :  { %2681 = vmatpush.bf16.msra.mxu2 %v5737_v57  ;;  %2703 = vmatpush.bf16.msrb.mxu0 %v6377_v63  ;;  %v2401_v56 = vpop.f32.mrf.mxu0  ;;  %v2440_v57 = vpop.f32.mrf.mxu3  ;;  %v6061_v63 = vor.u32 %v8131_v50, %v6058_v52  ;;  %v6441_v13 = vor.u32 %v8231_v1, %v6440_v61  ;;  %v6184_v26 = vld [vmem:[#allocation11 + $0x418] sm:$0xf]  ;;  %v8211_v48 = vld [vmem:[#allocation11 + $0x59c] sm:$0xf]  ;;  %v5965_v50 = vor.u32 %v8107_v40, %v5962_v41 }
 0x1f0   :  { %v6378_v49 = vld [vmem:[#allocation11 + $0x5b8] sm:$0xf0]  ;;  %v8318_v22 = vld [vmem:[#allocation14 + $0xec] sm:$0xf0] }
 0x1f1   :  { %2696 = vmatpush.bf16.msra.mxu3 %v5929_v8  ;;  %2718 = vmatpush.bf16.msrb.mxu1 %v6569_v9  ;;  %v9056_v62 = vpop.f32.mrf.mxu1  ;;  %v6666_v8 = vld [vmem:[#allocation11 + $0x7f8] sm:$0xf0]  ;;  %v6216_v9 = vld [vmem:[#allocation11 + $0x458] sm:$0xf]  ;;  %v6381_v61 = vor.u32 %v8211_v48, %v6378_v49 }
 0x1f2   :  { %v6669_v7 = vor.u32 %v8283_v6, %v6666_v8  ;;  %v5930_v56 = vld [vmem:[#allocation11 + $0x238] sm:$0xf0] }
 0x1f3   :  { %2682 = vmatpush.bf16.msra.mxu2 %v5705_v14  ;;  %2704 = vmatpush.bf16.msrb.mxu0 %v6345_v15  ;;  %v6029_v15 = vor.u32 %v8123_v3, %v6026_v4  ;;  %v8259_v57 = vld [vmem:[#allocation11 + $0x71c] sm:$0xf] }
 0x1f4   :  { %2697 = vmatmul.bf16.vlgmr.msra.gmra.mxu3 %v9011_v2  ;;  %v6570_v58 = vld [vmem:[#allocation11 + $0x738] sm:$0xf0] }
 0x1f5   :  { %2741 = vmatpush.bf16.msrb.mxu3 %v6157_v10  ;;  %2719 = vmatpush.bf16.msrb.mxu1 %v6537_v29  ;;  %v8175_v10 = vld [vmem:[#allocation11 + $0x474] sm:$0xf0]  ;;  %v2427_v14 = vpop.f32.mrf.mxu2  ;;  %v8043_v1 = vld [vmem:[#allocation11 + $0x5c] sm:$0xf] }
 0x1f6   :  { %v6217_v19 = vor.u32 %v8175_v10, %v6216_v9  ;;  %v8167_v29 = vld [vmem:[#allocation11 + $0x434] sm:$0xf0]  ;;  %v5706_v3 = vld [vmem:[#allocation11 + $0x78] sm:$0xf0]  ;;  %v6573_v9 = vor.u32 %v8259_v57, %v6570_v58  ;;  %v6752_v57 = vld [vmem:[#allocation14 + $0xa0] sm:$0xf] }
 0x1f7   :  { %2683 = vmatpush.bf16.msra.mxu2 %v5673_v32  ;;  %2705 = vmatpush.bf16.msrb.mxu0 %v6313_v33  ;;  %v9058_v27 = vpop.f32.mrf.mxu0  ;;  %v9060_v28 = vpop.f32.mrf.mxu3  ;;  %v8219_v32 = vld [vmem:[#allocation11 + $0x5dc] sm:$0xf]  ;;  %v8310_v58 = vld [vmem:[#allocation14 + $0xac] sm:$0xf0] }
 0x1f8   :  { %v6410_v33 = vld [vmem:[#allocation11 + $0x5f8] sm:$0xf0] }
 0x1f9   :  { %2742 = vmatpush.bf16.msrb.mxu3 %v6125_v30  ;;  %2720 = vmatpush.bf16.msrb.mxu1 %v6505_v44  ;;  %v8059_v30 = vld [vmem:[#allocation11 + $0xdc] sm:$0xf]  ;;  %v2466_v34 = vpop.f32.mrf.mxu1  ;;  %v6413_v43 = vor.u32 %v8219_v32, %v6410_v33 }
 0x1fa   :  { %2684 = vmatmul.bf16.vlgmr.msra.gmra.mxu2 %v9014_v25  ;;  %v5773_v39 = vor.u32 %v8059_v30, %v5770_v31  ;;  %v6602_v44 = vld [vmem:[#allocation11 + $0x778] sm:$0xf0] }
 0x1fb   :  { %2728 = vmatpush.bf16.msrb.mxu2 %v5901_v38  ;;  %2706 = vmatpush.bf16.msrb.mxu0 %v6281_v47  ;;  %v6185_v38 = vor.u32 %v8167_v29, %v6184_v26  ;;  %v5738_v47 = vld [vmem:[#allocation11 + $0xb8] sm:$0xf0]  ;;  %v6605_v53 = vor.u32 %v8267_v42, %v6602_v44  ;;  %v8314_v44 = vld [vmem:[#allocation14 + $0xcc] sm:$0xf0] }
 0x1fc   :  { %v8203_v4 = vld [vmem:[#allocation11 + $0x55c] sm:$0xf] }
 0x1fd   :  { %2743 = vmatpush.bf16.msrb.mxu3 %v6093_v46  ;;  %2721 = vmatpush.bf16.msrb.mxu1 %v6473_v60  ;;  %v8051_v46 = vld [vmem:[#allocation11 + $0x9c] sm:$0xf]  ;;  %v9063_v52 = vpop.f32.mrf.mxu2 }
 0x1fe   :  { %v5741_v54 = vor.u32 %v8051_v46, %v5738_v47  ;;  %v8251_v11 = vld [vmem:[#allocation11 + $0x6dc] sm:$0xf] }
 0x1ff   :  { %2729 = vmatpush.bf16.msrb.mxu2 %v5869_v51  ;;  %2707 = vmatpush.bf16.msrb.mxu0 %v6249_v0  ;;  %v8099_v51 = vld [vmem:[#allocation11 + $0x21c] sm:$0xf]  ;;  %v2453_v59 = vpop.f32.mrf.mxu0  ;;  %v2492_v60 = vpop.f32.mrf.mxu3  ;;  %v8350_v0 = vld [vmem:[#allocation14 + $0x1ec] sm:$0xf0] }
 0x200   :  { %v5933_v8 = vor.u32 %v8099_v51, %v5930_v56  ;;  %v6538_v12 = vld [vmem:[#allocation11 + $0x6f8] sm:$0xf0]  ;;  %v6864_v51 = vld [vmem:[#allocation14 + $0x180] sm:$0xf]  ;;  %v1069_v59 = vperm.slane %v9043_v24, 1 }
 0x201   :  { %2744 = vmatpush.bf16.msrb.mxu3 %v6061_v63  ;;  %2722 = vmatpush.bf16.msrb.mxu1 %v6441_v13  ;;  %v6912_v63 = vld [vmem:[#allocation14 + $0x1e0] sm:$0xf]  ;;  %v9066_v6 = vpop.f32.mrf.mxu1  ;;  %v5709_v13 = vor.u32 %v8043_v1, %v5706_v3  ;;  %v8035_v17 = vld [vmem:[#allocation11 + $0x1c] sm:$0xf]  ;;  %v6541_v29 = vor.u32 %v8251_v11, %v6538_v12 }
 0x202   :  { %v6913_v10 = vor.u32 %v8350_v0, %v6912_v63  ;;  %v5674_v18 = vld [vmem:[#allocation11 + $0x38] sm:$0xf0]  ;;  %v6848_v3 = vld [vmem:[#allocation14 + $0x160] sm:$0xf] }
 0x203   :  { %2730 = vmatpush.bf16.msrb.mxu2 %v5837_v5  ;;  %2708 = vmatpush.bf16.msrb.mxu0 %v6217_v19  ;;  %v6346_v5 = vld [vmem:[#allocation11 + $0x578] sm:$0xf0]  ;;  %v5677_v31 = vor.u32 %v8035_v17, %v5674_v18  ;;  %v6832_v18 = vld [vmem:[#allocation14 + $0x140] sm:$0xf] }
 0x204   :  { %2723 = vmatmul.bf16.vlgmr.msrb.gmra.mxu1 %v9019_v55  ;;  %v6349_v14 = vor.u32 %v8203_v4, %v6346_v5  ;;  %v8195_v19 = vld [vmem:[#allocation11 + $0x51c] sm:$0xf]  ;;  %v8334_v4 = vld [vmem:[#allocation14 + $0x16c] sm:$0xf0] }
 0x205   :  { %2745 = vmatpush.bf16.msrb.mxu3 %v6029_v15  ;;  %2767 = vmatpush.bf16.msra.mxu1 %v6669_v7  ;;  %v6896_v15 = vld [vmem:[#allocation14 + $0x1c0] sm:$0xf]  ;;  %v8346_v7 = vld [vmem:[#allocation14 + $0x1cc] sm:$0xf0]  ;;  %v2479_v26 = vpop.f32.mrf.mxu2  ;;  %v8243_v33 = vld [vmem:[#allocation11 + $0x69c] sm:$0xf] }
 0x206   :  { %v6897_v30 = vor.u32 %v8346_v7, %v6896_v15  ;;  %v6506_v34 = vld [vmem:[#allocation11 + $0x6b8] sm:$0xf0]  ;;  %v6849_v7 = vor.u32 %v8334_v4, %v6848_v3  ;;  %v7152_v26 = vld [vmem:[#allocation14 + $0x3c0] sm:$0xf]  ;;  %v8374_v4 = vld [vmem:[#allocation14 + $0x2ac] sm:$0xf0] }
 0x207   :  { %2731 = vmatpush.bf16.msrb.mxu2 %v5805_v20  ;;  %2709 = vmatpush.bf16.msrb.mxu0 %v6185_v38  ;;  %v6314_v20 = vld [vmem:[#allocation11 + $0x538] sm:$0xf0]  ;;  %v6785_v38 = vor.u32 %v8318_v22, %v6784_v21  ;;  %v6509_v46 = vor.u32 %v8243_v33, %v6506_v34  ;;  %v8302_v33 = vld [vmem:[#allocation14 + $0x6c] sm:$0xf0]  ;;  %v7040_v34 = vld [vmem:[#allocation14 + $0x2e0] sm:$0xf] }
 0x208   :  { %v6317_v32 = vor.u32 %v8195_v19, %v6314_v20  ;;  %v8187_v40 = vld [vmem:[#allocation11 + $0x4dc] sm:$0xf]  ;;  %v8330_v19 = vld [vmem:[#allocation14 + $0x14c] sm:$0xf0] }
 0x209   :  { %2746 = vmatpush.bf16.msrb.mxu3 %v5997_v35  ;;  %2768 = vmatpush.bf16.msra.mxu1 %v6637_v36  ;;  %v6880_v35 = vld [vmem:[#allocation14 + $0x1a0] sm:$0xf]  ;;  %v9069_v36 = vpop.f32.mrf.mxu0  ;;  %v6282_v41 = vld [vmem:[#allocation11 + $0x4f8] sm:$0xf0]  ;;  %v2518_v42 = vpop.f32.mrf.mxu1 }
 0x20a   :  { %2710 = vmatmul.bf16.vlgmr.msrb.gmra.mxu0 %v9023_v16  ;;  %v6285_v48 = vor.u32 %v8187_v40, %v6282_v41  ;;  %v8235_v49 = vld [vmem:[#allocation11 + $0x65c] sm:$0xf] }
 0x20b   :  { %2732 = vmatpush.bf16.msrb.mxu2 %v5773_v39  ;;  %2754 = vmatpush.bf16.msra.mxu0 %v6413_v43  ;;  %v8342_v39 = vld [vmem:[#allocation14 + $0x1ac] sm:$0xf0]  ;;  %v6768_v43 = vld [vmem:[#allocation14 + $0xc0] sm:$0xf]  ;;  %v6250_v56 = vld [vmem:[#allocation11 + $0x4b8] sm:$0xf0] }
 0x20c   :  { %v6881_v47 = vor.u32 %v8342_v39, %v6880_v35  ;;  %v6442_v1 = vld [vmem:[#allocation11 + $0x638] sm:$0xf0]  ;;  %v8382_v35 = vld [vmem:[#allocation14 + $0x2ec] sm:$0xf0] }
 0x20d   :  { %2747 = vmatpush.bf16.msrb.mxu3 %v5965_v50  ;;  %2769 = vmatpush.bf16.msra.mxu1 %v6605_v53  ;;  %v6474_v50 = vld [vmem:[#allocation11 + $0x678] sm:$0xf0]  ;;  %v8338_v53 = vld [vmem:[#allocation14 + $0x18c] sm:$0xf0] }
 0x20e   :  { %v6477_v60 = vor.u32 %v8235_v49, %v6474_v50  ;;  %v6865_v63 = vor.u32 %v8338_v53, %v6864_v51  ;;  %v8171_v11 = vld [vmem:[#allocation11 + $0x45c] sm:$0xf]  ;;  %v8298_v49 = vld [vmem:[#allocation14 + $0x4c] sm:$0xf0]  ;;  %v7024_v51 = vld [vmem:[#allocation14 + $0x2c0] sm:$0xf] }
 0x20f   :  { %2733 = vmatpush.bf16.msrb.mxu2 %v5741_v54  ;;  %2755 = vmatpush.bf16.msra.mxu0 %v6381_v61  ;;  %v8179_v54 = vld [vmem:[#allocation11 + $0x49c] sm:$0xf] }
 0x210   :  { %v8227_v61 = vld [vmem:[#allocation11 + $0x61c] sm:$0xf]  ;;  %v6253_v0 = vor.u32 %v8179_v54, %v6250_v56 }
 0x211   :  { %2748 = vmatpush.bf16.msrb.mxu3 %v5933_v8  ;;  %2770 = vmatpush.bf16.msra.mxu1 %v6573_v9  ;;  %v2505_v5 = vpop.f32.mrf.mxu0  ;;  %v6753_v8 = vor.u32 %v8310_v58, %v6752_v57  ;;  %v7168_v9 = vld [vmem:[#allocation14 + $0x3e0] sm:$0xf]  ;;  %v6218_v12 = vld [vmem:[#allocation11 + $0x478] sm:$0xf0]  ;;  %v6445_v15 = vor.u32 %v8227_v61, %v6442_v1 }
 0x212   :  { %v6221_v21 = vor.u32 %v8171_v11, %v6218_v12  ;;  %v7008_v1 = vld [vmem:[#allocation14 + $0x2a0] sm:$0xf]  ;;  %v1070_v11 = vperm.slane %v9043_v24, 2 }
 0x213   :  { %2734 = vmatpush.bf16.msrb.mxu2 %v5709_v13  ;;  %2756 = vmatpush.bf16.msra.mxu0 %v6349_v14  ;;  %v6736_v13 = vld [vmem:[#allocation14 + $0x80] sm:$0xf]  ;;  %v8306_v14 = vld [vmem:[#allocation14 + $0x8c] sm:$0xf0] }
 0x214   :  { %2749 = vmatmul.bf16.vlgmr.msrb.gmra.mxu3 %v9011_v2  ;;  %v6769_v2 = vor.u32 %v8314_v44, %v6768_v43  ;;  %v6737_v22 = vor.u32 %v8306_v14, %v6736_v13  ;;  %v6816_v43 = vld [vmem:[#allocation14 + $0x120] sm:$0xf]  ;;  %v8326_v44 = vld [vmem:[#allocation14 + $0x12c] sm:$0xf0] }
 0x215   :  { %4355 = vmatpush.bf16.msra.mxu3 %v6913_v10  ;;  %2771 = vmatpush.bf16.msra.mxu1 %v6541_v29  ;;  %v8414_v10 = vld [vmem:[#allocation14 + $0x3ec] sm:$0xf0]  ;;  %v6817_v53 = vor.u32 %v8326_v44, %v6816_v43  ;;  %v7424_v5 = vld [vmem:[#allocation14 + $0x5e0] sm:$0xf]  ;;  %v2478_v43 = vadd.f32 %v9063_v52, %v1070_v11 }
 0x216   :  { %v7169_v17 = vor.u32 %v8414_v10, %v7168_v9  ;;  %v8410_v29 = vld [vmem:[#allocation14 + $0x3cc] sm:$0xf0]  ;;  %v7104_v14 = vld [vmem:[#allocation14 + $0x360] sm:$0xf] }
 0x217   :  { %2735 = vmatpush.bf16.msrb.mxu2 %v5677_v31  ;;  %2757 = vmatpush.bf16.msra.mxu0 %v6317_v32  ;;  %v9074_v20 = vpop.f32.mrf.mxu3  ;;  %v6186_v31 = vld [vmem:[#allocation11 + $0x438] sm:$0xf0]  ;;  %v6720_v32 = vld [vmem:[#allocation14 + $0x60] sm:$0xf]  ;;  %v7153_v39 = vor.u32 %v8410_v29, %v7152_v26  ;;  %v8446_v26 = vld [vmem:[#allocation14 + $0x4ec] sm:$0xf0] }
 0x218   :  { %v6721_v42 = vor.u32 %v8302_v33, %v6720_v32  ;;  %v2780_v32 = vmax.f32 %v9050_v37, 0.0  ;;  %v8366_v37 = vld [vmem:[#allocation14 + $0x26c] sm:$0xf0] }
 0x219   :  { %4356 = vmatpush.bf16.msra.mxu3 %v6897_v30  ;;  %2772 = vmatpush.bf16.msra.mxu1 %v6509_v46  ;;  %v8163_v30 = vld [vmem:[#allocation11 + $0x41c] sm:$0xf]  ;;  %v7136_v46 = vld [vmem:[#allocation14 + $0x3a0] sm:$0xf]  ;;  %v8358_v11 = vld [vmem:[#allocation14 + $0x22c] sm:$0xf0] }
 0x21a   :  { %2736 = vmatmul.bf16.vlgmr.msrb.gmra.mxu2 %v9014_v25  ;;  %v2426_v25 = vadd.f32 %v9053_v45, %v1069_v59  ;;  %v6189_v41 = vor.u32 %v8163_v30, %v6186_v31  ;;  %v8322_v59 = vld [vmem:[#allocation14 + $0x10c] sm:$0xf0]  ;;  %v7408_v30 = vld [vmem:[#allocation14 + $0x5c0] sm:$0xf] }
 0x21b   :  { %4342 = vmatpush.bf16.msra.mxu2 %v6785_v38  ;;  %2758 = vmatpush.bf16.msra.mxu0 %v6285_v48  ;;  %v6833_v38 = vor.u32 %v8330_v19, %v6832_v18  ;;  %v6704_v48 = vld [vmem:[#allocation14 + $0x40] sm:$0xf]  ;;  %v8474_v31 = vld [vmem:[#allocation14 + $0x5cc] sm:$0xf0] }
 0x21c   :  { %v2439_v45 = vadd.f32 %v9048_v23, %v2426_v25  ;;  %v8406_v23 = vld [vmem:[#allocation14 + $0x3ac] sm:$0xf0]  ;;  %v6705_v58 = vor.u32 %v8298_v49, %v6704_v48  ;;  %v6992_v18 = vld [vmem:[#allocation14 + $0x280] sm:$0xf] }
 0x21d   :  { %4357 = vmatpush.bf16.msra.mxu3 %v6881_v47  ;;  %2773 = vmatpush.bf16.msra.mxu1 %v6477_v60  ;;  %v7041_v47 = vor.u32 %v8382_v35, %v7040_v34  ;;  %v2529_v50 = vpop.f32.mrf.mxu2  ;;  %v7137_v56 = vor.u32 %v8406_v23, %v7136_v46  ;;  %v8402_v60 = vld [vmem:[#allocation14 + $0x38c] sm:$0xf0]  ;;  %v7280_v46 = vld [vmem:[#allocation14 + $0x4c0] sm:$0xf]  ;;  %v7409_v23 = vor.u32 %v8474_v31, %v7408_v30 }
 0x21e   :  { %v2452_v40 = vadd.f32 %v9058_v27, %v2439_v45  ;;  %v6800_v27 = vld [vmem:[#allocation14 + $0x100] sm:$0xf]  ;;  %v8398_v25 = vld [vmem:[#allocation14 + $0x36c] sm:$0xf0] }
 0x21f   :  { %4343 = vmatpush.bf16.msra.mxu2 %v6769_v2  ;;  %2759 = vmatpush.bf16.msra.mxu0 %v6253_v0  ;;  %v8378_v2 = vld [vmem:[#allocation14 + $0x2cc] sm:$0xf0]  ;;  %v2544_v57 = vpop.f32.mrf.mxu3  ;;  %v6801_v9 = vor.u32 %v8322_v59, %v6800_v27  ;;  %v7105_v45 = vor.u32 %v8398_v25, %v7104_v14  ;;  %v7392_v49 = vld [vmem:[#allocation14 + $0x5a0] sm:$0xf] }
 0x220   :  { %v2465_v54 = vadd.f32 %v9056_v62, %v2452_v40  ;;  %v7025_v61 = vor.u32 %v8378_v2, %v7024_v51  ;;  %v8294_v0 = vld [vmem:[#allocation14 + $0x2c] sm:$0xf0]  ;;  %v1071_v62 = vperm.slane %v9043_v24, 3  ;;  %v7088_v40 = vld [vmem:[#allocation14 + $0x340] sm:$0xf]  ;;  %v9091_v51 = vpack.c.bf16 %v2780_v32, %v2780_v32 }
 0x221   :  { %4358 = vmatpush.bf16.msra.mxu3 %v6865_v63  ;;  %2774 = vmatpush.bf16.msra.mxu1 %v6445_v15  ;;  %v6688_v63 = vld [vmem:[#allocation14 + $0x20] sm:$0xf]  ;;  %v9080_v3 = vpop.f32.mrf.mxu1  ;;  %v7009_v15 = vor.u32 %v8374_v4, %v7008_v1  ;;  %v8362_v59 = vld [vmem:[#allocation14 + $0x24c] sm:$0xf0] }
 0x222   :  { %v2781_v10 = vmax.f32 %v2465_v54, 0.0  ;;  %v6689_v13 = vor.u32 %v8294_v0, %v6688_v63  ;;  %v2530_v29 = vadd.f32 %v2529_v50, %v1071_v62  ;;  %v8470_v50 = vld [vmem:[#allocation14 + $0x5ac] sm:$0xf0]  ;;  %v7072_v54 = vld [vmem:[#allocation14 + $0x320] sm:$0xf] }
 0x223   :  { %4344 = vmatpush.bf16.msra.mxu2 %v6753_v8  ;;  %2760 = vmatpush.bf16.msra.mxu0 %v6221_v21  ;;  %v8478_v8 = vld [vmem:[#allocation14 + $0x5ec] sm:$0xf0]  ;;  %v6960_v57 = vld [vmem:[#allocation14 + $0x240] sm:$0xf] }
 0x224   :  { %2775 = vmatmul.bf16.vlgmr.msra.gmra.mxu1 %v9019_v55  ;;  %v7120_v55 = vld [vmem:[#allocation14 + $0x380] sm:$0xf]  ;;  %v7425_v19 = vor.u32 %v8478_v8, %v7424_v5  ;;  %v9086_v33 = vpack.c.bf16 %v2781_v10, %v2781_v10  ;;  %v2543_v48 = vadd.f32 %v9074_v20, %v2530_v29  ;;  %v8438_v20 = vld [vmem:[#allocation14 + $0x4ac] sm:$0xf0]  ;;  %v6961_v8 = vor.u32 %v8362_v59, %v6960_v57 }
 0x225   :  { %4359 = vmatpush.bf16.msra.mxu3 %v6849_v7  ;;  %4381 = vmatpush.bf16.msrb.mxu1 %v7169_v17  ;;  %v7121_v12 = vor.u32 %v8402_v60, %v7120_v55  ;;  %v6672_v7 = vld [vmem:[#allocation14] sm:$0xf]  ;;  %v8290_v17 = vld [vmem:[#allocation14 + $0xc] sm:$0xf0]  ;;  %v2531_v21 = vpop.f32.mrf.mxu2  ;;  %v7393_v60 = vor.u32 %v8470_v50, %v7392_v49 }
 0x226   :  { %v6673_v35 = vor.u32 %v8290_v17, %v6672_v7  ;;  %v7264_v55 = vld [vmem:[#allocation14 + $0x4a0] sm:$0xf]  ;;  %v8466_v63 = vld [vmem:[#allocation14 + $0x58c] sm:$0xf0] }
 0x227   :  { %4345 = vmatpush.bf16.msra.mxu2 %v6737_v22  ;;  %2761 = vmatpush.bf16.msra.mxu0 %v6189_v41  ;;  %v8370_v22 = vld [vmem:[#allocation14 + $0x28c] sm:$0xf0]  ;;  %v2555_v34 = vpop.f32.mrf.mxu0  ;;  %v7056_v62 = vld [vmem:[#allocation14 + $0x300] sm:$0xf] }
 0x228   :  { %v8394_v41 = vld [vmem:[#allocation14 + $0x34c] sm:$0xf0]  ;;  %v6944_v10 = vld [vmem:[#allocation14 + $0x220] sm:$0xf] }
 0x229   :  { %4360 = vmatpush.bf16.msra.mxu3 %v6833_v38  ;;  %4382 = vmatpush.bf16.msrb.mxu1 %v7153_v39  ;;  %v6993_v38 = vor.u32 %v8370_v22, %v6992_v18  ;;  %v2570_v44 = vpop.f32.mrf.mxu1  ;;  %v7089_v2 = vor.u32 %v8394_v41, %v7088_v40  ;;  %v7360_v25 = vld [vmem:[#allocation14 + $0x560] sm:$0xf]  ;;  %v6945_v18 = vor.u32 %v8358_v11, %v6944_v10  ;;  %v8354_v22 = vld [vmem:[#allocation14 + $0x20c] sm:$0xf0]  ;;  %v8344_v10 = vld [vmem:[#allocation14 + $0x1c4] sm:$0xf] }
 0x22a   :  { %2762 = vmatmul.bf16.vlgmr.msra.gmra.mxu0 %v9023_v16  ;;  %v7296_v16 = vld [vmem:[#allocation14 + $0x4e0] sm:$0xf]  ;;  %v8458_v31 = vld [vmem:[#allocation14 + $0x54c] sm:$0xf0]  ;;  %v6898_v11 = vld [vmem:[#allocation14 + $0x1d0] sm:$0xf0] }
 0x22b   :  { %4346 = vmatpush.bf16.msra.mxu2 %v6721_v42  ;;  %4368 = vmatpush.bf16.msrb.mxu0 %v7041_v47  ;;  %v7297_v39 = vor.u32 %v8446_v26, %v7296_v16  ;;  %v6976_v42 = vld [vmem:[#allocation14 + $0x260] sm:$0xf]  ;;  %v8442_v47 = vld [vmem:[#allocation14 + $0x4cc] sm:$0xf0] }
 0x22c   :  { %v6977_v52 = vor.u32 %v8366_v37, %v6976_v42  ;;  %v7281_v27 = vor.u32 %v8442_v47, %v7280_v46  ;;  %v6928_v21 = vld [vmem:[#allocation14 + $0x200] sm:$0xf]  ;;  %v8430_v26 = vld [vmem:[#allocation14 + $0x46c] sm:$0xf0] }
 0x22d   :  { %4361 = vmatpush.bf16.msra.mxu3 %v6817_v53  ;;  %4383 = vmatpush.bf16.msrb.mxu1 %v7137_v56  ;;  %v2556_v53 = vadd.f32 %v2555_v34, %v2543_v48  ;;  %v8390_v56 = vld [vmem:[#allocation14 + $0x32c] sm:$0xf0]  ;;  %v7232_v16 = vld [vmem:[#allocation14 + $0x460] sm:$0xf] }
 0x22e   :  { %v7073_v1 = vor.u32 %v8390_v56, %v7072_v54  ;;  %v7344_v30 = vld [vmem:[#allocation14 + $0x540] sm:$0xf]  ;;  %v8426_v40 = vld [vmem:[#allocation14 + $0x44c] sm:$0xf0] }
 0x22f   :  { %4347 = vmatpush.bf16.msra.mxu2 %v6705_v58  ;;  %4369 = vmatpush.bf16.msrb.mxu0 %v7025_v61  ;;  %v2491_v58 = vadd.f32 %v9060_v28, %v2478_v43  ;;  %v7376_v61 = vld [vmem:[#allocation14 + $0x580] sm:$0xf]  ;;  %v2557_v4 = vpop.f32.mrf.mxu0  ;;  %v2569_v5 = vadd.f32 %v9080_v3, %v2556_v53  ;;  %v7265_v28 = vor.u32 %v8438_v20, %v7264_v55  ;;  %v8454_v37 = vld [vmem:[#allocation14 + $0x52c] sm:$0xf0]  ;;  %v8348_v55 = vld [vmem:[#allocation14 + $0x1e4] sm:$0xf] }
 0x230   :  { %v7377_v14 = vor.u32 %v8466_v63, %v7376_v61  ;;  %v7552_v32 = vld [vmem:[#allocation14 + $0x6e0] sm:$0xf]  ;;  %v7345_v41 = vor.u32 %v8458_v31, %v7344_v30  ;;  %v8506_v47 = vld [vmem:[#allocation14 + $0x6cc] sm:$0xf0]  ;;  %v6914_v20 = vld [vmem:[#allocation14 + $0x1f0] sm:$0xf0] }
 0x231   :  { %4362 = vmatpush.bf16.msra.mxu3 %v6801_v9  ;;  %4384 = vmatpush.bf16.msrb.mxu1 %v7121_v12  ;;  %v2504_v0 = vadd.f32 %v9069_v36, %v2491_v58  ;;  %v8386_v9 = vld [vmem:[#allocation14 + $0x30c] sm:$0xf0]  ;;  %v7248_v12 = vld [vmem:[#allocation14 + $0x480] sm:$0xf]  ;;  %v2783_v17 = vmax.f32 %v2569_v5, 0.0 }
 0x232   :  { %v7057_v36 = vor.u32 %v8386_v9, %v7056_v62  ;;  %v7328_v42 = vld [vmem:[#allocation14 + $0x520] sm:$0xf]  ;;  %v8422_v53 = vld [vmem:[#allocation14 + $0x42c] sm:$0xf0]  ;;  %v8308_v30 = vld [vmem:[#allocation14 + $0xa4] sm:$0xf] }
 0x233   :  { %4348 = vmatpush.bf16.msra.mxu2 %v6689_v13  ;;  %4370 = vmatpush.bf16.msrb.mxu0 %v7009_v15  ;;  %v8434_v13 = vld [vmem:[#allocation14 + $0x48c] sm:$0xf0]  ;;  %v2517_v7 = vadd.f32 %v9066_v6, %v2504_v0  ;;  %v9100_v6 = vpack.c.bf16 %v2783_v17, %v2783_v17  ;;  %v7536_v46 = vld [vmem:[#allocation14 + $0x6c0] sm:$0xf]  ;;  %v8316_v0 = vld [vmem:[#allocation14 + $0xe4] sm:$0xf] }
 0x234   :  { %4363 = vmatmul.bf16.vlgmr.msra.gmra.mxu3 %v9086_v33  ;;  %v8462_v15 = vld [vmem:[#allocation14 + $0x56c] sm:$0xf0]  ;;  %v7537_v54 = vor.u32 %v8506_v47, %v7536_v46  ;;  %v7520_v57 = vld [vmem:[#allocation14 + $0x6a0] sm:$0xf]  ;;  %v6770_v17 = vld [vmem:[#allocation14 + $0xd0] sm:$0xf0] }
 0x235   :  { %4407 = vmatpush.bf16.msrb.mxu3 %v7425_v19  ;;  %4385 = vmatpush.bf16.msrb.mxu1 %v7105_v45  ;;  %v7249_v19 = vor.u32 %v8434_v13, %v7248_v12  ;;  %v7361_v29 = vor.u32 %v8462_v15, %v7360_v25  ;;  %v8510_v45 = vld [vmem:[#allocation14 + $0x6ec] sm:$0xf0]  ;;  %v2782_v34 = vmax.f32 %v2517_v7, 0.0  ;;  %v7184_v61 = vld [vmem:[#allocation14 + $0x400] sm:$0xf] }
 0x236   :  { %v7553_v43 = vor.u32 %v8510_v45, %v7552_v32  ;;  %v8450_v56 = vld [vmem:[#allocation14 + $0x50c] sm:$0xf0]  ;;  %v7504_v62 = vld [vmem:[#allocation14 + $0x680] sm:$0xf]  ;;  %v8312_v15 = vld [vmem:[#allocation14 + $0xc4] sm:$0xf] }
 0x237   :  { %4349 = vmatpush.bf16.msra.mxu2 %v6673_v35  ;;  %4371 = vmatpush.bf16.msrb.mxu0 %v6993_v38  ;;  %v9098_v3 = vpop.f32.mrf.mxu3  ;;  %v6929_v35 = vor.u32 %v8354_v22, %v6928_v21  ;;  %v7233_v38 = vor.u32 %v8430_v26, %v7232_v16  ;;  %v9104_v50 = vpack.c.bf16 %v2782_v34, %v2782_v34  ;;  %v8502_v58 = vld [vmem:[#allocation14 + $0x6ac] sm:$0xf0]  ;;  %v8340_v16 = vld [vmem:[#allocation14 + $0x1a4] sm:$0xf]  ;;  %v6882_v26 = vld [vmem:[#allocation14 + $0x1b0] sm:$0xf0] }
 0x238   :  { %v8418_v63 = vld [vmem:[#allocation14 + $0x40c] sm:$0xf0]  ;;  %v7521_v4 = vor.u32 %v8502_v58, %v7520_v57  ;;  %v6754_v31 = vld [vmem:[#allocation14 + $0xb0] sm:$0xf0]  ;;  %v6885_v34 = vor.u32 %v8340_v16, %v6882_v26  ;;  %v8304_v46 = vld [vmem:[#allocation14 + $0x84] sm:$0xf] }
 0x239   :  { %4408 = vmatpush.bf16.msrb.mxu3 %v7409_v23  ;;  %4386 = vmatpush.bf16.msrb.mxu1 %v7089_v2  ;;  %v1072_v23 = vperm.slane %v9043_v24, 4  ;;  %v7200_v2 = vld [vmem:[#allocation14 + $0x420] sm:$0xf]  ;;  %v8498_v9 = vld [vmem:[#allocation14 + $0x68c] sm:$0xf0]  ;;  %v7185_v13 = vor.u32 %v8418_v63, %v7184_v61 }
 0x23a   :  { %4350 = vmatmul.bf16.vlgmr.msra.gmra.mxu2 %v9091_v51  ;;  %v8494_v21 = vld [vmem:[#allocation14 + $0x66c] sm:$0xf0]  ;;  %v8292_v26 = vld [vmem:[#allocation14 + $0x24] sm:$0xf] }
 0x23b   :  { %4394 = vmatpush.bf16.msrb.mxu2 %v7297_v39  ;;  %4372 = vmatpush.bf16.msrb.mxu0 %v6977_v52  ;;  %v7216_v39 = vld [vmem:[#allocation14 + $0x440] sm:$0xf]  ;;  %v7329_v52 = vor.u32 %v8454_v37, %v7328_v42  ;;  %v6757_v37 = vor.u32 %v8308_v30, %v6754_v31  ;;  %v8538_v57 = vld [vmem:[#allocation14 + $0x7cc] sm:$0xf0] }
 0x23c   :  { %v7217_v49 = vor.u32 %v8426_v40, %v7216_v39  ;;  %v8336_v39 = vld [vmem:[#allocation14 + $0x184] sm:$0xf]  ;;  %v6866_v40 = vld [vmem:[#allocation14 + $0x190] sm:$0xf0]  ;;  %v7680_v42 = vld [vmem:[#allocation14 + $0x7e0] sm:$0xf] }
 0x23d   :  { %4409 = vmatpush.bf16.msrb.mxu3 %v7393_v60  ;;  %4387 = vmatpush.bf16.msrb.mxu1 %v7073_v1  ;;  %v2581_v44 = vpop.f32.mrf.mxu2  ;;  %v7201_v60 = vor.u32 %v8422_v53, %v7200_v2  ;;  %v7456_v2 = vld [vmem:[#allocation14 + $0x620] sm:$0xf]  ;;  %v8486_v53 = vld [vmem:[#allocation14 + $0x62c] sm:$0xf0] }
 0x23e   :  { %v2582_v24 = vadd.f32 %v2581_v44, %v1072_v23 }
 0x23f   :  { %4395 = vmatpush.bf16.msrb.mxu2 %v7281_v27  ;;  %4373 = vmatpush.bf16.msrb.mxu0 %v6961_v8  ;;  %v2596_v48 = vpop.f32.mrf.mxu3  ;;  %v7312_v27 = vld [vmem:[#allocation14 + $0x500] sm:$0xf]  ;;  %v6786_v8 = vld [vmem:[#allocation14 + $0xf0] sm:$0xf0] }
 0x240   :  { %v7313_v1 = vor.u32 %v8450_v56, %v7312_v27  ;;  %v2595_v12 = vadd.f32 %v9098_v3, %v2582_v24  ;;  %v6789_v25 = vor.u32 %v8316_v0, %v6786_v8  ;;  %v6773_v3 = vor.u32 %v8312_v15, %v6770_v17  ;;  %v6738_v48 = vld [vmem:[#allocation14 + $0x90] sm:$0xf0]  ;;  %v7664_v56 = vld [vmem:[#allocation14 + $0x7c0] sm:$0xf] }
 0x241   :  { %4410 = vmatpush.bf16.msrb.mxu3 %v7377_v14  ;;  %4388 = vmatpush.bf16.msrb.mxu1 %v7057_v36  ;;  %v2620_v59 = vpop.f32.mrf.mxu1  ;;  %v7505_v36 = vor.u32 %v8498_v9, %v7504_v62  ;;  %v6850_v27 = vld [vmem:[#allocation14 + $0x170] sm:$0xf0]  ;;  %v6741_v58 = vor.u32 %v8304_v46, %v6738_v48  ;;  %v7457_v24 = vor.u32 %v8486_v53, %v7456_v2  ;;  %v7440_v0 = vld [vmem:[#allocation14 + $0x600] sm:$0xf]  ;;  %v8288_v46 = vld [vmem:[#allocation14 + $0x4] sm:$0xf] }
 0x242   :  { %v7042_v8 = vld [vmem:[#allocation14 + $0x2f0] sm:$0xf0]  ;;  %v8368_v53 = vld [vmem:[#allocation14 + $0x284] sm:$0xf] }
 0x243   :  { %4396 = vmatpush.bf16.msrb.mxu2 %v7265_v28  ;;  %4374 = vmatpush.bf16.msrb.mxu0 %v6945_v18  ;;  %v6917_v28 = vor.u32 %v8348_v55, %v6914_v20  ;;  %v6901_v18 = vor.u32 %v8344_v10, %v6898_v11  ;;  %v8328_v55 = vld [vmem:[#allocation14 + $0x144] sm:$0xf]  ;;  %v6834_v20 = vld [vmem:[#allocation14 + $0x150] sm:$0xf0] }
 0x244   :  { %4389 = vmatmul.bf16.vlgmr.msrb.gmra.mxu1 %v9100_v6  ;;  %v8296_v11 = vld [vmem:[#allocation14 + $0x44] sm:$0xf]  ;;  %v6818_v15 = vld [vmem:[#allocation14 + $0x130] sm:$0xf0] }
 0x245   :  { %4411 = vmatpush.bf16.msrb.mxu3 %v7361_v29  ;;  %v2583_v5 = vpop.f32.mrf.mxu2  ;;  %v7298_v2 = vld [vmem:[#allocation14 + $0x4f0] sm:$0xf0] }
 0x246   :  { %v8380_v5 = vld [vmem:[#allocation14 + $0x2e4] sm:$0xf] }
 0x247   :  { %4397 = vmatpush.bf16.msrb.mxu2 %v7249_v19  ;;  %4375 = vmatpush.bf16.msrb.mxu0 %v6929_v35  ;;  %v2607_v14 = vpop.f32.mrf.mxu0  ;;  %v7488_v19 = vld [vmem:[#allocation14 + $0x660] sm:$0xf] }
 0x248   :  { %v2608_v7 = vadd.f32 %v2607_v14, %v2595_v12  ;;  %v7489_v32 = vor.u32 %v8494_v21, %v7488_v19  ;;  %v7472_v35 = vld [vmem:[#allocation14 + $0x640] sm:$0xf]  ;;  %v6706_v12 = vld [vmem:[#allocation14 + $0x50] sm:$0xf0]  ;;  %v8324_v14 = vld [vmem:[#allocation14 + $0x124] sm:$0xf] }
 0x249   :  { %4412 = vmatpush.bf16.msrb.mxu3 %v7345_v41  ;;  %v2622_v22 = vpop.f32.mrf.mxu1  ;;  %v8530_v19 = vld [vmem:[#allocation14 + $0x78c] sm:$0xf0]  ;;  %v9113_v21 = vld [vmem:[#allocation13] sm:$0xff]  ;;  %v6709_v16 = vor.u32 %v8296_v11, %v6706_v12  ;;  %v6821_v31 = vor.u32 %v8324_v14, %v6818_v15  ;;  %v7426_v11 = vld [vmem:[#allocation14 + $0x5f0] sm:$0xf0] }
 0x24a   :  { %4376 = vmatmul.bf16.vlgmr.msrb.gmra.mxu0 %v9104_v50  ;;  %v2621_v29 = vadd.f32 %v2620_v59, %v2608_v7  ;;  %v6722_v59 = vld [vmem:[#allocation14 + $0x70] sm:$0xf0]  ;;  %v1073_v22 = vperm.slane %v9113_v21, 5  ;;  %v8436_v12 = vld [vmem:[#allocation14 + $0x4a4] sm:$0xf] }
 0x24b   :  { %4398 = vmatpush.bf16.msrb.mxu2 %v7233_v38  ;;  %4420 = vmatpush.bf16.msra.mxu0 %v7553_v43  ;;  %v8490_v38 = vld [vmem:[#allocation14 + $0x64c] sm:$0xf0]  ;;  %v7026_v7 = vld [vmem:[#allocation14 + $0x2d0] sm:$0xf0] }
 0x24c   :  { %v2784_v45 = vmax.f32 %v2621_v29, 0.0  ;;  %v8542_v43 = vld [vmem:[#allocation14 + $0x7ec] sm:$0xf0]  ;;  %v7473_v47 = vor.u32 %v8490_v38, %v7472_v35  ;;  %v6690_v29 = vld [vmem:[#allocation14 + $0x30] sm:$0xf0] }
 0x24d   :  { %4413 = vmatpush.bf16.msrb.mxu3 %v7329_v52  ;;  %v7681_v23 = vor.u32 %v8542_v43, %v7680_v42  ;;  %v8332_v52 = vld [vmem:[#allocation14 + $0x164] sm:$0xf]  ;;  %v7010_v38 = vld [vmem:[#allocation14 + $0x2b0] sm:$0xf0] }
 0x24e   :  { %v9108_v41 = vpack.c.bf16 %v2784_v45, %v2784_v45  ;;  %v6853_v63 = vor.u32 %v8332_v52, %v6850_v27  ;;  %v6802_v45 = vld [vmem:[#allocation14 + $0x110] sm:$0xf0]  ;;  %v8372_v35 = vld [vmem:[#allocation14 + $0x2a4] sm:$0xf] }
 0x24f   :  { %4399 = vmatpush.bf16.msrb.mxu2 %v7217_v49  ;;  %4421 = vmatpush.bf16.msra.mxu0 %v7537_v54  ;;  %v2609_v44 = vpop.f32.mrf.mxu0  ;;  %v6869_v49 = vor.u32 %v8336_v39, %v6866_v40  ;;  %v8300_v54 = vld [vmem:[#allocation14 + $0x64] sm:$0xf]  ;;  %v7616_v39 = vld [vmem:[#allocation14 + $0x760] sm:$0xf]  ;;  %v8526_v40 = vld [vmem:[#allocation14 + $0x76c] sm:$0xf0] }
 0x250   :  { %4433 = vmatpush.bf16.msra.mxu1 %v7681_v23  ;;  %v6725_v9 = vor.u32 %v8300_v54, %v6722_v59  ;;  %v7617_v42 = vor.u32 %v8526_v40, %v7616_v39  ;;  %v6693_v44 = vor.u32 %v8292_v26, %v6690_v29  ;;  %v8444_v23 = vld [vmem:[#allocation14 + $0x4e4] sm:$0xf]  ;;  %v6994_v52 = vld [vmem:[#allocation14 + $0x290] sm:$0xf0]  ;;  %v7600_v54 = vld [vmem:[#allocation14 + $0x740] sm:$0xf] }
 0x251   :  { %4414 = vmatpush.bf16.msrb.mxu3 %v7313_v1  ;;  %v8482_v1 = vld [vmem:[#allocation14 + $0x60c] sm:$0xf0]  ;;  %v7266_v14 = vld [vmem:[#allocation14 + $0x4b0] sm:$0xf0] }
 0x252   :  { %v7441_v10 = vor.u32 %v8482_v1, %v7440_v0  ;;  %v8364_v0 = vld [vmem:[#allocation14 + $0x264] sm:$0xf]  ;;  %v6978_v1 = vld [vmem:[#allocation14 + $0x270] sm:$0xf0]  ;;  %v7269_v29 = vor.u32 %v8436_v12, %v7266_v14 }
 0x253   :  { %4400 = vmatpush.bf16.msrb.mxu2 %v7201_v60  ;;  %4422 = vmatpush.bf16.msra.mxu0 %v7521_v4  ;;  %v7665_v60 = vor.u32 %v8538_v57, %v7664_v56  ;;  %v7648_v4 = vld [vmem:[#allocation14 + $0x7a0] sm:$0xf]  ;;  %v8522_v56 = vld [vmem:[#allocation14 + $0x74c] sm:$0xf0]  ;;  %v6962_v15 = vld [vmem:[#allocation14 + $0x250] sm:$0xf0] }
 0x254   :  { %v7106_v14 = vld [vmem:[#allocation14 + $0x370] sm:$0xf0] }
 0x255   :  { %4459 = vmatpush.bf16.msra.mxu3 %v6917_v28  ;;  %4434 = vmatpush.bf16.msra.mxu1 %v7665_v60  ;;  %v8534_v28 = vld [vmem:[#allocation14 + $0x7ac] sm:$0xf0] }
 0x256   :  { %v7649_v62 = vor.u32 %v8534_v28, %v7648_v4 }
 0x257   :  { %4401 = vmatpush.bf16.msrb.mxu2 %v7185_v13  ;;  %4423 = vmatpush.bf16.msra.mxu0 %v7505_v36  ;;  %v9111_v61 = vpop.f32.mrf.mxu3  ;;  %v6837_v13 = vor.u32 %v8328_v55, %v6834_v20  ;;  %v8376_v36 = vld [vmem:[#allocation14 + $0x2c4] sm:$0xf]  ;;  %v7301_v55 = vor.u32 %v8444_v23, %v7298_v2  ;;  %v7234_v23 = vld [vmem:[#allocation14 + $0x470] sm:$0xf0] }
 0x258   :  { %v8440_v20 = vld [vmem:[#allocation14 + $0x4c4] sm:$0xf] }
 0x259   :  { %4460 = vmatpush.bf16.msra.mxu3 %v6901_v18  ;;  %4435 = vmatpush.bf16.msra.mxu1 %v7649_v62  ;;  %v7632_v18 = vld [vmem:[#allocation14 + $0x780] sm:$0xf]  ;;  %v8352_v2 = vld [vmem:[#allocation14 + $0x204] sm:$0xf] }
 0x25a   :  { %4402 = vmatmul.bf16.vlgmr.msrb.gmra.mxu2 %v9108_v41 }
 0x25b   :  { %4446 = vmatpush.bf16.msra.mxu2 %v6789_v25  ;;  %4424 = vmatpush.bf16.msra.mxu0 %v7489_v32  ;;  %v7045_v25 = vor.u32 %v8380_v5, %v7042_v8  ;;  %v8320_v32 = vld [vmem:[#allocation14 + $0x104] sm:$0xf]  ;;  %v7584_v5 = vld [vmem:[#allocation14 + $0x720] sm:$0xf]  ;;  %v8518_v8 = vld [vmem:[#allocation14 + $0x72c] sm:$0xf0] }
 0x25c   :  { %v6805_v48 = vor.u32 %v8320_v32, %v6802_v45  ;;  %v7585_v62 = vor.u32 %v8518_v8, %v7584_v5  ;;  %v7170_v32 = vld [vmem:[#allocation14 + $0x3f0] sm:$0xf0]  ;;  %v8460_v8 = vld [vmem:[#allocation14 + $0x564] sm:$0xf] }
 0x25d   :  { %4461 = vmatpush.bf16.msra.mxu3 %v6885_v34  ;;  %v2633_v17 = vpop.f32.mrf.mxu2  ;;  %v7029_v34 = vor.u32 %v8376_v36, %v7026_v7  ;;  %v7568_v7 = vld [vmem:[#allocation14 + $0x700] sm:$0xf] }
 0x25f   :  { %4447 = vmatpush.bf16.msra.mxu2 %v6773_v3  ;;  %4425 = vmatpush.bf16.msra.mxu0 %v7473_v47  ;;  %v7633_v3 = vor.u32 %v8530_v19, %v7632_v18  ;;  %v2648_v30 = vpop.f32.mrf.mxu3  ;;  %v6674_v47 = vld [vmem:[#allocation14 + $0x10] sm:$0xf0]  ;;  %v8472_v19 = vld [vmem:[#allocation14 + $0x5c4] sm:$0xf] }
 0x260   :  { %v6677_v57 = vor.u32 %v8288_v46, %v6674_v47  ;;  %v7394_v46 = vld [vmem:[#allocation14 + $0x5b0] sm:$0xf0]  ;;  %v8428_v47 = vld [vmem:[#allocation14 + $0x464] sm:$0xf] }
 0x261   :  { %4462 = vmatpush.bf16.msra.mxu3 %v6869_v49  ;;  %4436 = vmatpush.bf16.msra.mxu1 %v7633_v3  ;;  %v2672_v43 = vpop.f32.mrf.mxu1  ;;  %v7013_v49 = vor.u32 %v8372_v35, %v7010_v38  ;;  %v8432_v3 = vld [vmem:[#allocation14 + $0x484] sm:$0xf]  ;;  %v6946_v38 = vld [vmem:[#allocation14 + $0x230] sm:$0xf0] }
 0x262   :  { %v8356_v35 = vld [vmem:[#allocation14 + $0x224] sm:$0xf] }
 0x263   :  { %4448 = vmatpush.bf16.msra.mxu2 %v6757_v37  ;;  %4426 = vmatpush.bf16.msra.mxu0 %v7457_v24  ;;  %v2634_v37 = vadd.f32 %v2633_v17, %v1073_v22  ;;  %v6997_v24 = vor.u32 %v8368_v53, %v6994_v52  ;;  %v8514_v17 = vld [vmem:[#allocation14 + $0x70c] sm:$0xf0]  ;;  %v7410_v22 = vld [vmem:[#allocation14 + $0x5d0] sm:$0xf0]  ;;  %v8404_v52 = vld [vmem:[#allocation14 + $0x3a4] sm:$0xf] }
 0x264   :  { %v7413_v40 = vor.u32 %v8472_v19, %v7410_v22  ;;  %v6930_v53 = vld [vmem:[#allocation14 + $0x210] sm:$0xf0] }
 0x265   :  { %4463 = vmatpush.bf16.msra.mxu3 %v6853_v63  ;;  %4437 = vmatpush.bf16.msra.mxu1 %v7617_v42  ;;  %v2635_v27 = vpop.f32.mrf.mxu2  ;;  %v2647_v59 = vadd.f32 %v9111_v61, %v2634_v37  ;;  %v7282_v63 = vld [vmem:[#allocation14 + $0x4d0] sm:$0xf0]  ;;  %v8476_v61 = vld [vmem:[#allocation14 + $0x5e4] sm:$0xf] }
 0x266   :  { %v7429_v18 = vor.u32 %v8476_v61, %v7426_v11  ;;  %v8468_v42 = vld [vmem:[#allocation14 + $0x5a4] sm:$0xf]  ;;  %v1074_v61 = vperm.slane %v9113_v21, 6  ;;  %v7186_v19 = vld [vmem:[#allocation14 + $0x410] sm:$0xf0] }
 0x267   :  { %4449 = vmatpush.bf16.msra.mxu2 %v6741_v58  ;;  %4427 = vmatpush.bf16.msra.mxu0 %v7441_v10  ;;  %v7601_v58 = vor.u32 %v8522_v56, %v7600_v54  ;;  %v2659_v60 = vpop.f32.mrf.mxu0  ;;  %v7285_v10 = vor.u32 %v8440_v20, %v7282_v63  ;;  %v7138_v54 = vld [vmem:[#allocation14 + $0x3b0] sm:$0xf0]  ;;  %v7397_v56 = vor.u32 %v8468_v42, %v7394_v46  ;;  %v6776_v42 = vld [vmem:[#allocation14 + $0xc8] sm:$0xf]  ;;  %v8388_v46 = vld [vmem:[#allocation14 + $0x324] sm:$0xf] }
 0x268   :  { %v2660_v4 = vadd.f32 %v2659_v60, %v2647_v59  ;;  %v8464_v59 = vld [vmem:[#allocation14 + $0x584] sm:$0xf]  ;;  %v6933_v20 = vor.u32 %v8352_v2, %v6930_v53  ;;  %v7218_v60 = vld [vmem:[#allocation14 + $0x450] sm:$0xf0] }
 0x269   :  { %4464 = vmatpush.bf16.msra.mxu3 %v6837_v13  ;;  %4438 = vmatpush.bf16.msra.mxu1 %v7601_v58  ;;  %v2674_v28 = vpop.f32.mrf.mxu1  ;;  %v6981_v13 = vor.u32 %v8364_v0, %v6978_v1  ;;  %v7237_v58 = vor.u32 %v8428_v47, %v7234_v23  ;;  %v8400_v0 = vld [vmem:[#allocation14 + $0x384] sm:$0xf]  ;;  %v7122_v1 = vld [vmem:[#allocation14 + $0x390] sm:$0xf0] }
 0x26a   :  { %v7362_v28 = vld [vmem:[#allocation14 + $0x570] sm:$0xf0] }
 0x26b   :  { %4450 = vmatpush.bf16.msra.mxu2 %v6725_v9  ;;  %4472 = vmatpush.bf16.msrb.mxu0 %v7045_v25  ;;  %v2673_v9 = vadd.f32 %v2672_v43, %v2660_v4  ;;  %v8360_v25 = vld [vmem:[#allocation14 + $0x244] sm:$0xf]  ;;  %v7365_v12 = vor.u32 %v8460_v8, %v7362_v28  ;;  %v7074_v47 = vld [vmem:[#allocation14 + $0x330] sm:$0xf0]  ;;  %v6904_v8 = vld [vmem:[#allocation14 + $0x1c8] sm:$0xf] }
 0x26c   :  { %v6965_v30 = vor.u32 %v8360_v25, %v6962_v15  ;;  %v8408_v43 = vld [vmem:[#allocation14 + $0x3c4] sm:$0xf]  ;;  %v7077_v2 = vor.u32 %v8388_v46, %v7074_v47  ;;  %v8347_v28 = vld [vmem:[#allocation14 + $0x1d4] sm:$0xf0]  ;;  %v7490_v46 = vld [vmem:[#allocation14 + $0x670] sm:$0xf0] }
 0x26d   :  { %4465 = vmatpush.bf16.msra.mxu3 %v6821_v31  ;;  %4439 = vmatpush.bf16.msra.mxu1 %v7585_v62  ;;  %v2785_v36 = vmax.f32 %v2673_v9, 0.0  ;;  %v8412_v31 = vld [vmem:[#allocation14 + $0x3e4] sm:$0xf]  ;;  %v7125_v62 = vor.u32 %v8400_v0, %v7122_v1  ;;  %v6696_v47 = vld [vmem:[#allocation14 + $0x28] sm:$0xf] }
 0x26e   :  { %v7173_v39 = vor.u32 %v8412_v31, %v7170_v32  ;;  %v8420_v9 = vld [vmem:[#allocation14 + $0x424] sm:$0xf]  ;;  %v7090_v31 = vld [vmem:[#allocation14 + $0x350] sm:$0xf0] }
 0x26f   :  { %4451 = vmatpush.bf16.msra.mxu2 %v6709_v16  ;;  %4473 = vmatpush.bf16.msrb.mxu0 %v7029_v34  ;;  %v7569_v16 = vor.u32 %v8514_v17, %v7568_v7  ;;  %v9118_v26 = vpack.c.bf16 %v2785_v36, %v2785_v36  ;;  %v2661_v45 = vpop.f32.mrf.mxu0  ;;  %v7250_v34 = vld [vmem:[#allocation14 + $0x490] sm:$0xf0]  ;;  %v8456_v15 = vld [vmem:[#allocation14 + $0x544] sm:$0xf] }
 0x270   :  { %v7253_v37 = vor.u32 %v8432_v3, %v7250_v34  ;;  %v7346_v36 = vld [vmem:[#allocation14 + $0x550] sm:$0xf0]  ;;  %v8452_v34 = vld [vmem:[#allocation14 + $0x524] sm:$0xf] }
 0x271   :  { %4466 = vmatpush.bf16.msra.mxu3 %v6805_v48  ;;  %4440 = vmatpush.bf16.msra.mxu1 %v7569_v16  ;;  %v6949_v48 = vor.u32 %v8356_v35, %v6946_v38  ;;  %v6792_v16 = vld [vmem:[#allocation14 + $0xe8] sm:$0xf]  ;;  %v7349_v3 = vor.u32 %v8456_v15, %v7346_v36  ;;  %v7330_v35 = vld [vmem:[#allocation14 + $0x530] sm:$0xf0]  ;;  %v8500_v15 = vld [vmem:[#allocation14 + $0x6a4] sm:$0xf] }
 0x272   :  { %4415 = vmatmul.bf16.vlgmr.msrb.gmra.mxu3 %v9118_v26  ;;  %v6888_v36 = vld [vmem:[#allocation14 + $0x1a8] sm:$0xf] }
 0x273   :  { %4452 = vmatpush.bf16.msra.mxu2 %v6693_v44  ;;  %4474 = vmatpush.bf16.msrb.mxu0 %v7013_v49  ;;  %v7154_v44 = vld [vmem:[#allocation14 + $0x3d0] sm:$0xf0] }
 0x274   :  { %v7157_v49 = vor.u32 %v8408_v43, %v7154_v44  ;;  %v8315_v43 = vld [vmem:[#allocation14 + $0xd4] sm:$0xf0] }
 0x275   :  { %4511 = vmatpush.bf16.msrb.mxu3 %v7429_v18  ;;  %4485 = vmatpush.bf16.msrb.mxu1 %v7173_v39  ;;  %v8416_v18 = vld [vmem:[#allocation14 + $0x404] sm:$0xf] }
 0x276   :  { %v7189_v45 = vor.u32 %v8416_v18, %v7186_v19  ;;  %v6728_v18 = vld [vmem:[#allocation14 + $0x68] sm:$0xf]  ;;  %v8303_v19 = vld [vmem:[#allocation14 + $0x74] sm:$0xf0] }
 0x277   :  { %4453 = vmatpush.bf16.msra.mxu2 %v6677_v57  ;;  %4475 = vmatpush.bf16.msrb.mxu0 %v6997_v24  ;;  %v2698_v27 = vpop.f32.mrf.mxu3  ;;  %v7141_v57 = vor.u32 %v8404_v52, %v7138_v54  ;;  %v8424_v24 = vld [vmem:[#allocation14 + $0x444] sm:$0xf]  ;;  %v6777_v52 = vor.u32 %v8315_v43, %v6776_v42  ;;  %v6856_v43 = vld [vmem:[#allocation14 + $0x168] sm:$0xf] }
 0x278   :  { %v7221_v5 = vor.u32 %v8424_v24, %v7218_v60  ;;  %v8508_v54 = vld [vmem:[#allocation14 + $0x6e4] sm:$0xf]  ;;  %v7058_v60 = vld [vmem:[#allocation14 + $0x310] sm:$0xf0] }
 0x279   :  { %4512 = vmatpush.bf16.msrb.mxu3 %v7413_v40  ;;  %4486 = vmatpush.bf16.msrb.mxu1 %v7157_v49  ;;  %v7314_v49 = vld [vmem:[#allocation14 + $0x510] sm:$0xf0]  ;;  %v8384_v24 = vld [vmem:[#allocation14 + $0x304] sm:$0xf] }
 0x27a   :  { %4454 = vmatmul.bf16.vlgmr.msra.gmra.mxu2 %v9091_v51  ;;  %v8492_v42 = vld [vmem:[#allocation14 + $0x664] sm:$0xf] }
 0x27b   :  { %4498 = vmatpush.bf16.msrb.mxu2 %v7301_v55  ;;  %4476 = vmatpush.bf16.msrb.mxu0 %v6981_v13  ;;  %v7378_v55 = vld [vmem:[#allocation14 + $0x590] sm:$0xf0]  ;;  %v8396_v13 = vld [vmem:[#allocation14 + $0x364] sm:$0xf] }
 0x27c   :  { %v7381_v63 = vor.u32 %v8464_v59, %v7378_v55  ;;  %v7109_v7 = vor.u32 %v8396_v13, %v7106_v14  ;;  %v6760_v59 = vld [vmem:[#allocation14 + $0xa8] sm:$0xf]  ;;  %v8311_v55 = vld [vmem:[#allocation14 + $0xb4] sm:$0xf0]  ;;  %v6905_v13 = vor.u32 %v8347_v28, %v6904_v8  ;;  %v8484_v28 = vld [vmem:[#allocation14 + $0x624] sm:$0xf] }
 0x27d   :  { %4513 = vmatpush.bf16.msrb.mxu3 %v7397_v56  ;;  %4487 = vmatpush.bf16.msrb.mxu1 %v7141_v57  ;;  %v2685_v4 = vpop.f32.mrf.mxu2  ;;  %v6920_v56 = vld [vmem:[#allocation14 + $0x1e8] sm:$0xf]  ;;  %v8351_v57 = vld [vmem:[#allocation14 + $0x1f4] sm:$0xf0] }
 0x27e   :  { %v2686_v22 = vadd.f32 %v2685_v4, %v1074_v61  ;;  %v6921_v0 = vor.u32 %v8351_v57, %v6920_v56  ;;  %v6761_v4 = vor.u32 %v8311_v55, %v6760_v59  ;;  %v8307_v61 = vld [vmem:[#allocation14 + $0x94] sm:$0xf0]  ;;  %v6840_v56 = vld [vmem:[#allocation14 + $0x148] sm:$0xf] }
 0x27f   :  { %4499 = vmatpush.bf16.msrb.mxu2 %v7285_v10  ;;  %4477 = vmatpush.bf16.msrb.mxu0 %v6965_v30  ;;  %v7202_v10 = vld [vmem:[#allocation14 + $0x430] sm:$0xf0]  ;;  %v2700_v11 = vpop.f32.mrf.mxu3  ;;  %v8392_v30 = vld [vmem:[#allocation14 + $0x344] sm:$0xf]  ;;  %v8331_v57 = vld [vmem:[#allocation14 + $0x154] sm:$0xf0] }
 0x280   :  { %v7205_v25 = vor.u32 %v8420_v9, %v7202_v10  ;;  %v7093_v38 = vor.u32 %v8392_v30, %v7090_v31  ;;  %v2699_v40 = vadd.f32 %v2698_v27, %v2686_v22  ;;  %v7538_v9 = vld [vmem:[#allocation14 + $0x6d0] sm:$0xf0]  ;;  %v6744_v10 = vld [vmem:[#allocation14 + $0x88] sm:$0xf]  ;;  %v7061_v11 = vor.u32 %v8384_v24, %v7058_v60  ;;  %v8496_v30 = vld [vmem:[#allocation14 + $0x684] sm:$0xf] }
 0x281   :  { %4514 = vmatpush.bf16.msrb.mxu3 %v7381_v63  ;;  %4488 = vmatpush.bf16.msrb.mxu1 %v7125_v62  ;;  %v2724_v17 = vpop.f32.mrf.mxu1  ;;  %v6872_v31 = vld [vmem:[#allocation14 + $0x188] sm:$0xf]  ;;  %v8291_v59 = vld [vmem:[#allocation14 + $0x14] sm:$0xf0] }
 0x282   :  { %4467 = vmatmul.bf16.vlgmr.msra.gmra.mxu3 %v9086_v33  ;;  %v8447_v24 = vld [vmem:[#allocation14 + $0x4f4] sm:$0xf0] }
 0x283   :  { %4500 = vmatpush.bf16.msrb.mxu2 %v7269_v29  ;;  %4478 = vmatpush.bf16.msrb.mxu0 %v6949_v48  ;;  %v8319_v29 = vld [vmem:[#allocation14 + $0xf4] sm:$0xf0]  ;;  %v8448_v48 = vld [vmem:[#allocation14 + $0x504] sm:$0xf] }
 0x284   :  { %v6793_v39 = vor.u32 %v8319_v29, %v6792_v16 }
 0x285   :  { %4515 = vmatpush.bf16.msrb.mxu3 %v7365_v12  ;;  %4489 = vmatpush.bf16.msrb.mxu1 %v7109_v7  ;;  %v2687_v32 = vpop.f32.mrf.mxu2  ;;  %v8343_v7 = vld [vmem:[#allocation14 + $0x1b4] sm:$0xf0] }
 0x286   :  { %v6889_v16 = vor.u32 %v8343_v7, %v6888_v36  ;;  %v8339_v32 = vld [vmem:[#allocation14 + $0x194] sm:$0xf0] }
 0x287   :  { %4501 = vmatpush.bf16.msrb.mxu2 %v7253_v37  ;;  %4479 = vmatpush.bf16.msrb.mxu0 %v6933_v20  ;;  %v2711_v44 = vpop.f32.mrf.mxu0  ;;  %v7333_v37 = vor.u32 %v8452_v34, %v7330_v35  ;;  %v7317_v20 = vor.u32 %v8448_v48, %v7314_v49  ;;  %v6712_v34 = vld [vmem:[#allocation14 + $0x48] sm:$0xf]  ;;  %v8299_v35 = vld [vmem:[#allocation14 + $0x54] sm:$0xf0]  ;;  %v1075_v48 = vperm.slane %v9113_v21, 7  ;;  %v6841_v21 = vor.u32 %v8331_v57, %v6840_v56 }
 0x288   :  { %v2712_v23 = vadd.f32 %v2711_v44, %v2699_v40  ;;  %v6713_v40 = vor.u32 %v8299_v35, %v6712_v34  ;;  %v8335_v44 = vld [vmem:[#allocation14 + $0x174] sm:$0xf0]  ;;  %v7272_v34 = vld [vmem:[#allocation14 + $0x4a8] sm:$0xf] }
 0x289   :  { %4516 = vmatpush.bf16.msrb.mxu3 %v7349_v3  ;;  %4490 = vmatpush.bf16.msrb.mxu1 %v7093_v38  ;;  %v2726_v53 = vpop.f32.mrf.mxu1  ;;  %v6729_v3 = vor.u32 %v8303_v19, %v6728_v18  ;;  %v6873_v38 = vor.u32 %v8339_v32, %v6872_v31  ;;  %v8323_v36 = vld [vmem:[#allocation14 + $0x114] sm:$0xf0]  ;;  %v7442_v18 = vld [vmem:[#allocation14 + $0x610] sm:$0xf0]  ;;  %v7432_v19 = vld [vmem:[#allocation14 + $0x5e8] sm:$0xf] }
 0x28a   :  { %v2725_v27 = vadd.f32 %v2724_v17, %v2712_v23  ;;  %v7522_v17 = vld [vmem:[#allocation14 + $0x6b0] sm:$0xf0]  ;;  %v8295_v23 = vld [vmem:[#allocation14 + $0x34] sm:$0xf0]  ;;  %v7493_v53 = vor.u32 %v8492_v42, %v7490_v46 }
 0x28b   :  { %4502 = vmatpush.bf16.msrb.mxu2 %v7237_v58  ;;  %v7554_v58 = vld [vmem:[#allocation14 + $0x6f0] sm:$0xf0]  ;;  %v7525_v29 = vor.u32 %v8500_v15, %v7522_v17  ;;  %v6808_v15 = vld [vmem:[#allocation14 + $0x108] sm:$0xf]  ;;  %v8383_v31 = vld [vmem:[#allocation14 + $0x2f4] sm:$0xf0] }
 0x28c   :  { %v2786_v63 = vmax.f32 %v2725_v27, 0.0  ;;  %v7557_v1 = vor.u32 %v8508_v54, %v7554_v58  ;;  %v8488_v54 = vld [vmem:[#allocation14 + $0x644] sm:$0xf]  ;;  %v7474_v27 = vld [vmem:[#allocation14 + $0x650] sm:$0xf0]  ;;  %v6809_v32 = vor.u32 %v8323_v36, %v6808_v15 }
 0x28d   :  { %4517 = vmatpush.bf16.msrb.mxu3 %v7333_v37  ;;  %4491 = vmatpush.bf16.msrb.mxu1 %v7077_v2  ;;  %v6857_v2 = vor.u32 %v8335_v44, %v6856_v43  ;;  %v6680_v58 = vld [vmem:[#allocation14 + $0x8] sm:$0xf]  ;;  %v8439_v35 = vld [vmem:[#allocation14 + $0x4b4] sm:$0xf0] }
 0x28e   :  { %v9124_v62 = vpack.c.bf16 %v2786_v63, %v2786_v63  ;;  %v7477_v63 = vor.u32 %v8488_v54, %v7474_v27  ;;  %v7416_v43 = vld [vmem:[#allocation14 + $0x5c8] sm:$0xf]  ;;  %v8475_v44 = vld [vmem:[#allocation14 + $0x5d4] sm:$0xf0]  ;;  %v7273_v46 = vor.u32 %v8439_v35, %v7272_v34  ;;  %v8532_v27 = vld [vmem:[#allocation14 + $0x7a4] sm:$0xf] }
 0x28f   :  { %4503 = vmatpush.bf16.msrb.mxu2 %v7221_v5  ;;  %v8504_v5 = vld [vmem:[#allocation14 + $0x6c4] sm:$0xf]  ;;  %v2713_v12 = vpop.f32.mrf.mxu0  ;;  %v7417_v56 = vor.u32 %v8475_v44, %v7416_v43  ;;  %v7224_v15 = vld [vmem:[#allocation14 + $0x448] sm:$0xf]  ;;  %v8427_v36 = vld [vmem:[#allocation14 + $0x454] sm:$0xf0] }
 0x290   :  { %4428 = vmatmul.bf16.vlgmr.msra.gmra.mxu0 %v9124_v62  ;;  %v7541_v14 = vor.u32 %v8504_v5, %v7538_v9  ;;  %v7458_v9 = vld [vmem:[#allocation14 + $0x630] sm:$0xf0]  ;;  %v7208_v34 = vld [vmem:[#allocation14 + $0x428] sm:$0xf]  ;;  %v8423_v35 = vld [vmem:[#allocation14 + $0x434] sm:$0xf0] }
 0x291   :  { %4518 = vmatpush.bf16.msrb.mxu3 %v7317_v20  ;;  %4524 = vmatpush.bf16.msra.mxu0 %v7557_v1  ;;  %v7304_v20 = vld [vmem:[#allocation14 + $0x4e8] sm:$0xf]  ;;  %v8459_v44 = vld [vmem:[#allocation14 + $0x554] sm:$0xf0] }
 0x292   :  { %4492 = vmatpush.bf16.msrb.mxu1 %v7061_v11  ;;  %v6824_v1 = vld [vmem:[#allocation14 + $0x128] sm:$0xf]  ;;  %v7305_v8 = vor.u32 %v8447_v24, %v7304_v20 }
 0x293   :  { %4504 = vmatpush.bf16.msrb.mxu2 %v7205_v25  ;;  %v6745_v25 = vor.u32 %v8307_v61, %v6744_v10  ;;  %v7288_v10 = vld [vmem:[#allocation14 + $0x4c8] sm:$0xf]  ;;  %v8443_v61 = vld [vmem:[#allocation14 + $0x4d4] sm:$0xf0] }
 0x294   :  { %4519 = vmatmul.bf16.vlgmr.msrb.gmra.mxu3 %v9118_v26  ;;  %v7289_v17 = vor.u32 %v8443_v61, %v7288_v10  ;;  %v7016_v24 = vld [vmem:[#allocation14 + $0x2a8] sm:$0xf]  ;;  %v8467_v10 = vld [vmem:[#allocation14 + $0x594] sm:$0xf0] }
 0x295   :  { %4563 = vmatpush.bf16.msra.mxu3 %v6921_v0  ;;  %4525 = vmatpush.bf16.msra.mxu0 %v7541_v14  ;;  %v6681_v0 = vor.u32 %v8291_v59, %v6680_v58  ;;  %v7461_v14 = vor.u32 %v8484_v28, %v7458_v9  ;;  %v7400_v58 = vld [vmem:[#allocation14 + $0x5a8] sm:$0xf]  ;;  %v8471_v59 = vld [vmem:[#allocation14 + $0x5b4] sm:$0xf0] }
 0x296   :  { %v7384_v9 = vld [vmem:[#allocation14 + $0x588] sm:$0xf] }
 0x297   :  { %4505 = vmatpush.bf16.msrb.mxu2 %v7189_v45  ;;  %v2750_v22 = vpop.f32.mrf.mxu3  ;;  %v7506_v45 = vld [vmem:[#allocation14 + $0x690] sm:$0xf0]  ;;  %v7352_v43 = vld [vmem:[#allocation14 + $0x548] sm:$0xf] }
 0x299   :  { %4564 = vmatpush.bf16.msra.mxu3 %v6905_v13  ;;  %4526 = vmatpush.bf16.msra.mxu0 %v7525_v29 }
 0x29a   :  { %4506 = vmatmul.bf16.vlgmr.msrb.gmra.mxu2 %v9108_v41 }
 0x29b   :  { %4550 = vmatpush.bf16.msra.mxu2 %v6793_v39  ;;  %v7509_v39 = vor.u32 %v8496_v30, %v7506_v45  ;;  %v7048_v30 = vld [vmem:[#allocation14 + $0x2e8] sm:$0xf]  ;;  %v7682_v45 = vld [vmem:[#allocation14 + $0x7f0] sm:$0xf0] }
 0x29c   :  { %v7049_v42 = vor.u32 %v8383_v31, %v7048_v30  ;;  %v8524_v30 = vld [vmem:[#allocation14 + $0x764] sm:$0xf]  ;;  %v6984_v31 = vld [vmem:[#allocation14 + $0x268] sm:$0xf] }
 0x29d   :  { %4565 = vmatpush.bf16.msra.mxu3 %v6889_v16  ;;  %v2737_v37 = vpop.f32.mrf.mxu2  ;;  %4527 = vmatpush.bf16.msra.mxu0 %v7509_v39  ;;  %v8479_v16 = vld [vmem:[#allocation14 + $0x5f4] sm:$0xf0] }
 0x29e   :  { %v2738_v60 = vadd.f32 %v2737_v37, %v1075_v48  ;;  %v7433_v39 = vor.u32 %v8479_v16, %v7432_v19  ;;  %v8379_v48 = vld [vmem:[#allocation14 + $0x2d4] sm:$0xf0] }
 0x29f   :  { %4551 = vmatpush.bf16.msra.mxu2 %v6777_v52  ;;  %v2752_v49 = vpop.f32.mrf.mxu3  ;;  %v6697_v52 = vor.u32 %v8295_v23, %v6696_v47  ;;  %v8536_v47 = vld [vmem:[#allocation14 + $0x7c4] sm:$0xf]  ;;  %v7032_v23 = vld [vmem:[#allocation14 + $0x2c8] sm:$0xf]  ;;  %v8463_v19 = vld [vmem:[#allocation14 + $0x574] sm:$0xf0] }
 0x2a0   :  { %4480 = vmatmul.bf16.vlgmr.msrb.gmra.mxu0 %v9104_v50  ;;  %v2751_v11 = vadd.f32 %v2750_v22, %v2738_v60  ;;  %v7033_v57 = vor.u32 %v8379_v48, %v7032_v23  ;;  %v8375_v60 = vld [vmem:[#allocation14 + $0x2b4] sm:$0xf0]  ;;  %v6968_v23 = vld [vmem:[#allocation14 + $0x248] sm:$0xf] }
 0x2a1   :  { %4566 = vmatpush.bf16.msra.mxu3 %v6873_v38  ;;  %v2776_v55 = vpop.f32.mrf.mxu1  ;;  %4528 = vmatpush.bf16.msra.mxu0 %v7493_v53  ;;  %v7256_v53 = vld [vmem:[#allocation14 + $0x488] sm:$0xf]  ;;  %v8363_v48 = vld [vmem:[#allocation14 + $0x254] sm:$0xf0] }
 0x2a3   :  { %4552 = vmatpush.bf16.msra.mxu2 %v6761_v4  ;;  %v8327_v4 = vld [vmem:[#allocation14 + $0x134] sm:$0xf0] }
 0x2a4   :  { %v6825_v12 = vor.u32 %v8327_v4, %v6824_v1  ;;  %v8431_v1 = vld [vmem:[#allocation14 + $0x474] sm:$0xf0]  ;;  %v7401_v4 = vor.u32 %v8471_v59, %v7400_v58  ;;  %v6969_v58 = vor.u32 %v8363_v48, %v6968_v23  ;;  %v7336_v59 = vld [vmem:[#allocation14 + $0x528] sm:$0xf]  ;;  %v8305_v48 = vld [vmem:[#allocation14 + $0x8c] sm:$0xf] }
 0x2a5   :  { %4567 = vmatpush.bf16.msra.mxu3 %v6857_v2  ;;  %v2739_v5 = vpop.f32.mrf.mxu2  ;;  %4529 = vmatpush.bf16.msra.mxu0 %v7477_v63  ;;  %v7666_v2 = vld [vmem:[#allocation14 + $0x7d0] sm:$0xf0]  ;;  %v8411_v23 = vld [vmem:[#allocation14 + $0x3d4] sm:$0xf0] }
 0x2a6   :  { %v7650_v63 = vld [vmem:[#allocation14 + $0x7b0] sm:$0xf0] }
 0x2a7   :  { %4553 = vmatpush.bf16.msra.mxu2 %v6745_v25  ;;  %v2763_v13 = vpop.f32.mrf.mxu0  ;;  %v8480_v25 = vld [vmem:[#allocation14 + $0x604] sm:$0xf]  ;;  %v7653_v61 = vor.u32 %v8532_v27, %v7650_v63  ;;  %v6794_v27 = vld [vmem:[#allocation14 + $0xf8] sm:$0xf0]  ;;  %v8359_v63 = vld [vmem:[#allocation14 + $0x234] sm:$0xf0] }
 0x2a8   :  { %v2764_v7 = vadd.f32 %v2763_v13, %v2751_v11  ;;  %v7445_v38 = vor.u32 %v8480_v25, %v7442_v18  ;;  %v7000_v13 = vld [vmem:[#allocation14 + $0x288] sm:$0xf]  ;;  %v7634_v25 = vld [vmem:[#allocation14 + $0x790] sm:$0xf0] }
 0x2a9   :  { %4568 = vmatpush.bf16.msra.mxu3 %v6841_v21  ;;  %v2778_v29 = vpop.f32.mrf.mxu1  ;;  %4530 = vmatpush.bf16.msra.mxu0 %v7461_v14  ;;  %v3052_v21 = vld [vmem:[%s9234_s8] sm:$0xf]  ;;  %v8371_v14 = vld [vmem:[#allocation14 + $0x294] sm:$0xf0] }
 0x2aa   :  { %v2777_v22 = vadd.f32 %v2776_v55, %v2764_v7  ;;  %v7669_v55 = vor.u32 %v8536_v47, %v7666_v2  ;;  %v3054_v28 = vperm.slane %v3052_v21, 0  ;;  %v7385_v7 = vor.u32 %v8467_v10, %v7384_v9  ;;  %v7368_v18 = vld [vmem:[#allocation14 + $0x568] sm:$0xf]  ;;  %v8520_v47 = vld [vmem:[#allocation14 + $0x744] sm:$0xf] }
 0x2ab   :  { %4554 = vmatpush.bf16.msra.mxu2 %v6729_v3  ;;  %v8540_v3 = vld [vmem:[#allocation14 + $0x7e4] sm:$0xf]  ;;  %v7602_v2 = vld [vmem:[#allocation14 + $0x750] sm:$0xf0]  ;;  %v6952_v21 = vld [vmem:[#allocation14 + $0x228] sm:$0xf] }
 0x2ac   :  { %v7685_v37 = vor.u32 %v8540_v3, %v7682_v45  ;;  %v7225_v3 = vor.u32 %v8427_v36, %v7224_v15  ;;  %v7618_v45 = vld [vmem:[#allocation14 + $0x770] sm:$0xf0]  ;;  %v6953_v10 = vor.u32 %v8359_v63, %v6952_v21  ;;  %v8355_v36 = vld [vmem:[#allocation14 + $0x214] sm:$0xf0]  ;;  %v6730_v21 = vld [vmem:[#allocation14 + $0x78] sm:$0xf0] }
 0x2ad   :  { %4569 = vmatpush.bf16.msra.mxu3 %v6825_v12  ;;  %4531 = vmatpush.bf16.msra.mxu0 %v7445_v38  ;;  %v8528_v12 = vld [vmem:[#allocation14 + $0x784] sm:$0xf]  ;;  %v7369_v38 = vor.u32 %v8463_v19, %v7368_v18  ;;  %v7176_v19 = vld [vmem:[#allocation14 + $0x3e8] sm:$0xf] }
 0x2ae   :  { %v7637_v29 = vor.u32 %v8528_v12, %v7634_v25  ;;  %v6936_v12 = vld [vmem:[#allocation14 + $0x208] sm:$0xf] }
 0x2af   :  { %4555 = vmatpush.bf16.msra.mxu2 %v6713_v40  ;;  %v2787_v40 = vmax.f32 %v2777_v22, 0.0  ;;  %v2765_v54 = vpop.f32.mrf.mxu0  ;;  %v8367_v22 = vld [vmem:[#allocation14 + $0x274] sm:$0xf0] }
 0x2b0   :  { %4532 = vmatmul.bf16.vlgmr.msra.gmra.mxu0 %v9124_v62 }
 0x2b1   :  { %v9131_v49 = vpack.c.bf16 %v2787_v40, %v2787_v40  ;;  %4570 = vmatpush.bf16.msra.mxu3 %v6809_v32  ;;  %4576 = vmatpush.bf16.msrb.mxu0 %v7049_v42  ;;  %v6985_v40 = vor.u32 %v8367_v22, %v6984_v31  ;;  %v8415_v31 = vld [vmem:[#allocation14 + $0x3f4] sm:$0xf0]  ;;  %v8309_v22 = vld [vmem:[#allocation14 + $0xac] sm:$0xf] }
 0x2b3   :  { %4556 = vmatpush.bf16.msra.mxu2 %v6697_v52  ;;  %v8435_v52 = vld [vmem:[#allocation14 + $0x494] sm:$0xf0]  ;;  %4441 = vmatmul.bf16.vlgmr.msra.gmra.mxu1 %v9131_v49 }
 0x2b4   :  { %4537 = vmatpush.bf16.msra.mxu1 %v7685_v37  ;;  %v7257_v20 = vor.u32 %v8435_v52, %v7256_v53  ;;  %4571 = vmatmul.bf16.vlgmr.msra.gmra.mxu3 %v9086_v33  ;;  %v7621_v37 = vor.u32 %v8524_v30, %v7618_v45  ;;  %v7192_v53 = vld [vmem:[#allocation14 + $0x408] sm:$0xf]  ;;  %v8419_v52 = vld [vmem:[#allocation14 + $0x414] sm:$0xf0] }
 0x2b5   :  { %4615 = vmatpush.bf16.msrb.mxu3 %v7433_v39  ;;  %4577 = vmatpush.bf16.msrb.mxu0 %v7033_v57  ;;  %v8317_v57 = vld [vmem:[#allocation14 + $0xec] sm:$0xf] }
 0x2b7   :  { %4557 = vmatpush.bf16.msra.mxu2 %v6681_v0  ;;  %v7240_v0 = vld [vmem:[#allocation14 + $0x468] sm:$0xf]  ;;  %v4364_v5 = vpop.f32.mrf.mxu3 }
 0x2b8   :  { %4538 = vmatpush.bf16.msra.mxu1 %v7669_v55  ;;  %v7241_v11 = vor.u32 %v8431_v1, %v7240_v0  ;;  %v8455_v55 = vld [vmem:[#allocation14 + $0x534] sm:$0xf0]  ;;  %v6797_v0 = vor.u32 %v8317_v57, %v6794_v27  ;;  %v8516_v1 = vld [vmem:[#allocation14 + $0x724] sm:$0xf]  ;;  %v6890_v57 = vld [vmem:[#allocation14 + $0x1b8] sm:$0xf0] }
 0x2b9   :  { %4616 = vmatpush.bf16.msrb.mxu3 %v7417_v56  ;;  %v7353_v56 = vor.u32 %v8459_v44, %v7352_v43  ;;  %v7177_v43 = vor.u32 %v8415_v31, %v7176_v19  ;;  %v8495_v19 = vld [vmem:[#allocation14 + $0x674] sm:$0xf0] }
 0x2ba   :  { %4558 = vmatmul.bf16.vlgmr.msra.gmra.mxu2 %v9091_v51 }
 0x2bb   :  { %4602 = vmatpush.bf16.msrb.mxu2 %v7305_v8  ;;  %v7017_v8 = vor.u32 %v8375_v60, %v7016_v24  ;;  %v7605_v24 = vor.u32 %v8520_v47, %v7602_v2  ;;  %v7193_v60 = vor.u32 %v8419_v52, %v7192_v53  ;;  %v8507_v47 = vld [vmem:[#allocation14 + $0x6d4] sm:$0xf0]  ;;  %v6746_v2 = vld [vmem:[#allocation14 + $0x98] sm:$0xf0] }
 0x2bc   :  { %4539 = vmatpush.bf16.msra.mxu1 %v7653_v61  ;;  %v8512_v61 = vld [vmem:[#allocation14 + $0x704] sm:$0xf] }
 0x2bd   :  { %4617 = vmatpush.bf16.msrb.mxu3 %v7401_v4  ;;  %4578 = vmatpush.bf16.msrb.mxu0 %v7017_v8  ;;  %v4351_v16 = vpop.f32.mrf.mxu2  ;;  %v7586_v4 = vld [vmem:[#allocation14 + $0x730] sm:$0xf0]  ;;  %v8313_v8 = vld [vmem:[#allocation14 + $0xcc] sm:$0xf] }
 0x2be   :  { %v4352_v32 = vadd.f32 %v4351_v16, %v3054_v28  ;;  %v6778_v28 = vld [vmem:[#allocation14 + $0xd8] sm:$0xf0]  ;;  %v7589_v15 = vor.u32 %v8516_v1, %v7586_v4  ;;  %v7560_v16 = vld [vmem:[#allocation14 + $0x6e8] sm:$0xf]  ;;  %v8337_v1 = vld [vmem:[#allocation14 + $0x18c] sm:$0xf] }
 0x2bf   :  { %4603 = vmatpush.bf16.msrb.mxu2 %v7289_v17  ;;  %v7001_v17 = vor.u32 %v8371_v14, %v7000_v13  ;;  %v4366_v39 = vpop.f32.mrf.mxu3  ;;  %v7320_v13 = vld [vmem:[#allocation14 + $0x508] sm:$0xf]  ;;  %v8451_v14 = vld [vmem:[#allocation14 + $0x514] sm:$0xf0]  ;;  %v6781_v18 = vor.u32 %v8313_v8, %v6778_v28  ;;  %v6874_v4 = vld [vmem:[#allocation14 + $0x198] sm:$0xf0] }
 0x2c0   :  { %v4365_v42 = vadd.f32 %v4364_v5, %v4352_v32  ;;  %4540 = vmatpush.bf16.msra.mxu1 %v7637_v29  ;;  %v7337_v5 = vor.u32 %v8455_v55, %v7336_v59  ;;  %v8511_v29 = vld [vmem:[#allocation14 + $0x6f4] sm:$0xf0]  ;;  %v7321_v30 = vor.u32 %v8451_v14, %v7320_v13  ;;  %v6762_v32 = vld [vmem:[#allocation14 + $0xb8] sm:$0xf0]  ;;  %v7144_v59 = vld [vmem:[#allocation14 + $0x3a8] sm:$0xf]  ;;  %v6877_v13 = vor.u32 %v8337_v1, %v6874_v4 }
 0x2c1   :  { %4618 = vmatpush.bf16.msrb.mxu3 %v7385_v7  ;;  %4579 = vmatpush.bf16.msrb.mxu0 %v7001_v17  ;;  %v4390_v54 = vpop.f32.mrf.mxu1  ;;  %v8349_v7 = vld [vmem:[#allocation14 + $0x1ec] sm:$0xf]  ;;  %v6922_v17 = vld [vmem:[#allocation14 + $0x1f8] sm:$0xf0]  ;;  %v7561_v39 = vor.u32 %v8511_v29, %v7560_v16  ;;  %v6765_v44 = vor.u32 %v8309_v22, %v6762_v32  ;;  %v7528_v55 = vld [vmem:[#allocation14 + $0x6a8] sm:$0xf] }
 0x2c2   :  { %v7128_v28 = vld [vmem:[#allocation14 + $0x388] sm:$0xf]  ;;  %v8399_v16 = vld [vmem:[#allocation14 + $0x374] sm:$0xf0]  ;;  %v8293_v29 = vld [vmem:[#allocation14 + $0x2c] sm:$0xf] }
 0x2c3   :  { %4604 = vmatpush.bf16.msrb.mxu2 %v7273_v46  ;;  %v7209_v46 = vor.u32 %v8423_v35, %v7208_v34  ;;  %4493 = vmatmul.bf16.vlgmr.msrb.gmra.mxu1 %v9100_v6  ;;  %v6937_v34 = vor.u32 %v8355_v36, %v6936_v12  ;;  %v6925_v35 = vor.u32 %v8349_v7, %v6922_v17  ;;  %v6714_v12 = vld [vmem:[#allocation14 + $0x58] sm:$0xf0]  ;;  %v7112_v17 = vld [vmem:[#allocation14 + $0x368] sm:$0xf]  ;;  %v8329_v32 = vld [vmem:[#allocation14 + $0x14c] sm:$0xf] }
 0x2c4   :  { %4541 = vmatpush.bf16.msra.mxu1 %v7621_v37  ;;  %v7160_v37 = vld [vmem:[#allocation14 + $0x3c8] sm:$0xf]  ;;  %v8321_v4 = vld [vmem:[#allocation14 + $0x10c] sm:$0xf] }
 0x2c5   :  { %4619 = vmatpush.bf16.msrb.mxu3 %v7369_v38  ;;  %4580 = vmatpush.bf16.msrb.mxu0 %v6985_v40  ;;  %v8345_v40 = vld [vmem:[#allocation14 + $0x1cc] sm:$0xf]  ;;  %v7161_v27 = vor.u32 %v8411_v23, %v7160_v37  ;;  %v7448_v1 = vld [vmem:[#allocation14 + $0x608] sm:$0xf] }
 0x2c6   :  { %v8289_v37 = vld [vmem:[#allocation14 + $0xc] sm:$0xf] }
 0x2c7   :  { %4605 = vmatpush.bf16.msrb.mxu2 %v7257_v20  ;;  %v4353_v20 = vpop.f32.mrf.mxu2  ;;  %v4377_v9 = vpop.f32.mrf.mxu0  ;;  %v8445_v23 = vld [vmem:[#allocation14 + $0x4ec] sm:$0xf] }
 0x2c8   :  { %v4378_v25 = vadd.f32 %v4377_v9, %v4365_v42  ;;  %4542 = vmatpush.bf16.msra.mxu1 %v7605_v24  ;;  %v6906_v42 = vld [vmem:[#allocation14 + $0x1d8] sm:$0xf0]  ;;  %v8503_v20 = vld [vmem:[#allocation14 + $0x6b4] sm:$0xf0]  ;;  %v7512_v9 = vld [vmem:[#allocation14 + $0x688] sm:$0xf] }
 0x2c9   :  { %4620 = vmatpush.bf16.msrb.mxu3 %v7353_v56  ;;  %4581 = vmatpush.bf16.msrb.mxu0 %v6969_v58  ;;  %v6909_v52 = vor.u32 %v8345_v40, %v6906_v42  ;;  %v8341_v56 = vld [vmem:[#allocation14 + $0x1ac] sm:$0xf]  ;;  %v6749_v58 = vor.u32 %v8305_v48, %v6746_v2  ;;  %v8407_v24 = vld [vmem:[#allocation14 + $0x3b4] sm:$0xf0]  ;;  %v7096_v40 = vld [vmem:[#allocation14 + $0x348] sm:$0xf] }
 0x2ca   :  { %v9140_v45 = vadd.f32 %v4390_v54, %v4378_v25  ;;  %v6893_v63 = vor.u32 %v8341_v56, %v6890_v57  ;;  %v8333_v25 = vld [vmem:[#allocation14 + $0x16c] sm:$0xf]  ;;  %v7480_v42 = vld [vmem:[#allocation14 + $0x648] sm:$0xf]  ;;  %v7306_v48 = vld [vmem:[#allocation14 + $0x4f8] sm:$0xf0] }
 0x2cb   :  { %4606 = vmatpush.bf16.msrb.mxu2 %v7241_v11  ;;  %v7570_v11 = vld [vmem:[#allocation14 + $0x710] sm:$0xf0]  ;;  %v7464_v56 = vld [vmem:[#allocation14 + $0x628] sm:$0xf]  ;;  %v8487_v57 = vld [vmem:[#allocation14 + $0x634] sm:$0xf0] }
 0x2cc   :  { %4543 = vmatpush.bf16.msra.mxu1 %v7589_v15  ;;  %v7573_v38 = vor.u32 %v8512_v61, %v7570_v11  ;;  %v8403_v61 = vld [vmem:[#allocation14 + $0x394] sm:$0xf0]  ;;  %v8297_v11 = vld [vmem:[#allocation14 + $0x4c] sm:$0xf]  ;;  %v6858_v15 = vld [vmem:[#allocation14 + $0x178] sm:$0xf0] }
 0x2cd   :  { %4621 = vmatpush.bf16.msrb.mxu3 %v7337_v5  ;;  %4582 = vmatpush.bf16.msrb.mxu0 %v6953_v10  ;;  %v7145_v5 = vor.u32 %v8407_v24, %v7144_v59  ;;  %v8499_v10 = vld [vmem:[#allocation14 + $0x694] sm:$0xf0]  ;;  %v7129_v36 = vor.u32 %v8403_v61, %v7128_v28  ;;  %v6717_v7 = vor.u32 %v8297_v11, %v6714_v12  ;;  %v7290_v24 = vld [vmem:[#allocation14 + $0x4d8] sm:$0xf0]  ;;  %v7688_v11 = vld [vmem:[#allocation14 + $0x7e8] sm:$0xf] }
 0x2ce   :  { %v7513_v14 = vor.u32 %v8499_v10, %v7512_v9  ;;  %v8391_v59 = vld [vmem:[#allocation14 + $0x334] sm:$0xf0]  ;;  %v8477_v9 = vld [vmem:[#allocation14 + $0x5ec] sm:$0xf]  ;;  %v7434_v10 = vld [vmem:[#allocation14 + $0x5f8] sm:$0xf0] }
 0x2cf   :  { %4607 = vmatpush.bf16.msrb.mxu2 %v7225_v3  ;;  %v4392_v3 = vpop.f32.mrf.mxu1  ;;  %v4379_v53 = vpop.f32.mrf.mxu0  ;;  %v8483_v28 = vld [vmem:[#allocation14 + $0x614] sm:$0xf0]  ;;  %v8381_v12 = vld [vmem:[#allocation14 + $0x2ec] sm:$0xf] }
 0x2d0   :  { %4544 = vmatpush.bf16.msra.mxu1 %v7573_v38  ;;  %v6698_v3 = vld [vmem:[#allocation14 + $0x38] sm:$0xf0]  ;;  %v7113_v38 = vor.u32 %v8399_v16, %v7112_v17  ;;  %v8325_v53 = vld [vmem:[#allocation14 + $0x12c] sm:$0xf]  ;;  %v7437_v17 = vor.u32 %v8477_v9, %v7434_v10  ;;  %v8527_v10 = vld [vmem:[#allocation14 + $0x774] sm:$0xf0] }
 0x2d1   :  { %4622 = vmatpush.bf16.msrb.mxu3 %v7321_v30  ;;  %4583 = vmatpush.bf16.msrb.mxu0 %v6937_v34  ;;  %v6861_v30 = vor.u32 %v8333_v25, %v6858_v15  ;;  %v6842_v34 = vld [vmem:[#allocation14 + $0x158] sm:$0xf0]  ;;  %v8543_v25 = vld [vmem:[#allocation14 + $0x7f4] sm:$0xf0]  ;;  %v8437_v15 = vld [vmem:[#allocation14 + $0x4ac] sm:$0xf] }
 0x2d2   :  { %v8473_v16 = vld [vmem:[#allocation14 + $0x5cc] sm:$0xf]  ;;  %v6986_v9 = vld [vmem:[#allocation14 + $0x278] sm:$0xf0] }
 0x2d3   :  { %4608 = vmatpush.bf16.msrb.mxu2 %v7209_v46  ;;  %v7544_v46 = vld [vmem:[#allocation14 + $0x6c8] sm:$0xf]  ;;  %4545 = vmatmul.bf16.vlgmr.msra.gmra.mxu1 %v9131_v49 }
 0x2d4   :  { %v7545_v54 = vor.u32 %v8507_v47, %v7544_v46  ;;  %4589 = vmatpush.bf16.msrb.mxu1 %v7177_v43  ;;  %4584 = vmatmul.bf16.vlgmr.msrb.gmra.mxu0 %v9104_v50  ;;  %v8491_v43 = vld [vmem:[#allocation14 + $0x654] sm:$0xf0]  ;;  %v6682_v46 = vld [vmem:[#allocation14 + $0x18] sm:$0xf0]  ;;  %v6845_v47 = vor.u32 %v8329_v32, %v6842_v34 }
 0x2d5   :  { %4667 = vmatpush.bf16.msra.mxu3 %v6925_v35  ;;  %4628 = vmatpush.bf16.msra.mxu0 %v7561_v39  ;;  %v6701_v39 = vor.u32 %v8293_v29, %v6698_v3  ;;  %v7481_v2 = vor.u32 %v8491_v43, %v7480_v42  ;;  %v7418_v29 = vld [vmem:[#allocation14 + $0x5d8] sm:$0xf0]  ;;  %v7689_v3 = vor.u32 %v8543_v25, %v7688_v11  ;;  %v8539_v34 = vld [vmem:[#allocation14 + $0x7d4] sm:$0xf0]  ;;  %v8469_v42 = vld [vmem:[#allocation14 + $0x5ac] sm:$0xf] }
 0x2d6   :  { %4623 = vmatmul.bf16.vlgmr.msrb.gmra.mxu3 %v9118_v26  ;;  %v7034_v32 = vld [vmem:[#allocation14 + $0x2d8] sm:$0xf0] }
 0x2d7   :  { %4609 = vmatpush.bf16.msrb.mxu2 %v7193_v60  ;;  %v8301_v60 = vld [vmem:[#allocation14 + $0x6c] sm:$0xf]  ;;  %v7402_v43 = vld [vmem:[#allocation14 + $0x5b8] sm:$0xf0] }
 0x2d8   :  { %4590 = vmatpush.bf16.msrb.mxu1 %v7161_v27  ;;  %v6733_v8 = vor.u32 %v8301_v60, %v6730_v21  ;;  %v7309_v27 = vor.u32 %v8445_v23, %v7306_v48  ;;  %v7465_v21 = vor.u32 %v8487_v57, %v7464_v56  ;;  %v7018_v23 = vld [vmem:[#allocation14 + $0x2b8] sm:$0xf0]  ;;  %v8535_v48 = vld [vmem:[#allocation14 + $0x7b4] sm:$0xf0] }
 0x2d9   :  { %4668 = vmatpush.bf16.msra.mxu3 %v6909_v52  ;;  %4629 = vmatpush.bf16.msra.mxu0 %v7545_v54  ;;  %v6826_v52 = vld [vmem:[#allocation14 + $0x138] sm:$0xf0]  ;;  %v6685_v54 = vor.u32 %v8289_v37, %v6682_v46  ;;  %v7656_v46 = vld [vmem:[#allocation14 + $0x7a8] sm:$0xf] }
 0x2da   :  { %4610 = vmatmul.bf16.vlgmr.msrb.gmra.mxu2 %v9108_v41  ;;  %v7386_v56 = vld [vmem:[#allocation14 + $0x598] sm:$0xf0]  ;;  %v7657_v57 = vor.u32 %v8535_v48, %v7656_v46  ;;  %v8557_v48 = vld [vmem:[#allocation16 + $0x64] sm:$0xf0] }
 0x2db   :  { %4654 = vmatpush.bf16.msra.mxu2 %v6797_v0  ;;  %v7529_v0 = vor.u32 %v8503_v20, %v7528_v55  ;;  %v6829_v55 = vor.u32 %v8325_v53, %v6826_v52  ;;  %v8441_v20 = vld [vmem:[#allocation14 + $0x4cc] sm:$0xf]  ;;  %v7242_v53 = vld [vmem:[#allocation14 + $0x478] sm:$0xf0]  ;;  %v7405_v52 = vor.u32 %v8469_v42, %v7402_v43 }
 0x2dc   :  { %4591 = vmatpush.bf16.msrb.mxu1 %v7145_v5  ;;  %v6810_v5 = vld [vmem:[#allocation14 + $0x118] sm:$0xf0]  ;;  %v7293_v61 = vor.u32 %v8441_v20, %v7290_v24  ;;  %v8531_v20 = vld [vmem:[#allocation14 + $0x794] sm:$0xf0]  ;;  %v8357_v42 = vld [vmem:[#allocation14 + $0x22c] sm:$0xf] }
 0x2dd   :  { %4669 = vmatpush.bf16.msra.mxu3 %v6893_v63  ;;  %4630 = vmatpush.bf16.msra.mxu0 %v7529_v0  ;;  %v4403_v31 = vpop.f32.mrf.mxu2  ;;  %v7064_v63 = vld [vmem:[#allocation14 + $0x308] sm:$0xf]  ;;  %v8387_v0 = vld [vmem:[#allocation14 + $0x314] sm:$0xf0]  ;;  %v7226_v24 = vld [vmem:[#allocation14 + $0x458] sm:$0xf0] }
 0x2de   :  { %v9147_v35 = vadd.f32 %v4403_v31, %v9140_v45  ;;  %v7672_v31 = vld [vmem:[#allocation14 + $0x7c8] sm:$0xf]  ;;  %v7210_v11 = vld [vmem:[#allocation14 + $0x438] sm:$0xf0] }
 0x2df   :  { %4655 = vmatpush.bf16.msra.mxu2 %v6781_v18  ;;  %v7496_v18 = vld [vmem:[#allocation14 + $0x668] sm:$0xf]  ;;  %v7354_v25 = vld [vmem:[#allocation14 + $0x558] sm:$0xf0] }
 0x2e0   :  { %v7497_v22 = vor.u32 %v8495_v19, %v7496_v18  ;;  %4592 = vmatpush.bf16.msrb.mxu1 %v7129_v36  ;;  %v7274_v36 = vld [vmem:[#allocation14 + $0x4b8] sm:$0xf0]  ;;  %v7065_v18 = vor.u32 %v8387_v0, %v7064_v63  ;;  %v8461_v63 = vld [vmem:[#allocation14 + $0x56c] sm:$0xf] }
 0x2e1   :  { %4670 = vmatpush.bf16.msra.mxu3 %v6877_v13  ;;  %4631 = vmatpush.bf16.msra.mxu0 %v7513_v14  ;;  %v7050_v13 = vld [vmem:[#allocation14 + $0x2f8] sm:$0xf0]  ;;  %v6813_v14 = vor.u32 %v8321_v4, %v6810_v5 }
 0x2e2   :  { %v7053_v19 = vor.u32 %v8381_v12, %v7050_v13  ;;  %v7370_v0 = vld [vmem:[#allocation14 + $0x578] sm:$0xf0] }
 0x2e3   :  { %4656 = vmatpush.bf16.msra.mxu2 %v6765_v44  ;;  %v8395_v44 = vld [vmem:[#allocation14 + $0x354] sm:$0xf0]  ;;  %v7373_v12 = vor.u32 %v8461_v63, %v7370_v0  ;;  %v6954_v43 = vld [vmem:[#allocation14 + $0x238] sm:$0xf0]  ;;  %v7736_v63 = vld [vmem:[#allocation16 + $0x50] sm:$0xf] }
 0x2e4   :  { %4593 = vmatpush.bf16.msrb.mxu1 %v7113_v38  ;;  %v7097_v45 = vor.u32 %v8395_v44, %v7096_v40  ;;  %v8433_v38 = vld [vmem:[#allocation14 + $0x48c] sm:$0xf]  ;;  %v7673_v44 = vor.u32 %v8539_v34, %v7672_v31  ;;  %v7752_v31 = vld [vmem:[#allocation16 + $0x70] sm:$0xf]  ;;  %v8555_v0 = vld [vmem:[#allocation16 + $0x54] sm:$0xf0] }
 0x2e5   :  { %4671 = vmatpush.bf16.msra.mxu3 %v6861_v30  ;;  %4632 = vmatpush.bf16.msra.mxu0 %v7497_v22  ;;  %v4405_v60 = vpop.f32.mrf.mxu2  ;;  %v7277_v30 = vor.u32 %v8437_v15, %v7274_v36  ;;  %v8377_v22 = vld [vmem:[#allocation14 + $0x2cc] sm:$0xf] }
 0x2e6   :  { %v7037_v40 = vor.u32 %v8377_v22, %v7034_v32  ;;  %v8559_v22 = vld [vmem:[#allocation16 + $0x74] sm:$0xf0]  ;;  %v8453_v34 = vld [vmem:[#allocation14 + $0x52c] sm:$0xf] }
 0x2e7   :  { %4657 = vmatpush.bf16.msra.mxu2 %v6749_v58  ;;  %v7080_v58 = vld [vmem:[#allocation14 + $0x328] sm:$0xf]  ;;  %v7753_v46 = vor.u32 %v8559_v22, %v7752_v31  ;;  %v8551_v31 = vld [vmem:[#allocation16 + $0x34] sm:$0xf0]  ;;  %v7808_v22 = vld [vmem:[#allocation16 + $0xe0] sm:$0xf] }
 0x2e8   :  { %4594 = vmatpush.bf16.msrb.mxu1 %v7097_v45 }
 0x2e9   :  { %4672 = vmatpush.bf16.msra.mxu3 %v6845_v47  ;;  %4633 = vmatpush.bf16.msra.mxu0 %v7481_v2  ;;  %v8373_v47 = vld [vmem:[#allocation14 + $0x2ac] sm:$0xf] }
 0x2ea   :  { %v8429_v2 = vld [vmem:[#allocation14 + $0x46c] sm:$0xf]  ;;  %v7021_v45 = vor.u32 %v8373_v47, %v7018_v23  ;;  %v7744_v23 = vld [vmem:[#allocation16 + $0x60] sm:$0xf] }
 0x2eb   :  { %4658 = vmatpush.bf16.msra.mxu2 %v6733_v8  ;;  %v7081_v8 = vor.u32 %v8391_v59, %v7080_v58  ;;  %v7640_v58 = vld [vmem:[#allocation14 + $0x788] sm:$0xf]  ;;  %v8369_v59 = vld [vmem:[#allocation14 + $0x28c] sm:$0xf] }
 0x2ec   :  { %v7641_v4 = vor.u32 %v8531_v20, %v7640_v58  ;;  %v8515_v58 = vld [vmem:[#allocation14 + $0x714] sm:$0xf0]  ;;  %v7745_v20 = vor.u32 %v8557_v48, %v7744_v23  ;;  %v7800_v23 = vld [vmem:[#allocation16 + $0xd0] sm:$0xf] }
 0x2ed   :  { %4673 = vmatpush.bf16.msra.mxu3 %v6829_v55  ;;  %4634 = vmatpush.bf16.msra.mxu0 %v7465_v21  ;;  %v7002_v55 = vld [vmem:[#allocation14 + $0x298] sm:$0xf0]  ;;  %v8571_v48 = vld [vmem:[#allocation16 + $0xd4] sm:$0xf0] }
 0x2ee   :  { %4595 = vmatpush.bf16.msrb.mxu1 %v7081_v8  ;;  %v7005_v21 = vor.u32 %v8369_v59, %v7002_v55  ;;  %v7624_v8 = vld [vmem:[#allocation14 + $0x768] sm:$0xf]  ;;  %v8509_v59 = vld [vmem:[#allocation14 + $0x6ec] sm:$0xf]  ;;  %v7562_v55 = vld [vmem:[#allocation14 + $0x6f8] sm:$0xf0] }
 0x2ef   :  { %4659 = vmatpush.bf16.msra.mxu2 %v6717_v7  ;;  %v7449_v7 = vor.u32 %v8483_v28, %v7448_v1  ;;  %v8365_v28 = vld [vmem:[#allocation14 + $0x26c] sm:$0xf]  ;;  %v7625_v36 = vor.u32 %v8527_v10, %v7624_v8 }
 0x2f0   :  { %v6989_v13 = vor.u32 %v8365_v28, %v6986_v9  ;;  %v8505_v28 = vld [vmem:[#allocation14 + $0x6cc] sm:$0xf]  ;;  %v7546_v9 = vld [vmem:[#allocation14 + $0x6d8] sm:$0xf0] }
 0x2f1   :  { %4674 = vmatpush.bf16.msra.mxu3 %v6813_v14  ;;  %4635 = vmatpush.bf16.msra.mxu0 %v7449_v7  ;;  %v8457_v14 = vld [vmem:[#allocation14 + $0x54c] sm:$0xf] }
 0x2f2   :  { %4596 = vmatpush.bf16.msrb.mxu1 %v7065_v18  ;;  %v8361_v18 = vld [vmem:[#allocation14 + $0x24c] sm:$0xf] }
 0x2f3   :  { %4660 = vmatpush.bf16.msra.mxu2 %v6701_v39  ;;  %v7258_v39 = vld [vmem:[#allocation14 + $0x498] sm:$0xf0]  ;;  %v8409_v10 = vld [vmem:[#allocation14 + $0x3cc] sm:$0xf] }
 0x2f4   :  { %v7261_v37 = vor.u32 %v8433_v38, %v7258_v39  ;;  %4636 = vmatmul.bf16.vlgmr.msra.gmra.mxu0 %v9124_v62  ;;  %4675 = vmatmul.bf16.vlgmr.msra.gmra.mxu3 %v9086_v33  ;;  %v8425_v33 = vld [vmem:[#allocation14 + $0x44c] sm:$0xf]  ;;  %v7338_v38 = vld [vmem:[#allocation14 + $0x538] sm:$0xf0] }
 0x2f5   :  { %4719 = vmatpush.bf16.msrb.mxu3 %v7437_v17  ;;  %4680 = vmatpush.bf16.msrb.mxu0 %v7053_v19  ;;  %v7229_v5 = vor.u32 %v8425_v33, %v7226_v24  ;;  %v9155_v15 = vpop.f32.mrf.mxu3  ;;  %v7608_v17 = vld [vmem:[#allocation14 + $0x748] sm:$0xf]  ;;  %v6970_v19 = vld [vmem:[#allocation14 + $0x258] sm:$0xf0]  ;;  %v7341_v47 = vor.u32 %v8453_v34, %v7338_v38  ;;  %v8413_v24 = vld [vmem:[#allocation14 + $0x3ec] sm:$0xf] }
 0x2f6   :  { %4641 = vmatpush.bf16.msra.mxu1 %v7689_v3  ;;  %v7194_v3 = vld [vmem:[#allocation14 + $0x418] sm:$0xf0]  ;;  %v6973_v32 = vor.u32 %v8361_v18, %v6970_v19 }
 0x2f7   :  { %4661 = vmatpush.bf16.msra.mxu2 %v6685_v54  ;;  %4597 = vmatmul.bf16.vlgmr.msrb.gmra.mxu1 %v9100_v6  ;;  %v8465_v54 = vld [vmem:[#allocation14 + $0x58c] sm:$0xf]  ;;  %v7530_v18 = vld [vmem:[#allocation14 + $0x6b8] sm:$0xf0] }
 0x2f8   :  { %v7389_v60 = vor.u32 %v8465_v54, %v7386_v56  ;;  %v7576_v56 = vld [vmem:[#allocation14 + $0x708] sm:$0xf] }
 0x2f9   :  { %4681 = vmatpush.bf16.msrb.mxu0 %v7037_v40 }
 0x2fa   :  { %4662 = vmatmul.bf16.vlgmr.msra.gmra.mxu2 %v9091_v51  ;;  %v7421_v51 = vor.u32 %v8473_v16, %v7418_v29  ;;  %4642 = vmatpush.bf16.msra.mxu1 %v7673_v44  ;;  %v8523_v16 = vld [vmem:[#allocation14 + $0x754] sm:$0xf0]  ;;  %v8417_v29 = vld [vmem:[#allocation14 + $0x40c] sm:$0xf]  ;;  %v7592_v44 = vld [vmem:[#allocation14 + $0x728] sm:$0xf] }
 0x2fb   :  { %4706 = vmatpush.bf16.msrb.mxu2 %v7309_v27  ;;  %v7245_v27 = vor.u32 %v8429_v2, %v7242_v53  ;;  %v7197_v40 = vor.u32 %v8417_v29, %v7194_v3  ;;  %v6957_v2 = vor.u32 %v8357_v42, %v6954_v43  ;;  %v8449_v53 = vld [vmem:[#allocation14 + $0x50c] sm:$0xf]  ;;  %v7146_v29 = vld [vmem:[#allocation14 + $0x3b8] sm:$0xf0]  ;;  %v7712_v43 = vld [vmem:[#allocation16 + $0x20] sm:$0xf] }
 0x2fc   :  { %4720 = vmatpush.bf16.msrb.mxu3 %v7421_v51  ;;  %v7609_v51 = vor.u32 %v8523_v16, %v7608_v17  ;;  %v8501_v17 = vld [vmem:[#allocation14 + $0x6ac] sm:$0xf] }
 0x2fd   :  { %4682 = vmatpush.bf16.msrb.mxu0 %v7021_v45  ;;  %v9153_v1 = vpop.f32.mrf.mxu2  ;;  %v4418_v45 = vpop.f32.mrf.mxu3  ;;  %v8405_v16 = vld [vmem:[#allocation14 + $0x3ac] sm:$0xf]  ;;  %v7533_v34 = vor.u32 %v8501_v17, %v7530_v18  ;;  %v7466_v17 = vld [vmem:[#allocation14 + $0x638] sm:$0xf0] }
 0x2fe   :  { %4643 = vmatpush.bf16.msra.mxu1 %v7657_v57  ;;  %v8353_v57 = vld [vmem:[#allocation14 + $0x20c] sm:$0xf]  ;;  %v7149_v38 = vor.u32 %v8405_v16, %v7146_v29  ;;  %v7498_v45 = vld [vmem:[#allocation14 + $0x678] sm:$0xf0] }
 0x2ff   :  { %4707 = vmatpush.bf16.msrb.mxu2 %v7293_v61  ;;  %v8421_v61 = vld [vmem:[#allocation14 + $0x42c] sm:$0xf]  ;;  %v7082_v16 = vld [vmem:[#allocation14 + $0x338] sm:$0xf0] }
 0x300   :  { %4721 = vmatpush.bf16.msrb.mxu3 %v7405_v52  ;;  %v7213_v7 = vor.u32 %v8421_v61, %v7210_v11  ;;  %v7322_v52 = vld [vmem:[#allocation14 + $0x518] sm:$0xf0]  ;;  %v7737_v11 = vor.u32 %v8555_v0, %v7736_v63  ;;  %v8393_v0 = vld [vmem:[#allocation14 + $0x34c] sm:$0xf] }
 0x301   :  { %4683 = vmatpush.bf16.msrb.mxu0 %v7005_v21  ;;  %v7325_v33 = vor.u32 %v8449_v53, %v7322_v52  ;;  %v7162_v61 = vld [vmem:[#allocation14 + $0x3d8] sm:$0xf0]  ;;  %v8493_v52 = vld [vmem:[#allocation14 + $0x66c] sm:$0xf] }
 0x302   :  { %4644 = vmatpush.bf16.msra.mxu1 %v7641_v4  ;;  %v7577_v4 = vor.u32 %v8515_v58, %v7576_v56  ;;  %v8397_v56 = vld [vmem:[#allocation14 + $0x36c] sm:$0xf]  ;;  %v7704_v58 = vld [vmem:[#allocation16 + $0x10] sm:$0xf] }
 0x303   :  { %4708 = vmatpush.bf16.msrb.mxu2 %v7277_v30  ;;  %v7357_v30 = vor.u32 %v8457_v14, %v7354_v25  ;;  %v7816_v14 = vld [vmem:[#allocation16 + $0xf0] sm:$0xf]  ;;  %v7549_v25 = vor.u32 %v8505_v28, %v7546_v9  ;;  %v8545_v28 = vld [vmem:[#allocation16 + $0x4] sm:$0xf0] }
 0x304   :  { %4722 = vmatpush.bf16.msrb.mxu3 %v7389_v60  ;;  %v7178_v60 = vld [vmem:[#allocation14 + $0x3f8] sm:$0xf0]  ;;  %v7784_v9 = vld [vmem:[#allocation16 + $0xb0] sm:$0xf] }
 0x305   :  { %4684 = vmatpush.bf16.msrb.mxu0 %v6989_v13  ;;  %v4457_v39 = vpop.f32.mrf.mxu2  ;;  %v7181_v8 = vor.u32 %v8413_v24, %v7178_v60  ;;  %v8553_v13 = vld [vmem:[#allocation16 + $0x44] sm:$0xf0]  ;;  %v8489_v60 = vld [vmem:[#allocation14 + $0x64c] sm:$0xf] }
 0x306   :  { %4645 = vmatpush.bf16.msra.mxu1 %v7625_v36  ;;  %v8575_v36 = vld [vmem:[#allocation16 + $0xf4] sm:$0xf0]  ;;  %v8497_v39 = vld [vmem:[#allocation14 + $0x68c] sm:$0xf] }
 0x307   :  { %4709 = vmatpush.bf16.msrb.mxu2 %v7261_v37  ;;  %v8519_v37 = vld [vmem:[#allocation14 + $0x734] sm:$0xf0]  ;;  %v7817_v19 = vor.u32 %v8575_v36, %v7816_v14 }
 0x308   :  { %4723 = vmatpush.bf16.msrb.mxu3 %v7373_v12  ;;  %v7593_v54 = vor.u32 %v8519_v37, %v7592_v44  ;;  %v7728_v12 = vld [vmem:[#allocation16 + $0x40] sm:$0xf]  ;;  %v8549_v44 = vld [vmem:[#allocation16 + $0x24] sm:$0xf0]  ;;  %v8567_v14 = vld [vmem:[#allocation16 + $0xb4] sm:$0xf0] }
 0x309   :  { %4685 = vmatpush.bf16.msrb.mxu0 %v6973_v32  ;;  %v7729_v3 = vor.u32 %v8553_v13, %v7728_v12  ;;  %v8573_v32 = vld [vmem:[#allocation16 + $0xe4] sm:$0xf0]  ;;  %v8558_v12 = vld [vmem:[#allocation16 + $0x74] sm:$0xf]  ;;  %v7754_v13 = vld [vmem:[#allocation16 + $0x78] sm:$0xf0]  ;;  %v7785_v18 = vor.u32 %v8567_v14, %v7784_v9 }
 0x30a   :  { %4646 = vmatpush.bf16.msra.mxu1 %v7609_v51  ;;  %v7514_v51 = vld [vmem:[#allocation14 + $0x698] sm:$0xf0] }
 0x30b   :  { %4710 = vmatpush.bf16.msrb.mxu2 %v7245_v27  ;;  %v6938_v27 = vld [vmem:[#allocation14 + $0x218] sm:$0xf0] }
 0x30c   :  { %4724 = vmatpush.bf16.msrb.mxu3 %v7357_v30  ;;  %v6941_v21 = vor.u32 %v8353_v57, %v6938_v27  ;;  %v7720_v30 = vld [vmem:[#allocation16 + $0x30] sm:$0xf]  ;;  %v7114_v57 = vld [vmem:[#allocation14 + $0x378] sm:$0xf0]  ;;  %v7713_v27 = vor.u32 %v8549_v44, %v7712_v43 }
 0x30d   :  { %4686 = vmatpush.bf16.msrb.mxu0 %v6957_v2  ;;  %v7721_v42 = vor.u32 %v8551_v31, %v7720_v30  ;;  %v9163_v37 = vpop.f32.mrf.mxu0  ;;  %v7117_v24 = vor.u32 %v8397_v56, %v7114_v57  ;;  %v7776_v30 = vld [vmem:[#allocation16 + $0xa0] sm:$0xf]  ;;  %v8565_v31 = vld [vmem:[#allocation16 + $0xa4] sm:$0xf0]  ;;  %v7690_v43 = vld [vmem:[#allocation14 + $0x7f8] sm:$0xf0] }
 0x30e   :  { %4647 = vmatpush.bf16.msra.mxu1 %v7593_v54  ;;  %v7801_v54 = vor.u32 %v8571_v48, %v7800_v23  ;;  %v7658_v9 = vld [vmem:[#allocation14 + $0x7b8] sm:$0xf0] }
 0x30f   :  { %4711 = vmatpush.bf16.msrb.mxu2 %v7229_v5  ;;  %v7565_v5 = vor.u32 %v8509_v59, %v7562_v55  ;;  %v8547_v59 = vld [vmem:[#allocation16 + $0x14] sm:$0xf0]  ;;  %v7792_v55 = vld [vmem:[#allocation16 + $0xc0] sm:$0xf] }
 0x310   :  { %4725 = vmatpush.bf16.msrb.mxu3 %v7341_v47  ;;  %v7517_v47 = vor.u32 %v8497_v39, %v7514_v51  ;;  %v8481_v39 = vld [vmem:[#allocation14 + $0x60c] sm:$0xf]  ;;  %v7450_v51 = vld [vmem:[#allocation14 + $0x618] sm:$0xf0] }
 0x311   :  { %4687 = vmatpush.bf16.msrb.mxu0 %v6941_v21  ;;  %v7482_v21 = vld [vmem:[#allocation14 + $0x658] sm:$0xf0]  ;;  %v7453_v48 = vor.u32 %v8481_v39, %v7450_v51  ;;  %v8568_v51 = vld [vmem:[#allocation16 + $0xc4] sm:$0xf] }
 0x312   :  { %4648 = vmatpush.bf16.msra.mxu1 %v7577_v4  ;;  %v7098_v4 = vld [vmem:[#allocation14 + $0x358] sm:$0xf0] }
 0x313   :  { %4712 = vmatpush.bf16.msrb.mxu2 %v7213_v7  ;;  %v7165_v7 = vor.u32 %v8409_v10, %v7162_v61  ;;  %v7101_v36 = vor.u32 %v8393_v0, %v7098_v4  ;;  %v7706_v39 = vld [vmem:[#allocation16 + $0x18] sm:$0xf0] }
 0x314   :  { %4726 = vmatpush.bf16.msrb.mxu3 %v7325_v33  ;;  %4688 = vmatmul.bf16.vlgmr.msrb.gmra.mxu0 %v9104_v50  ;;  %v7130_v50 = vld [vmem:[#allocation14 + $0x398] sm:$0xf0]  ;;  %v8569_v33 = vld [vmem:[#allocation16 + $0xc4] sm:$0xf0] }
 0x315   :  { %4732 = vmatpush.bf16.msra.mxu0 %v7565_v5  ;;  %4649 = vmatmul.bf16.vlgmr.msra.gmra.mxu1 %v9131_v49  ;;  %v7793_v63 = vor.u32 %v8569_v33, %v7792_v55  ;;  %v7705_v5 = vor.u32 %v8547_v59, %v7704_v58  ;;  %v4431_v10 = vpop.f32.mrf.mxu0  ;;  %v7674_v58 = vld [vmem:[#allocation14 + $0x7d8] sm:$0xf0]  ;;  %v8552_v55 = vld [vmem:[#allocation16 + $0x44] sm:$0xf]  ;;  %v8561_v33 = vld [vmem:[#allocation16 + $0x84] sm:$0xf0] }
 0x316   :  { %4693 = vmatpush.bf16.msrb.mxu1 %v7181_v8  ;;  %v7696_v8 = vld [vmem:[#allocation16] sm:$0xf] }
 0x317   :  { %4713 = vmatpush.bf16.msrb.mxu2 %v7197_v40  ;;  %4727 = vmatmul.bf16.vlgmr.msrb.gmra.mxu3 %v9118_v26  ;;  %v7809_v26 = vor.u32 %v8573_v32, %v7808_v22  ;;  %v8401_v40 = vld [vmem:[#allocation14 + $0x38c] sm:$0xf]  ;;  %v7697_v29 = vor.u32 %v8545_v28, %v7696_v8  ;;  %v8556_v32 = vld [vmem:[#allocation16 + $0x64] sm:$0xf] }
 0x318   :  { %5169 = vmatpush.bf16.msra.mxu3 %v7817_v19  ;;  %v7133_v53 = vor.u32 %v8401_v40, %v7130_v50  ;;  %v8389_v19 = vld [vmem:[#allocation14 + $0x32c] sm:$0xf]  ;;  %v7066_v50 = vld [vmem:[#allocation14 + $0x318] sm:$0xf0] }
 0x319   :  { %4733 = vmatpush.bf16.msra.mxu0 %v7549_v25  ;;  %v8385_v40 = vld [vmem:[#allocation14 + $0x30c] sm:$0xf] }
 0x31a   :  { %4714 = vmatmul.bf16.vlgmr.msrb.gmra.mxu2 %v9108_v41  ;;  %v9158_v41 = vpop.f32.mrf.mxu3  ;;  %4694 = vmatpush.bf16.msrb.mxu1 %v7165_v7  ;;  %v8485_v7 = vld [vmem:[#allocation14 + $0x62c] sm:$0xf] }
 0x31b   :  { %5156 = vmatpush.bf16.msra.mxu2 %v7753_v46  ;;  %v7469_v22 = vor.u32 %v8485_v7, %v7466_v17  ;;  %v7810_v8 = vld [vmem:[#allocation16 + $0xe8] sm:$0xf0]  ;;  %v7642_v17 = vld [vmem:[#allocation14 + $0x798] sm:$0xf0] }
 0x31c   :  { %5170 = vmatpush.bf16.msra.mxu3 %v7809_v26  ;;  %v7777_v26 = vor.u32 %v8565_v31, %v7776_v30  ;;  %v8533_v28 = vld [vmem:[#allocation14 + $0x7ac] sm:$0xf] }
 0x31d   :  { %4734 = vmatpush.bf16.msra.mxu0 %v7533_v34  ;;  %v9165_v2 = vpop.f32.mrf.mxu2  ;;  %v7746_v34 = vld [vmem:[#allocation16 + $0x68] sm:$0xf0] }
 0x31e   :  { %4695 = vmatpush.bf16.msrb.mxu1 %v7149_v38  ;;  %v7085_v38 = vor.u32 %v8389_v19, %v7082_v16  ;;  %v7749_v44 = vor.u32 %v8556_v32, %v7746_v34  ;;  %v8529_v7 = vld [vmem:[#allocation14 + $0x78c] sm:$0xf]  ;;  %v8570_v16 = vld [vmem:[#allocation16 + $0xd4] sm:$0xf] }
 0x31f   :  { %5157 = vmatpush.bf16.msra.mxu2 %v7745_v20  ;;  %v7501_v20 = vor.u32 %v8493_v52, %v7498_v45  ;;  %v7738_v52 = vld [vmem:[#allocation16 + $0x58] sm:$0xf0]  ;;  %v8563_v45 = vld [vmem:[#allocation16 + $0x94] sm:$0xf0]  ;;  %v7714_v19 = vld [vmem:[#allocation16 + $0x28] sm:$0xf0] }
 0x320   :  { %5171 = vmatpush.bf16.msra.mxu3 %v7801_v54  ;;  %v7069_v54 = vor.u32 %v8385_v40, %v7066_v50  ;;  %v8525_v34 = vld [vmem:[#allocation14 + $0x76c] sm:$0xf] }
 0x321   :  { %4735 = vmatpush.bf16.msra.mxu0 %v7517_v47  ;;  %v9169_v47 = vpop.f32.mrf.mxu0  ;;  %v7794_v40 = vld [vmem:[#allocation16 + $0xc8] sm:$0xf0] }
 0x322   :  { %v4470_v46 = vpop.f32.mrf.mxu3  ;;  %4696 = vmatpush.bf16.msrb.mxu1 %v7133_v53  ;;  %v8554_v53 = vld [vmem:[#allocation16 + $0x54] sm:$0xf] }
 0x323   :  { %5158 = vmatpush.bf16.msra.mxu2 %v7737_v11  ;;  %v7485_v11 = vor.u32 %v8489_v60, %v7482_v21  ;;  %v7768_v46 = vld [vmem:[#allocation16 + $0x90] sm:$0xf]  ;;  %v7741_v59 = vor.u32 %v8554_v53, %v7738_v52  ;;  %v8574_v21 = vld [vmem:[#allocation16 + $0xf4] sm:$0xf]  ;;  %v8544_v52 = vld [vmem:[#allocation16 + $0x4] sm:$0xf] }
 0x324   :  { %5172 = vmatpush.bf16.msra.mxu3 %v7793_v63  ;;  %v7769_v56 = vor.u32 %v8563_v45, %v7768_v46  ;;  %v7818_v63 = vld [vmem:[#allocation16 + $0xf8] sm:$0xf0]  ;;  %v7698_v45 = vld [vmem:[#allocation16 + $0x8] sm:$0xf0] }
 0x325   :  { %4736 = vmatpush.bf16.msra.mxu0 %v7501_v20  ;;  %v4509_v25 = vpop.f32.mrf.mxu2  ;;  %v7760_v20 = vld [vmem:[#allocation16 + $0x80] sm:$0xf]  ;;  %v7821_v0 = vor.u32 %v8574_v21, %v7818_v63  ;;  %v8517_v63 = vld [vmem:[#allocation14 + $0x72c] sm:$0xf] }
 0x326   :  { %4697 = vmatpush.bf16.msrb.mxu1 %v7117_v24  ;;  %v7730_v24 = vld [vmem:[#allocation16 + $0x48] sm:$0xf0]  ;;  %v7761_v60 = vor.u32 %v8561_v33, %v7760_v20  ;;  %v7661_v25 = vor.u32 %v8533_v28, %v7658_v9  ;;  %v8564_v20 = vld [vmem:[#allocation16 + $0xa4] sm:$0xf] }
 0x327   :  { %5159 = vmatpush.bf16.msra.mxu2 %v7729_v3  ;;  %v7757_v3 = vor.u32 %v8558_v12, %v7754_v13  ;;  %v7733_v10 = vor.u32 %v8552_v55, %v7730_v24  ;;  %v8550_v12 = vld [vmem:[#allocation16 + $0x34] sm:$0xf]  ;;  %v7722_v13 = vld [vmem:[#allocation16 + $0x38] sm:$0xf0]  ;;  %v7778_v33 = vld [vmem:[#allocation16 + $0xa8] sm:$0xf0] }
 0x328   :  { %5173 = vmatpush.bf16.msra.mxu3 %v7785_v18  ;;  %v8548_v18 = vld [vmem:[#allocation16 + $0x24] sm:$0xf]  ;;  %v8513_v9 = vld [vmem:[#allocation14 + $0x70c] sm:$0xf] }
 0x329   :  { %4737 = vmatpush.bf16.msra.mxu0 %v7485_v11  ;;  %v4483_v11 = vpop.f32.mrf.mxu0 }
 0x32a   :  { %v9167_v61 = vpop.f32.mrf.mxu3  ;;  %4698 = vmatpush.bf16.msrb.mxu1 %v7101_v36  ;;  %v4417_v36 = vadd.f32 %v9155_v15, %v9147_v35  ;;  %v7717_v35 = vor.u32 %v8548_v18, %v7714_v19  ;;  %v8546_v15 = vld [vmem:[#allocation16 + $0x14] sm:$0xf] }
 0x32b   :  { %5160 = vmatpush.bf16.msra.mxu2 %v7721_v42  ;;  %v8541_v42 = vld [vmem:[#allocation14 + $0x7ec] sm:$0xf]  ;;  %v7709_v53 = vor.u32 %v8546_v15, %v7706_v39  ;;  %v7856_v39 = vld [vmem:[#allocation16 + $0x140] sm:$0xf] }
 0x32c   :  { %5174 = vmatpush.bf16.msra.mxu3 %v7777_v26  ;;  %v7693_v57 = vor.u32 %v8541_v42, %v7690_v43  ;;  %v7626_v26 = vld [vmem:[#allocation14 + $0x778] sm:$0xf0]  ;;  %v7797_v43 = vor.u32 %v8568_v51, %v7794_v40  ;;  %v8585_v51 = vld [vmem:[#allocation16 + $0x144] sm:$0xf0] }
 0x32d   :  { %4738 = vmatpush.bf16.msra.mxu0 %v7469_v22  ;;  %v7645_v22 = vor.u32 %v8529_v7, %v7642_v17 }
 0x32e   :  { %4699 = vmatpush.bf16.msrb.mxu1 %v7085_v38 }
 0x32f   :  { %5161 = vmatpush.bf16.msra.mxu2 %v7713_v27  ;;  %v8537_v27 = vld [vmem:[#allocation14 + $0x7cc] sm:$0xf] }
 0x330   :  { %5175 = vmatpush.bf16.msra.mxu3 %v7769_v56  ;;  %v7677_v4 = vor.u32 %v8537_v27, %v7674_v58  ;;  %v4442_v30 = vpop.f32.mrf.mxu1  ;;  %v7786_v56 = vld [vmem:[#allocation16 + $0xb8] sm:$0xf0] }
 0x331   :  { %4739 = vmatpush.bf16.msra.mxu0 %v7453_v48  ;;  %v9176_v38 = vpop.f32.mrf.mxu0  ;;  %v7610_v48 = vld [vmem:[#allocation14 + $0x758] sm:$0xf0] }
 0x332   :  { %v4522_v23 = vpop.f32.mrf.mxu3  ;;  %4700 = vmatpush.bf16.msrb.mxu1 %v7069_v54  ;;  %v8566_v54 = vld [vmem:[#allocation16 + $0xb4] sm:$0xf] }
 0x333   :  { %5162 = vmatpush.bf16.msra.mxu2 %v7705_v5  ;;  %v8572_v5 = vld [vmem:[#allocation16 + $0xe4] sm:$0xf]  ;;  %v8521_v23 = vld [vmem:[#allocation14 + $0x74c] sm:$0xf]  ;;  %v7789_v27 = vor.u32 %v8566_v54, %v7786_v56 }
 0x334   :  { %4740 = vmatmul.bf16.vlgmr.msra.gmra.mxu0 %v9124_v62  ;;  %5176 = vmatpush.bf16.msra.mxu3 %v7761_v60  ;;  %v7813_v14 = vor.u32 %v8572_v5, %v7810_v8  ;;  %v7725_v62 = vor.u32 %v8550_v12, %v7722_v13  ;;  %v7613_v55 = vor.u32 %v8521_v23, %v7610_v48  ;;  %v8562_v12 = vld [vmem:[#allocation16 + $0x94] sm:$0xf]  ;;  %v7770_v13 = vld [vmem:[#allocation16 + $0x98] sm:$0xf0] }
 0x335   :  { %4701 = vmatmul.bf16.vlgmr.msrb.gmra.mxu1 %v9100_v6  ;;  %v4430_v6 = vadd.f32 %v9163_v37, %v4417_v36  ;;  %v9181_v37 = vld [vmem:[%s9234_s8] sm:$0xf]  ;;  %v7781_v8 = vor.u32 %v8564_v20, %v7778_v33  ;;  %v7773_v7 = vor.u32 %v8562_v12, %v7770_v13  ;;  %v8590_v20 = vld [vmem:[#allocation16 + $0x174] sm:$0xf]  ;;  %v7882_v33 = vld [vmem:[#allocation16 + $0x178] sm:$0xf0] }
 0x336   :  { %4745 = vmatpush.bf16.msra.mxu1 %v7693_v57  ;;  %v3056_v42 = vperm.slane %v9181_v37, 2  ;;  %v3055_v24 = vperm.slane %v9181_v37, 1  ;;  %v7858_v12 = vld [vmem:[#allocation16 + $0x148] sm:$0xf0] }
 0x337   :  { %5163 = vmatpush.bf16.msra.mxu2 %v7697_v29  ;;  %v7802_v29 = vld [vmem:[#allocation16 + $0xd8] sm:$0xf0]  ;;  %v4443_v32 = vadd.f32 %v4442_v30, %v4430_v6  ;;  %v7762_v6 = vld [vmem:[#allocation16 + $0x88] sm:$0xf0]  ;;  %v7872_v30 = vld [vmem:[#allocation16 + $0x160] sm:$0xf] }
 0x338   :  { %5221 = vmatpush.bf16.msrb.mxu3 %v7821_v0  ;;  %v4444_v58 = vpop.f32.mrf.mxu1  ;;  %v7594_v0 = vld [vmem:[#allocation14 + $0x738] sm:$0xf0]  ;;  %v4456_v11 = vadd.f32 %v9153_v1, %v3055_v24 }
 0x339   :  { %v4758_v50 = vmax.f32 %v4443_v32, 0.0  ;;  %v4535_v5 = vpop.f32.mrf.mxu0  ;;  %v7597_v28 = vor.u32 %v8517_v63, %v7594_v0  ;;  %v7824_v58 = vld [vmem:[#allocation16 + $0x100] sm:$0xf]  ;;  %v7885_v63 = vor.u32 %v8590_v20, %v7882_v33  ;;  %v8588_v0 = vld [vmem:[#allocation16 + $0x164] sm:$0xf] }
 0x33a   :  { %4746 = vmatpush.bf16.msra.mxu1 %v7677_v4  ;;  %v7701_v4 = vor.u32 %v8544_v52, %v7698_v45  ;;  %v4469_v36 = vadd.f32 %v9158_v41, %v4456_v11  ;;  %v8581_v52 = vld [vmem:[#allocation16 + $0x124] sm:$0xf0]  ;;  %v8584_v11 = vld [vmem:[#allocation16 + $0x144] sm:$0xf] }
 0x33b   :  { %5208 = vmatpush.bf16.msrb.mxu2 %v7757_v3  ;;  %v7805_v3 = vor.u32 %v8570_v16, %v7802_v29  ;;  %v4762_v46 = vpack.c.bf16 %v4758_v50, %v4758_v50  ;;  %v8560_v29 = vld [vmem:[#allocation16 + $0x84] sm:$0xf]  ;;  %v8597_v33 = vld [vmem:[#allocation16 + $0x1a4] sm:$0xf0] }
 0x33c   :  { %5222 = vmatpush.bf16.msrb.mxu3 %v7813_v14  ;;  %v7880_v14 = vld [vmem:[#allocation16 + $0x170] sm:$0xf]  ;;  %v4482_v16 = vadd.f32 %v9169_v47, %v4469_v36  ;;  %v8587_v47 = vld [vmem:[#allocation16 + $0x154] sm:$0xf0] }
 0x33d   :  { %v4559_v31 = vpop.f32.mrf.mxu2  ;;  %5164 = vmatmul.bf16.vlgmr.msra.gmra.mxu2 %v4762_v46 }
 0x33e   :  { %4747 = vmatpush.bf16.msra.mxu1 %v7661_v25  ;;  %v4560_v57 = vadd.f32 %v4559_v31, %v3056_v42  ;;  %v8591_v25 = vld [vmem:[#allocation16 + $0x174] sm:$0xf0]  ;;  %v8589_v31 = vld [vmem:[#allocation16 + $0x164] sm:$0xf0] }
 0x33f   :  { %5209 = vmatpush.bf16.msrb.mxu2 %v7749_v44  ;;  %v7629_v44 = vor.u32 %v8525_v34, %v7626_v26  ;;  %v7881_v17 = vor.u32 %v8591_v25, %v7880_v14  ;;  %v7864_v34 = vld [vmem:[#allocation16 + $0x150] sm:$0xf]  ;;  %v7861_v14 = vor.u32 %v8584_v11, %v7858_v12  ;;  %v3057_v25 = vperm.slane %v9181_v37, 3  ;;  %v8576_v37 = vld [vmem:[#allocation16 + $0x104] sm:$0xf] }
 0x340   :  { %5223 = vmatpush.bf16.msrb.mxu3 %v7805_v3  ;;  %v7765_v3 = vor.u32 %v8560_v29, %v7762_v6  ;;  %v7842_v29 = vld [vmem:[#allocation16 + $0x128] sm:$0xf0]  ;;  %v8606_v12 = vld [vmem:[#allocation16 + $0x1f4] sm:$0xf] }
 0x341   :  { %5182 = vmatpush.bf16.msrb.mxu0 %v7881_v17  ;;  %v7850_v17 = vld [vmem:[#allocation16 + $0x138] sm:$0xf0] }
 0x342   :  { %4748 = vmatpush.bf16.msra.mxu1 %v7645_v22  ;;  %v7873_v22 = vor.u32 %v8589_v31, %v7872_v30 }
 0x343   :  { %5210 = vmatpush.bf16.msrb.mxu2 %v7741_v59  ;;  %v4572_v59 = vpop.f32.mrf.mxu3 }
 0x344   :  { %5224 = vmatpush.bf16.msrb.mxu3 %v7797_v43  ;;  %v9185_v60 = vadd.f32 %v4572_v59, %v4560_v57  ;;  %v7848_v43 = vld [vmem:[#allocation16 + $0x130] sm:$0xf] }
 0x345   :  { %v4561_v21 = vpop.f32.mrf.mxu2  ;;  %5183 = vmatpush.bf16.msrb.mxu0 %v7873_v22  ;;  %v7834_v22 = vld [vmem:[#allocation16 + $0x118] sm:$0xf0] }
 0x346   :  { %4749 = vmatpush.bf16.msra.mxu1 %v7629_v44  ;;  %v8583_v44 = vld [vmem:[#allocation16 + $0x134] sm:$0xf0] }
 0x347   :  { %5211 = vmatpush.bf16.msrb.mxu2 %v7733_v10  ;;  %v7578_v10 = vld [vmem:[#allocation14 + $0x718] sm:$0xf0]  ;;  %v7849_v23 = vor.u32 %v8583_v44, %v7848_v43 }
 0x348   :  { %5225 = vmatpush.bf16.msrb.mxu3 %v7789_v27  ;;  %v7581_v19 = vor.u32 %v8513_v9, %v7578_v10  ;;  %v8579_v27 = vld [vmem:[#allocation16 + $0x114] sm:$0xf0] }
 0x34a   :  { %4750 = vmatpush.bf16.msra.mxu1 %v7613_v55  ;;  %v8577_v55 = vld [vmem:[#allocation16 + $0x104] sm:$0xf0] }
 0x34b   :  { %5212 = vmatpush.bf16.msrb.mxu2 %v7725_v62  ;;  %v4494_v62 = vpop.f32.mrf.mxu1  ;;  %v4574_v18 = vpop.f32.mrf.mxu3  ;;  %v7825_v21 = vor.u32 %v8577_v55, %v7824_v58 }
 0x34c   :  { %5226 = vmatpush.bf16.msrb.mxu3 %v7781_v8  ;;  %v4495_v1 = vadd.f32 %v4494_v62, %v4482_v16  ;;  %v8586_v8 = vld [vmem:[#allocation16 + $0x154] sm:$0xf]  ;;  %v8580_v16 = vld [vmem:[#allocation16 + $0x124] sm:$0xf] }
 0x34e   :  { %4751 = vmatpush.bf16.msra.mxu1 %v7597_v28  ;;  %v4508_v41 = vadd.f32 %v9165_v2, %v4495_v1  ;;  %v7866_v28 = vld [vmem:[#allocation16 + $0x158] sm:$0xf0] }
 0x34f   :  { %5213 = vmatpush.bf16.msrb.mxu2 %v7717_v35  ;;  %v7865_v35 = vor.u32 %v8587_v47, %v7864_v34  ;;  %v7869_v9 = vor.u32 %v8586_v8, %v7866_v28  ;;  %v7826_v34 = vld [vmem:[#allocation16 + $0x108] sm:$0xf0]  ;;  %v7944_v47 = vld [vmem:[#allocation16 + $0x1f0] sm:$0xf] }
 0x350   :  { %5227 = vmatpush.bf16.msrb.mxu3 %v7773_v7  ;;  %v4521_v26 = vadd.f32 %v9167_v61, %v4508_v41  ;;  %v8582_v7 = vld [vmem:[#allocation16 + $0x134] sm:$0xf] }
 0x351   :  { %5184 = vmatpush.bf16.msrb.mxu0 %v7865_v35  ;;  %v9195_v40 = vpop.f32.mrf.mxu0  ;;  %v7853_v62 = vor.u32 %v8582_v7, %v7850_v17  ;;  %v8578_v41 = vld [vmem:[#allocation16 + $0x114] sm:$0xf] }
 0x352   :  { %4752 = vmatpush.bf16.msra.mxu1 %v7581_v19  ;;  %v4534_v2 = vadd.f32 %v9176_v38, %v4521_v26  ;;  %v7832_v38 = vld [vmem:[#allocation16 + $0x110] sm:$0xf]  ;;  %v8607_v26 = vld [vmem:[#allocation16 + $0x1f4] sm:$0xf0]  ;;  %v8602_v17 = vld [vmem:[#allocation16 + $0x1d4] sm:$0xf] }
 0x353   :  { %5214 = vmatpush.bf16.msrb.mxu2 %v7709_v53  ;;  %v4496_v32 = vpop.f32.mrf.mxu1  ;;  %v7840_v53 = vld [vmem:[#allocation16 + $0x120] sm:$0xf]  ;;  %v7833_v59 = vor.u32 %v8579_v27, %v7832_v38  ;;  %v7945_v35 = vor.u32 %v8607_v26, %v7944_v47  ;;  %v8599_v27 = vld [vmem:[#allocation16 + $0x1b4] sm:$0xf0]  ;;  %v8594_v26 = vld [vmem:[#allocation16 + $0x194] sm:$0xf] }
 0x354   :  { %5228 = vmatpush.bf16.msrb.mxu3 %v7765_v3  ;;  %v7841_v54 = vor.u32 %v8581_v52, %v7840_v53  ;;  %v7845_v3 = vor.u32 %v8580_v16, %v7842_v29  ;;  %v7837_v32 = vor.u32 %v8578_v41, %v7834_v22  ;;  %v7922_v16 = vld [vmem:[#allocation16 + $0x1c8] sm:$0xf0]  ;;  %v8596_v22 = vld [vmem:[#allocation16 + $0x1a4] sm:$0xf] }
 0x355   :  { %4753 = vmatmul.bf16.vlgmr.msra.gmra.mxu1 %v9131_v49  ;;  %v7857_v49 = vor.u32 %v8585_v51, %v7856_v39  ;;  %v7829_v51 = vor.u32 %v8576_v37, %v7826_v34  ;;  %v7906_v37 = vld [vmem:[#allocation16 + $0x1a8] sm:$0xf0] }
 0x356   :  { %5195 = vmatpush.bf16.msrb.mxu1 %v7945_v35  ;;  %v7898_v35 = vld [vmem:[#allocation16 + $0x198] sm:$0xf0] }
 0x357   :  { %5215 = vmatpush.bf16.msrb.mxu2 %v7701_v4  ;;  %5185 = vmatpush.bf16.msrb.mxu0 %v7857_v49  ;;  %v7874_v4 = vld [vmem:[#allocation16 + $0x168] sm:$0xf0] }
 0x358   :  { %v7877_v5 = vor.u32 %v8588_v0, %v7874_v4  ;;  %v8595_v0 = vld [vmem:[#allocation16 + $0x194] sm:$0xf0] }
 0x359   :  { %v9198_v61 = vpop.f32.mrf.mxu3  ;;  %v4587_v56 = vpop.f32.mrf.mxu0 }
 0x35a   :  { %5216 = vmatmul.bf16.vlgmr.msrb.gmra.mxu2 %v4762_v46 }
 0x35b   :  { %v4546_v50 = vpop.f32.mrf.mxu1  ;;  %5186 = vmatpush.bf16.msrb.mxu0 %v7849_v23  ;;  %v8603_v23 = vld [vmem:[#allocation16 + $0x1d4] sm:$0xf0] }
 0x35c   :  { %v4547_v42 = vadd.f32 %v4546_v50, %v4534_v2  ;;  %v4586_v2 = vadd.f32 %v9195_v40, %v9185_v60  ;;  %v7936_v50 = vld [vmem:[#allocation16 + $0x1e0] sm:$0xf] }
 0x35d   :  { %v9193_v15 = vpop.f32.mrf.mxu2 }
 0x35e   :  { %v4759_v46 = vmax.f32 %v4547_v42, 0.0  ;;  %v8605_v42 = vld [vmem:[#allocation16 + $0x1e4] sm:$0xf0] }
 0x35f   :  { %5187 = vmatpush.bf16.msrb.mxu0 %v7841_v54  ;;  %v7937_v44 = vor.u32 %v8605_v42, %v7936_v50  ;;  %v8601_v54 = vld [vmem:[#allocation16 + $0x1c4] sm:$0xf0] }
 0x360   :  { %v4763_v48 = vpack.c.bf16 %v4759_v46, %v4759_v46  ;;  %v7928_v46 = vld [vmem:[#allocation16 + $0x1d0] sm:$0xf] }
 0x361   :  { %v4626_v24 = vpop.f32.mrf.mxu3  ;;  %5196 = vmatpush.bf16.msrb.mxu1 %v7937_v44  ;;  %v7929_v53 = vor.u32 %v8603_v23, %v7928_v46 }
 0x362   :  { %5177 = vmatmul.bf16.vlgmr.msra.gmra.mxu3 %v4763_v48 }
 0x363   :  { %v4548_v57 = vpop.f32.mrf.mxu1  ;;  %5188 = vmatpush.bf16.msrb.mxu0 %v7833_v59 }
 0x365   :  { %v4613_v45 = vpop.f32.mrf.mxu2  ;;  %5197 = vmatpush.bf16.msrb.mxu1 %v7929_v53 }
 0x366   :  { %v7920_v45 = vld [vmem:[#allocation16 + $0x1c0] sm:$0xf] }
 0x367   :  { %5189 = vmatpush.bf16.msrb.mxu0 %v7825_v21  ;;  %v7921_v40 = vor.u32 %v8601_v54, %v7920_v45 }
 0x369   :  { %5198 = vmatpush.bf16.msrb.mxu1 %v7921_v40 }
 0x36b   :  { %5234 = vmatpush.bf16.msra.mxu0 %v7885_v63  ;;  %v7896_v63 = vld [vmem:[#allocation16 + $0x190] sm:$0xf] }
 0x36c   :  { %v7897_v8 = vor.u32 %v8595_v0, %v7896_v63 }
 0x36f   :  { %5235 = vmatpush.bf16.msra.mxu0 %v7877_v5 }
 0x371   :  { %v4637_v13 = vpop.f32.mrf.mxu0 }
 0x372   :  { %5229 = vmatmul.bf16.vlgmr.msrb.gmra.mxu3 %v4763_v48 }
 0x373   :  { %5236 = vmatpush.bf16.msra.mxu0 %v7869_v9  ;;  %v7888_v9 = vld [vmem:[#allocation16 + $0x180] sm:$0xf] }
 0x374   :  { %v4598_v36 = vpop.f32.mrf.mxu1 }
 0x375   :  { %v4599_v49 = vadd.f32 %v4598_v36, %v4586_v2  ;;  %v7938_v36 = vld [vmem:[#allocation16 + $0x1e8] sm:$0xf0] }
 0x376   :  { %v7890_v2 = vld [vmem:[#allocation16 + $0x188] sm:$0xf0] }
 0x377   :  { %5237 = vmatpush.bf16.msra.mxu0 %v7861_v14  ;;  %v4676_v19 = vpop.f32.mrf.mxu3  ;;  %v4612_v43 = vadd.f32 %v9193_v15, %v4599_v49  ;;  %v7912_v15 = vld [vmem:[#allocation16 + $0x1b0] sm:$0xf] }
 0x378   :  { %v7913_v59 = vor.u32 %v8599_v27, %v7912_v15 }
 0x379   :  { %v4639_v30 = vpop.f32.mrf.mxu0  ;;  %v4625_v48 = vadd.f32 %v9198_v61, %v4612_v43  ;;  %v7904_v61 = vld [vmem:[#allocation16 + $0x1a0] sm:$0xf] }
 0x37a   :  { %5199 = vmatpush.bf16.msrb.mxu1 %v7913_v59  ;;  %v7905_v21 = vor.u32 %v8597_v33, %v7904_v61  ;;  %v8598_v30 = vld [vmem:[#allocation16 + $0x1b4] sm:$0xf] }
 0x37b   :  { %5238 = vmatpush.bf16.msra.mxu0 %v7853_v62  ;;  %v4638_v56 = vadd.f32 %v4637_v13, %v4625_v48  ;;  %v7946_v13 = vld [vmem:[#allocation16 + $0x1f8] sm:$0xf0] }
 0x37c   :  { %v4600_v31 = vpop.f32.mrf.mxu1  ;;  %v7949_v14 = vor.u32 %v8606_v12, %v7946_v13  ;;  %v7930_v62 = vld [vmem:[#allocation16 + $0x1d8] sm:$0xf0] }
 0x37d   :  { %v4663_v10 = vpop.f32.mrf.mxu2  ;;  %v7914_v31 = vld [vmem:[#allocation16 + $0x1b8] sm:$0xf0] }
 0x37e   :  { %v4664_v18 = vadd.f32 %v4663_v10, %v3057_v25  ;;  %5200 = vmatpush.bf16.msrb.mxu1 %v7905_v21  ;;  %v8593_v10 = vld [vmem:[#allocation16 + $0x184] sm:$0xf0]  ;;  %v8604_v25 = vld [vmem:[#allocation16 + $0x1e4] sm:$0xf]  ;;  %v7917_v41 = vor.u32 %v8598_v30, %v7914_v31 }
 0x37f   :  { %5239 = vmatpush.bf16.msra.mxu0 %v7845_v3  ;;  %v4678_v39 = vpop.f32.mrf.mxu3  ;;  %v7889_v11 = vor.u32 %v8593_v10, %v7888_v9  ;;  %v7941_v7 = vor.u32 %v8604_v25, %v7938_v36 }
 0x380   :  { %v9201_v6 = vadd.f32 %v4676_v19, %v4664_v18  ;;  %v7933_v18 = vor.u32 %v8602_v17, %v7930_v62  ;;  %v8600_v19 = vld [vmem:[#allocation16 + $0x1c4] sm:$0xf]  ;;  %v7901_v39 = vor.u32 %v8594_v26, %v7898_v35 }
 0x382   :  { %5201 = vmatpush.bf16.msrb.mxu1 %v7897_v8 }
 0x383   :  { %5240 = vmatpush.bf16.msra.mxu0 %v7837_v32  ;;  %v7909_v32 = vor.u32 %v8596_v22, %v7906_v37 }
 0x385   :  { %v4665_v1 = vpop.f32.mrf.mxu2 }
 0x386   :  { %5202 = vmatpush.bf16.msrb.mxu1 %v7889_v11  ;;  %v7925_v1 = vor.u32 %v8600_v19, %v7922_v16 }
 0x387   :  { %5241 = vmatpush.bf16.msra.mxu0 %v7829_v51  ;;  %v8592_v51 = vld [vmem:[#allocation16 + $0x184] sm:$0xf] }
 0x388   :  { %v7893_v49 = vor.u32 %v8592_v51, %v7890_v2 }
 0x38a   :  { %5247 = vmatpush.bf16.msra.mxu1 %v7949_v14 }
 0x38e   :  { %5248 = vmatpush.bf16.msra.mxu1 %v7941_v7 }
 0x391   :  { %v9209_v60 = vpop.f32.mrf.mxu0 }
 0x392   :  { %v4650_v57 = vpop.f32.mrf.mxu1  ;;  %5249 = vmatpush.bf16.msra.mxu1 %v7933_v18  ;;  %v4690_v50 = vadd.f32 %v9209_v60, %v9201_v6 }
 0x393   :  { %v4651_v38 = vadd.f32 %v4650_v57, %v4638_v56 }
 0x395   :  { %v4760_v58 = vmax.f32 %v4651_v38, 0.0  ;;  %v4830_v38 = vld [vmem:[%s9236_s10] sm:$0x3]  ;;  %s8901_s10 = smov [#allocation17]  }
 0x396   :  { %5250 = vmatpush.bf16.msra.mxu1 %v7925_v1  ;;  %v4832_v60 = vperm.slane %v4830_v38, 0  ;;  %v4833_v59 = vperm.slane %v4830_v38, 1  ;;  %s5310_s24 = sshll.u32 %s8901_s10, 4  ;;  %s5311_s24 = int_to_ptr.vmem [resolvable:$true] %s5310_s24 }
 0x397   :  { %v4764_v20 = vpack.c.bf16 %v4760_v58, %v4760_v58 }
 0x399   :  { %5190 = vmatmul.bf16.vlgmr.msrb.gmra.mxu0 %v4764_v20  ;;  %v4691_v4 = vpop.f32.mrf.mxu0 }
 0x39a   :  { %v4728_v55 = vpop.f32.mrf.mxu3  ;;  %v4652_v5 = vpop.f32.mrf.mxu1  ;;  %5251 = vmatpush.bf16.msra.mxu1 %v7917_v41 }
 0x39d   :  { %v9207_v52 = vpop.f32.mrf.mxu2 }
 0x39e   :  { %5252 = vmatpush.bf16.msra.mxu1 %v7909_v32 }
 0x3a2   :  { %v4730_v28 = vpop.f32.mrf.mxu3  ;;  %5253 = vmatpush.bf16.msra.mxu1 %v7901_v39 }
 0x3a5   :  { %v4717_v24 = vpop.f32.mrf.mxu2 }
 0x3a6   :  { %5254 = vmatpush.bf16.msra.mxu1 %v7893_v49 }
 0x3a9   :  { %5242 = vmatmul.bf16.vlgmr.msra.gmra.mxu0 %v4764_v20 }
 0x3b1   :  { %v4741_v29 = vpop.f32.mrf.mxu0 }
 0x3b2   :  { %v4702_v3 = vpop.f32.mrf.mxu1 }
 0x3b3   :  { %v4703_v42 = vadd.f32 %v4702_v3, %v4690_v50 }
 0x3b5   :  { %v4716_v44 = vadd.f32 %v9207_v52, %v4703_v42 }
 0x3b7   :  { %v4729_v46 = vadd.f32 %v4728_v55, %v4716_v44 }
 0x3b9   :  { %v4743_v34 = vpop.f32.mrf.mxu0  ;;  %v4742_v48 = vadd.f32 %v4741_v29, %v4729_v46 }
 0x3ba   :  { %v4704_v47 = vpop.f32.mrf.mxu1 }
 0x3c0   :  { %v5165_v43 = vpop.f32.mrf.mxu2 }
 0x3c1   :  { %v5166_v15 = vadd.f32 %v5165_v43, %v4832_v60 }
 0x3c8   :  { %v5167_v23 = vpop.f32.mrf.mxu2 }
 0x3d2   :  { %v4754_v53 = vpop.f32.mrf.mxu1 }
 0x3d3   :  { %v4755_v45 = vadd.f32 %v4754_v53, %v4742_v48 }
 0x3d5   :  { %v4761_v54 = vmax.f32 %v4755_v45, 0.0 }
 0x3d7   :  { %v4765_v56 = vpack.c.bf16 %v4761_v54, %v4761_v54 }
 0x3d9   :  { %5203 = vmatmul.bf16.vlgmr.msrb.gmra.mxu1 %v4765_v56 }
 0x3da   :  { %v4756_v57 = vpop.f32.mrf.mxu1 }
 0x3dd   :  { %v5217_v40 = vpop.f32.mrf.mxu2 }
 0x3de   :  { %v5218_v55 = vadd.f32 %v5217_v40, %v4833_v59 }
 0x3e5   :  { %v5219_v6 = vpop.f32.mrf.mxu2  ;;  %v5178_v27 = vpop.f32.mrf.mxu3 }
 0x3e6   :  { %v5179_v58 = vadd.f32 %v5178_v27, %v5166_v15 }
 0x3e9   :  { %5255 = vmatmul.bf16.vlgmr.msra.gmra.mxu1 %v4765_v56 }
 0x3ed   :  { %v5180_v52 = vpop.f32.mrf.mxu3 }
 0x3f5   :  { %v5230_v20 = vpop.f32.mrf.mxu3 }
 0x3f6   :  { %v5231_v61 = vadd.f32 %v5230_v20, %v5218_v55 }
 0x3fd   :  { %v5232_v33 = vpop.f32.mrf.mxu3 }
 0x416   :  { %v5191_v24 = vpop.f32.mrf.mxu0 }
 0x417   :  { %v5192_v21 = vadd.f32 %v5191_v24, %v5179_v58 }
 0x41e   :  { %v5193_v63 = vpop.f32.mrf.mxu0 }
 0x426   :  { %v5243_v0 = vpop.f32.mrf.mxu0 }
 0x427   :  { %v5244_v11 = vadd.f32 %v5243_v0, %v5231_v61 }
 0x42e   :  { %v5245_v4 = vpop.f32.mrf.mxu0 }
 0x456   :  { %v5204_v5 = vpop.f32.mrf.mxu1 }
 0x457   :  { %v5205_v8 = vadd.f32 %v5204_v5, %v5192_v21 }
 0x459   :  { %v7950_v28 = vmul.f32 -1.442695, %v5205_v8 }
 0x45b   :  { %8624 = vpow2.f32 %v7950_v28 }
 0x45e   :  { %v5206_v9 = vpop.f32.mrf.mxu1 }
 0x461   :  { %v8625_v10 = vpop.eup %8624 }
 0x462   :  { %v5266_v12 = vadd.f32 1.0, %v8625_v10 }
 0x464   :  { %8626 = vrcp.f32 %v5266_v12  ;;  %vm5273_vm2 = vweird.f32 %v5266_v12  ;;  %v5279_v37 = vand.u32 2147483648, %v5266_v12  ;;  %v5277_v34 = vand.u32 2147483647, %v5266_v12 }
 0x466   :  { %v5256_v13 = vpop.f32.mrf.mxu1  ;;  %v5280_v51 = vor.u32 1.1754944e-38, %v5279_v37  ;;  %vm5278_vm8 = vcmp.eq.f32.partialorder %v5277_v34, 8.507059e+37 }
 0x467   :  { %v5257_v14 = vadd.f32 %v5256_v13, %v5244_v11 }
 0x469   :  { %v7951_v25 = vmul.f32 -1.442695, %v5257_v14 }
 0x46a   :  { %v8627_v7 = vpop.eup %8626 }
 0x46b   :  { %8628 = vpow2.f32 %v7951_v25  ;;  %v5269_v18 = vmul.f32 %v8627_v7, %v5266_v12  ;;  %vm5274_vm0 = vweird.f32 %v8627_v7 }
 0x46c   :  { %vm9217_vm3 = vmor %vm5273_vm2, %vm5274_vm0 }
 0x46d   :  { %v5270_v19 = vsub.f32 1.0, %v5269_v18 }
 0x46e   :  { %v5258_v36 = vpop.f32.mrf.mxu1 }
 0x46f   :  { %v5271_v1 = vmul.f32 %v8627_v7, %v5270_v19 }
 0x471   :  { %v8629_v17 = vpop.eup %8628  ;;  %v5272_v31 = vadd.f32 %v8627_v7, %v5271_v1 }
 0x472   :  { %v5267_v62 = vadd.f32 1.0, %v8629_v17 }
 0x473   :  { %v5276_v35 = vsel %vm9217_vm3, %v8627_v7, %v5272_v31 }
 0x474   :  { %8630 = vrcp.f32 %v5267_v62  ;;  %v5294_v30 = vand.u32 2147483648, %v5267_v62  ;;  %v5292_v22 = vand.u32 2147483647, %v5267_v62  ;;  %vm5288_vm4 = vweird.f32 %v5267_v62 }
 0x475   :  { %v5281_v50 = vsel %vm5278_vm8, %v5280_v51, %v5276_v35 }
 0x476   :  { %v5295_v26 = vor.u32 1.1754944e-38, %v5294_v30  ;;  %vm5293_vm6 = vcmp.eq.f32.partialorder %v5292_v22, 8.507059e+37 }
 0x47a   :  { %v8631_v16 = vpop.eup %8630 }
 0x47b   :  { %v5284_v29 = vmul.f32 %v8631_v16, %v5267_v62  ;;  %vm5289_vm1 = vweird.f32 %v8631_v16 }
 0x47c   :  { %vm5290_vm5 = vmor %vm5288_vm4, %vm5289_vm1 }
 0x47d   :  { %v5285_v3 = vsub.f32 1.0, %v5284_v29 }
 0x47f   :  { %v5286_v41 = vmul.f32 %v8631_v16, %v5285_v3 }
 0x481   :  { %v5287_v47 = vadd.f32 %v8631_v16, %v5286_v41 }
 0x483   :  { %v5291_v39 = vsel %vm5290_vm5, %v8631_v16, %v5287_v47 }
 0x484   :  { %v5296_v2 = vsel %vm5293_vm6, %v5295_v26, %v5291_v39 }
 0x485   :  { %v5300_v49 = vrot.slane %v5296_v2, 6 }
 0x487   :  { %v5302_v42 = vsel %vm5301_vm7, %v5281_v50, %v5300_v49 }
 0x488   :  { %5304 = vst [vmem:[#allocation17] sm:$0xf] %v5302_v42 }
 0x489   :  { %5315 = dma.vmem_to_hbm [thread:$0]  %s5311_s24, 64, %s5313_s28, [#allocation4]  }
 0x48a   :  { %8884 = dma.done.wait [#allocation4], 64  }
 0x48b   :  { %8885 = vsyncadd [#allocation4], 4294967232 }
 0x48c   :  { %5320 = vsyncpa [#allocation3], 1 }
 0x48d   :  { %5321 = vsyncpa [#allocation6], 1 }
 0x48e   :  { %5322 = vsyncpa [#allocation9], 1 }
 0x48f   :  { %5323 = vsyncpa [#allocation12], 1 }
 0x490   :  { %5324 = vsyncpa [#allocation15], 1 }
 0x491   :  { %5325 = vsyncpa [#allocation4], 1 }

</bundles_post_ra>
